<compile_context>
chip_gen: v5e
topology: v5e:2x2
jax: 0.10.0
libtpu: 0.0.40
codegen_flags: <defaults>
</compile_context>

<pallas_src>
import functools

import jax
import jax.numpy as jnp
from jax.experimental import pallas as pl
from jax.experimental.pallas import tpu as pltpu

K_SIZE = 4
BN_EPS = 1e-5
LANE = 128
TM_CAP = 1024  # max rows per grid step for matmul / elementwise tiles


def _round_up(n, m):
    return ((n + m - 1) // m) * m


def _pick_tm(m, cap=TM_CAP):
    """Largest row tile: full M if it fits, else the biggest divisor of M that
    is a multiple of 8 and <= cap (falls back to full M)."""
    if m <= cap:
        return m
    for tm in range(cap, 0, -8):
        if m % tm == 0:
            return tm
    return m


# ----------------------------- Pallas kernels ------------------------------

def _mm_bn_kernel(x_ref, w_ref, y_ref, sum_ref, sq_ref):
    """bf16 matmul tile (f32 accumulation) with fused per-channel
    sum / sum-of-squares accumulation for BatchNorm."""
    @pl.when((pl.program_id(0) == 0) & (pl.program_id(1) == 0))
    def _():
        sum_ref[...] = jnp.zeros_like(sum_ref)
        sq_ref[...] = jnp.zeros_like(sq_ref)

    y = jnp.dot(x_ref[...], w_ref[...], preferred_element_type=jnp.float32)
    y_ref[...] = y
    sum_ref[...] += jnp.sum(y, axis=0, keepdims=True)
    sq_ref[...] += jnp.sum(y * y, axis=0, keepdims=True)


def _mm_tanh_kernel(x_ref, w_ref, y_ref):
    y = jnp.dot(x_ref[...], w_ref[...], preferred_element_type=jnp.float32)
    y_ref[...] = jnp.tanh(y)


def _scale_shift_relu_kernel(y_ref, sc_ref, sh_ref, o_ref):
    o_ref[...] = jnp.maximum(y_ref[...] * sc_ref[...] + sh_ref[...],
                             0.0).astype(o_ref.dtype)


def pallas_matmul_bn(patches, weights):
    """Phase-batched matmul with fused BN statistics.

    patches: (Qp, M, K) bf16, Qp == Q or Qp == 1 (shared across phases)
    weights: (Q, K, Np) bf16, Np a multiple of 128
    returns: y (Q, M, Np) f32, col_sum (1, Np) f32, col_sqsum (1, Np) f32
    """
    qp, m, k = patches.shape
    q, _, npad = weights.shape
    tm = _pick_tm(m)
    x_map = (lambda qi, i: (qi, i, 0)) if qp == q else (lambda qi, i: (0, i, 0))
    return pl.pallas_call(
        _mm_bn_kernel,
        out_shape=(jax.ShapeDtypeStruct((q, m, npad), jnp.float32),
                   jax.ShapeDtypeStruct((1, npad), jnp.float32),
                   jax.ShapeDtypeStruct((1, npad), jnp.float32)),
        grid=(q, m // tm),
        in_specs=[pl.BlockSpec((None, tm, k), x_map),
                  pl.BlockSpec((None, k, npad), lambda qi, i: (qi, 0, 0))],
        out_specs=(pl.BlockSpec((None, tm, npad), lambda qi, i: (qi, i, 0)),
                   pl.BlockSpec((1, npad), lambda qi, i: (0, 0)),
                   pl.BlockSpec((1, npad), lambda qi, i: (0, 0))),
        compiler_params=pltpu.CompilerParams(
            dimension_semantics=("arbitrary", "arbitrary")),
    )(patches, weights)


def pallas_matmul_tanh(patches, weights):
    """Phase-batched matmul with fused tanh (final layer, no BN)."""
    qp, m, k = patches.shape
    q, _, npad = weights.shape
    tm = _pick_tm(m)
    x_map = (lambda qi, i: (qi, i, 0)) if qp == q else (lambda qi, i: (0, i, 0))
    return pl.pallas_call(
        _mm_tanh_kernel,
        out_shape=jax.ShapeDtypeStruct((q, m, npad), jnp.float32),
        grid=(q, m // tm),
        in_specs=[pl.BlockSpec((None, tm, k), x_map),
                  pl.BlockSpec((None, k, npad), lambda qi, i: (qi, 0, 0))],
        out_specs=pl.BlockSpec((None, tm, npad), lambda qi, i: (qi, i, 0)),
        compiler_params=pltpu.CompilerParams(
            dimension_semantics=("parallel", "parallel")),
    )(patches, weights)


def pallas_scale_shift_relu(y2d, scale, shift):
    """Fused per-channel affine (BN apply) + ReLU; bf16 activation output."""
    m, npad = y2d.shape
    tm = _pick_tm(m)
    return pl.pallas_call(
        _scale_shift_relu_kernel,
        out_shape=jax.ShapeDtypeStruct((m, npad), jnp.bfloat16),
        grid=(m // tm,),
        in_specs=[pl.BlockSpec((tm, npad), lambda i: (i, 0)),
                  pl.BlockSpec((1, npad), lambda i: (0, 0)),
                  pl.BlockSpec((1, npad), lambda i: (0, 0))],
        out_specs=pl.BlockSpec((tm, npad), lambda i: (i, 0)),
        compiler_params=pltpu.CompilerParams(
            dimension_semantics=("parallel",)),
    )(y2d, scale, shift)


# ------------------------------- JAX glue -----------------------------------

def _polyphase_patches(x):
    """x: (B, H, W, C) -> (4, B*H*W, 4*C): patches for the 4 output phases of a
    k=4, stride=2, padding=1 transposed conv (one 2x2 sub-kernel per phase)."""
    b, h, w, c = x.shape
    xp = jnp.pad(x, ((0, 0), (1, 1), (1, 1), (0, 0)))
    phases = []
    for ph in range(2):
        for pw in range(2):
            taps = [xp[:, ph + dh:ph + dh + h, pw + dw:pw + dw + w, :]
                    for dh in range(2) for dw in range(2)]
            phases.append(
                jnp.concatenate(taps, axis=-1).reshape(b * h * w, 4 * c))
    return jnp.stack(phases, axis=0)


def _polyphase_weights(w_t, npad):
    """PyTorch ConvTranspose2d weight (Cin, Cout, 4, 4) -> (4, 4*Cin, npad) bf16
    matmul matrices (one per output phase), Cout zero-padded to npad lanes."""
    cout = w_t.shape[1]
    mats = []
    for ph in range(2):
        for pw in range(2):
            taps = [w_t[:, :, 3 - ph - 2 * dh, 3 - pw - 2 * dw]
                    for dh in range(2) for dw in range(2)]
            mats.append(jnp.concatenate(taps, axis=0))        # (4*Cin, Cout)
    wq = jnp.stack(mats, axis=0)                              # (4, 4*Cin, Cout)
    wq = jnp.pad(wq, ((0, 0), (0, 0), (0, npad - cout)))
    return wq.astype(jnp.bfloat16)


def _first_layer_weights(w_t, npad):
    """(Cin, Cout, 4, 4) -> (16, Cin, npad) bf16: the 1x1-input, stride-1,
    padding-0 transposed conv is tap-separable (one matmul per kernel tap)."""
    cin, cout = w_t.shape[:2]
    wq = jnp.transpose(w_t, (2, 3, 0, 1)).reshape(K_SIZE * K_SIZE, cin, cout)
    wq = jnp.pad(wq, ((0, 0), (0, 0), (0, npad - cout)))
    return wq.astype(jnp.bfloat16)


def _bn_scale_shift(col_sum, col_sq, gamma_pad, beta_pad, count):
    mean = col_sum / count
    var = jnp.maximum(col_sq / count - mean * mean, 0.0)   # clamp cancellation
    scale = gamma_pad * jax.lax.rsqrt(var + BN_EPS)
    shift = beta_pad - mean * scale
    return scale, shift


def deconv_bn_relu_first(x2d, wq, gamma_pad, beta_pad, cout):
    """First block: (B, Cin) latent -> (B, 4, 4, cout) bf16."""
    b = x2d.shape[0]
    npad = wq.shape[-1]
    y, s, sq = pallas_matmul_bn(x2d[None], wq)               # y: (16, B, npad)
    scale, shift = _bn_scale_shift(s, sq, gamma_pad, beta_pad, 16 * b)
    act = pallas_scale_shift_relu(y.reshape(16 * b, npad), scale, shift)
    act = act.reshape(K_SIZE, K_SIZE, b, npad)[..., :cout]
    return jnp.transpose(act, (2, 0, 1, 3))                  # (B, 4, 4, cout)


def deconv_bn_relu_stride2(x, wq, gamma_pad, beta_pad, cout):
    """ConvTranspose2d(k=4, s=2, p=1, bias=False) + BatchNorm2d + ReLU."""
    b, h, w, _ = x.shape
    npad = wq.shape[-1]
    patches = _polyphase_patches(x)                          # (4, B*H*W, 4*Cin)
    y, s, sq = pallas_matmul_bn(patches, wq)                 # (4, B*H*W, npad)
    scale, shift = _bn_scale_shift(s, sq, gamma_pad, beta_pad, 4 * b * h * w)
    act = pallas_scale_shift_relu(y.reshape(4 * b * h * w, npad), scale, shift)
    act = act.reshape(2, 2, b, h, w, npad)[..., :cout]
    return jnp.transpose(act, (2, 3, 0, 4, 1, 5)).reshape(b, 2 * h, 2 * w, cout)


def deconv_tanh_stride2(x, wq, cout):
    """Final ConvTranspose2d(k=4, s=2, p=1, bias=False) + Tanh (f32 output)."""
    b, h, w, _ = x.shape
    npad = wq.shape[-1]
    patches = _polyphase_patches(x)
    y = pallas_matmul_tanh(patches, wq)                      # (4, B*H*W, npad)
    y = y.reshape(2, 2, b, h, w, npad)[..., :cout]
    return jnp.transpose(y, (2, 3, 0, 4, 1, 5)).reshape(b, 2 * h, 2 * w, cout)


def init_generator_params(z=16, nc=8, seed=0):
    """Raw params in PyTorch layout: ConvTranspose2d weights (Cin, Cout, 4, 4),
    BN gamma/beta for the first four blocks."""
    key = jax.random.PRNGKey(seed)
    chans = [(z, nc * 8), (nc * 8, nc * 4), (nc * 4, nc * 2),
             (nc * 2, nc), (nc, 3)]
    params = []
    for i, (cin, cout) in enumerate(chans):
        key, wk = jax.random.split(key)
        w = jax.random.normal(wk, (cin, cout, K_SIZE, K_SIZE),
                              jnp.float32) * 0.02
        if i < 4:
            params.append((w, jnp.ones((cout,), jnp.float32),
                           jnp.zeros((cout,), jnp.float32)))
        else:
            params.append((w,))
    return params


def prepare_params(params):
    """One-time weight layout transforms (hoisted out of the jitted forward).
    Returns (prepped, couts): bf16 lane-padded matmul matrices + padded BN
    params, plus a static tuple of the true output channel counts."""
    prepped, couts = [], []
    for i, layer in enumerate(params):
        w = layer[0]
        cout = w.shape[1]
        couts.append(cout)
        npad = _round_up(cout, LANE)
        wq = _first_layer_weights(w, npad) if i == 0 else _polyphase_weights(w, npad)
        if len(layer) == 3:
            _, g, bta = layer
            g_pad = jnp.pad(g, (0, npad - cout)).reshape(1, npad)
            b_pad = jnp.pad(bta, (0, npad - cout)).reshape(1, npad)
            prepped.append((wq, g_pad, b_pad))
        else:
            prepped.append((wq,))
    return prepped, tuple(couts)


@functools.partial(jax.jit, static_argnums=(2,))
def generator_forward(x_nchw, prepped, couts):
    """x: (B, z, 1, 1) NCHW latent -> (B, 3, 64, 64) NCHW image."""
    assert x_nchw.shape[2] == 1 and x_nchw.shape[3] == 1, "DCGAN latent is 1x1"
    b = x_nchw.shape[0]
    x2d = x_nchw.reshape(b, -1).astype(jnp.bfloat16)
    wq, g, bt = prepped[0]
    x = deconv_bn_relu_first(x2d, wq, g, bt, couts[0])
    for i in range(1, 4):
        wq, g, bt = prepped[i]
        x = deconv_bn_relu_stride2(x, wq, g, bt, couts[i])
    x = deconv_tanh_stride2(x, prepped[4][0], couts[4])
    return jnp.transpose(x, (0, 3, 1, 2))                    # -> NCHW, f32


if __name__ == "__main__":
    Z, NC, B = 16, 8, 2   # small synthetic config (PyTorch default z=100, nc=64)
    params = init_generator_params(z=Z, nc=NC, seed=0)
    prepped, couts = prepare_params(params)
    x = jax.random.normal(jax.random.PRNGKey(0), (B, Z, 1, 1), jnp.float32)
    out = generator_forward(x, prepped, couts)
    out = jax.block_until_ready(out)
    assert out.shape == (B, 3, 64, 64), out.shape
    assert bool(jnp.all(jnp.isfinite(out)))
    assert bool(jnp.all(jnp.abs(out) <= 1.0 + 1e-6))   # tanh range
    print("KERNEL_OK")
</pallas_src>

<mosaic_0001>
module attributes {stable_mosaic.version = 11 : i64} {
  func.func @_mm_bn_kernel(%arg0: i32, %arg1: i32, %arg2: memref<1x2x16xbf16, #tpu.memory_space<vmem>>, %arg3: memref<1x16x128xbf16, #tpu.memory_space<vmem>>, %arg4: memref<1x2x128xf32, #tpu.memory_space<vmem>>, %arg5: memref<1x128xf32, #tpu.memory_space<vmem>>, %arg6: memref<1x128xf32, #tpu.memory_space<vmem>>) attributes {dimension_semantics = [#tpu.dimension_semantics<arbitrary>, #tpu.dimension_semantics<arbitrary>], iteration_bounds = array<i64: 16, 1>, scalar_prefetch = 0 : i64, scratch_operands = 0 : i64, tpu.core_type = #tpu.core_type<tc>, window_params = [{transform_indices = @transform_0, window_bounds = array<i64: 1, 2, 16>}, {transform_indices = @transform_1, window_bounds = array<i64: 1, 16, 128>}, {transform_indices = @transform_2, window_bounds = array<i64: 1, 2, 128>}, {pipeline_mode = #tpu.pipeline_mode<synchronous>, transform_indices = @transform_3, window_bounds = array<i64: 1, 128>}, {pipeline_mode = #tpu.pipeline_mode<synchronous>, transform_indices = @transform_4, window_bounds = array<i64: 1, 128>}]} {
    %c0_i32 = arith.constant 0 : i32
    %0 = arith.cmpi eq, %arg0, %c0_i32 : i32
    %c0_i32_0 = arith.constant 0 : i32
    %1 = arith.cmpi eq, %arg1, %c0_i32_0 : i32
    %2 = arith.andi %0, %1 : i1
    %3 = arith.extui %2 : i1 to i32
    %c0_i32_1 = arith.constant 0 : i32
    %4 = arith.cmpi ne, %3, %c0_i32_1 : i32
    scf.if %4 {
      %cst_20 = arith.constant 0.000000e+00 : f32
      %24 = vector.broadcast %cst_20 : f32 to vector<1x128xf32>
      %c0_21 = arith.constant 0 : index
      %c0_22 = arith.constant 0 : index
      %25 = vector.load %arg5[%c0_21, %c0_22] : memref<1x128xf32, #tpu.memory_space<vmem>>, vector<1x128xf32>
      tpu.vector_store %arg5[%c0_21, %c0_22], %24 {strides = array<i32>} : memref<1x128xf32, #tpu.memory_space<vmem>>, vector<1x128xf32>,
      %cst_23 = arith.constant 0.000000e+00 : f32
      %26 = vector.broadcast %cst_23 : f32 to vector<1x128xf32>
      %c0_24 = arith.constant 0 : index
      %c0_25 = arith.constant 0 : index
      %27 = vector.load %arg6[%c0_24, %c0_25] : memref<1x128xf32, #tpu.memory_space<vmem>>, vector<1x128xf32>
      tpu.vector_store %arg6[%c0_24, %c0_25], %26 {strides = array<i32>} : memref<1x128xf32, #tpu.memory_space<vmem>>, vector<1x128xf32>,
    } else {
    }
    %c0 = arith.constant 0 : index
    %c0_2 = arith.constant 0 : index
    %c0_3 = arith.constant 0 : index
    %5 = vector.load %arg2[%c0, %c0_2, %c0_3] : memref<1x2x16xbf16, #tpu.memory_space<vmem>>, vector<1x2x16xbf16>
    %6 = vector.shape_cast %5 : vector<1x2x16xbf16> to vector<2x16xbf16>
    %c0_4 = arith.constant 0 : index
    %c0_5 = arith.constant 0 : index
    %c0_6 = arith.constant 0 : index
    %7 = vector.load %arg3[%c0_4, %c0_5, %c0_6] : memref<1x16x128xbf16, #tpu.memory_space<vmem>>, vector<1x16x128xbf16>
    %8 = vector.shape_cast %7 : vector<1x16x128xbf16> to vector<16x128xbf16>
    %cst = arith.constant dense<0.000000e+00> : vector<2x128xf32>
    %9 = tpu.matmul %6, %8, %cst {dimension_numbers = #tpu.dot_dimension_numbers<[1], [0], [0], [1], [0, 0, 1, 1], [], []>} : vector<2x16xbf16>, vector<16x128xbf16>, vector<2x128xf32> -> vector<2x128xf32>
    %c0_7 = arith.constant 0 : index
    %c0_8 = arith.constant 0 : index
    %c0_9 = arith.constant 0 : index
    %10 = vector.load %arg4[%c0_7, %c0_8, %c0_9] : memref<1x2x128xf32, #tpu.memory_space<vmem>>, vector<1x2x128xf32>
    %11 = vector.shape_cast %10 : vector<1x2x128xf32> to vector<2x128xf32>
    %12 = vector.shape_cast %9 : vector<2x128xf32> to vector<1x2x128xf32>
    tpu.vector_store %arg4[%c0_7, %c0_8, %c0_9], %12 {strides = array<i32>} : memref<1x2x128xf32, #tpu.memory_space<vmem>>, vector<1x2x128xf32>,
    %c0_10 = arith.constant 0 : index
    %c0_11 = arith.constant 0 : index
    %13 = vector.load %arg5[%c0_10, %c0_11] : memref<1x128xf32, #tpu.memory_space<vmem>>, vector<1x128xf32>
    %cst_12 = arith.constant dense<0.000000e+00> : vector<128xf32>
    %14 = vector.multi_reduction <add>, %9, %cst_12 [0] : vector<2x128xf32> to vector<128xf32>
    %15 = vector.shape_cast %14 : vector<128xf32> to vector<1x128xf32>
    %16 = arith.addf %13, %15 : vector<1x128xf32>
    %c0_13 = arith.constant 0 : index
    %c0_14 = arith.constant 0 : index
    %17 = vector.load %arg5[%c0_13, %c0_14] : memref<1x128xf32, #tpu.memory_space<vmem>>, vector<1x128xf32>
    tpu.vector_store %arg5[%c0_13, %c0_14], %16 {strides = array<i32>} : memref<1x128xf32, #tpu.memory_space<vmem>>, vector<1x128xf32>,
    %c0_15 = arith.constant 0 : index
    %c0_16 = arith.constant 0 : index
    %18 = vector.load %arg6[%c0_15, %c0_16] : memref<1x128xf32, #tpu.memory_space<vmem>>, vector<1x128xf32>
    %19 = arith.mulf %9, %9 : vector<2x128xf32>
    %cst_17 = arith.constant dense<0.000000e+00> : vector<128xf32>
    %20 = vector.multi_reduction <add>, %19, %cst_17 [0] : vector<2x128xf32> to vector<128xf32>
    %21 = vector.shape_cast %20 : vector<128xf32> to vector<1x128xf32>
    %22 = arith.addf %18, %21 : vector<1x128xf32>
    %c0_18 = arith.constant 0 : index
    %c0_19 = arith.constant 0 : index
    %23 = vector.load %arg6[%c0_18, %c0_19] : memref<1x128xf32, #tpu.memory_space<vmem>>, vector<1x128xf32>
    tpu.vector_store %arg6[%c0_18, %c0_19], %22 {strides = array<i32>} : memref<1x128xf32, #tpu.memory_space<vmem>>, vector<1x128xf32>,
    return
  }
  func.func @transform_0(%arg0: i32, %arg1: i32) -> (i32, i32, i32) {
    %c0_i32 = arith.constant 0 : i32
    %c0_i32_0 = arith.constant 0 : i32
    %c0_i32_1 = arith.constant 0 : i32
    return %c0_i32, %arg1, %c0_i32_0 : i32, i32, i32
  }
  func.func @transform_1(%arg0: i32, %arg1: i32) -> (i32, i32, i32) {
    %c0_i32 = arith.constant 0 : i32
    %c0_i32_0 = arith.constant 0 : i32
    %c0_i32_1 = arith.constant 0 : i32
    return %arg0, %c0_i32, %c0_i32_0 : i32, i32, i32
  }
  func.func @transform_2(%arg0: i32, %arg1: i32) -> (i32, i32, i32) {
    %c0_i32 = arith.constant 0 : i32
    %c0_i32_0 = arith.constant 0 : i32
    return %arg0, %arg1, %c0_i32 : i32, i32, i32
  }
  func.func @transform_3(%arg0: i32, %arg1: i32) -> (i32, i32) {
    %c0_i32 = arith.constant 0 : i32
    %c0_i32_0 = arith.constant 0 : i32
    %c0_i32_1 = arith.constant 0 : i32
    return %c0_i32, %c0_i32_0 : i32, i32
  }
  func.func @transform_4(%arg0: i32, %arg1: i32) -> (i32, i32) {
    %c0_i32 = arith.constant 0 : i32
    %c0_i32_0 = arith.constant 0 : i32
    %c0_i32_1 = arith.constant 0 : i32
    return %c0_i32, %c0_i32_0 : i32, i32
  }
}

module attributes {stable_mosaic.version = 11 : i64} {
  func.func @_scale_shift_relu_kernel(%arg0: i32, %arg1: memref<32x128xf32, #tpu.memory_space<vmem>>, %arg2: memref<1x128xf32, #tpu.memory_space<vmem>>, %arg3: memref<1x128xf32, #tpu.memory_space<vmem>>, %arg4: memref<32x128xbf16, #tpu.memory_space<vmem>>) attributes {dimension_semantics = [#tpu.dimension_semantics<parallel>], iteration_bounds = array<i64: 1>, scalar_prefetch = 0 : i64, scratch_operands = 0 : i64, tpu.core_type = #tpu.core_type<tc>, window_params = [{transform_indices = @transform_0, window_bounds = array<i64: 32, 128>}, {pipeline_mode = #tpu.pipeline_mode<synchronous>, transform_indices = @transform_1, window_bounds = array<i64: 1, 128>}, {pipeline_mode = #tpu.pipeline_mode<synchronous>, transform_indices = @transform_2, window_bounds = array<i64: 1, 128>}, {transform_indices = @transform_3, window_bounds = array<i64: 32, 128>}]} {
    %c0 = arith.constant 0 : index
    %c0_0 = arith.constant 0 : index
    %0 = vector.load %arg1[%c0, %c0_0] : memref<32x128xf32, #tpu.memory_space<vmem>>, vector<32x128xf32>
    %c0_1 = arith.constant 0 : index
    %c0_2 = arith.constant 0 : index
    %1 = vector.load %arg2[%c0_1, %c0_2] : memref<1x128xf32, #tpu.memory_space<vmem>>, vector<1x128xf32>
    %2 = vector.broadcast %1 : vector<1x128xf32> to vector<32x128xf32>
    %3 = arith.mulf %0, %2 : vector<32x128xf32>
    %c0_3 = arith.constant 0 : index
    %c0_4 = arith.constant 0 : index
    %4 = vector.load %arg3[%c0_3, %c0_4] : memref<1x128xf32, #tpu.memory_space<vmem>>, vector<1x128xf32>
    %5 = vector.broadcast %4 : vector<1x128xf32> to vector<32x128xf32>
    %6 = arith.addf %3, %5 : vector<32x128xf32>
    %cst = arith.constant 0.000000e+00 : f32
    %7 = vector.broadcast %cst : f32 to vector<32x128xf32>
    %8 = arith.maximumf %6, %7 : vector<32x128xf32>
    %9 = arith.truncf %8 : vector<32x128xf32> to vector<32x128xbf16>
    %c0_5 = arith.constant 0 : index
    %c0_6 = arith.constant 0 : index
    %10 = vector.load %arg4[%c0_5, %c0_6] : memref<32x128xbf16, #tpu.memory_space<vmem>>, vector<32x128xbf16>
    tpu.vector_store %arg4[%c0_5, %c0_6], %9 {strides = array<i32>} : memref<32x128xbf16, #tpu.memory_space<vmem>>, vector<32x128xbf16>,
    return
  }
  func.func @transform_0(%arg0: i32) -> (i32, i32) {
    %c0_i32 = arith.constant 0 : i32
    %c0_i32_0 = arith.constant 0 : i32
    return %arg0, %c0_i32 : i32, i32
  }
  func.func @transform_1(%arg0: i32) -> (i32, i32) {
    %c0_i32 = arith.constant 0 : i32
    %c0_i32_0 = arith.constant 0 : i32
    %c0_i32_1 = arith.constant 0 : i32
    return %c0_i32, %c0_i32_0 : i32, i32
  }
  func.func @transform_2(%arg0: i32) -> (i32, i32) {
    %c0_i32 = arith.constant 0 : i32
    %c0_i32_0 = arith.constant 0 : i32
    %c0_i32_1 = arith.constant 0 : i32
    return %c0_i32, %c0_i32_0 : i32, i32
  }
  func.func @transform_3(%arg0: i32) -> (i32, i32) {
    %c0_i32 = arith.constant 0 : i32
    %c0_i32_0 = arith.constant 0 : i32
    return %arg0, %c0_i32 : i32, i32
  }
}

module attributes {stable_mosaic.version = 11 : i64} {
  func.func @_mm_bn_kernel(%arg0: i32, %arg1: i32, %arg2: memref<1x32x256xbf16, #tpu.memory_space<vmem>>, %arg3: memref<1x256x128xbf16, #tpu.memory_space<vmem>>, %arg4: memref<1x32x128xf32, #tpu.memory_space<vmem>>, %arg5: memref<1x128xf32, #tpu.memory_space<vmem>>, %arg6: memref<1x128xf32, #tpu.memory_space<vmem>>) attributes {dimension_semantics = [#tpu.dimension_semantics<arbitrary>, #tpu.dimension_semantics<arbitrary>], iteration_bounds = array<i64: 4, 1>, scalar_prefetch = 0 : i64, scratch_operands = 0 : i64, tpu.core_type = #tpu.core_type<tc>, window_params = [{transform_indices = @transform_0, window_bounds = array<i64: 1, 32, 256>}, {transform_indices = @transform_1, window_bounds = array<i64: 1, 256, 128>}, {transform_indices = @transform_2, window_bounds = array<i64: 1, 32, 128>}, {pipeline_mode = #tpu.pipeline_mode<synchronous>, transform_indices = @transform_3, window_bounds = array<i64: 1, 128>}, {pipeline_mode = #tpu.pipeline_mode<synchronous>, transform_indices = @transform_4, window_bounds = array<i64: 1, 128>}]} {
    %c0_i32 = arith.constant 0 : i32
    %0 = arith.cmpi eq, %arg0, %c0_i32 : i32
    %c0_i32_0 = arith.constant 0 : i32
    %1 = arith.cmpi eq, %arg1, %c0_i32_0 : i32
    %2 = arith.andi %0, %1 : i1
    %3 = arith.extui %2 : i1 to i32
    %c0_i32_1 = arith.constant 0 : i32
    %4 = arith.cmpi ne, %3, %c0_i32_1 : i32
    scf.if %4 {
      %cst_20 = arith.constant 0.000000e+00 : f32
      %24 = vector.broadcast %cst_20 : f32 to vector<1x128xf32>
      %c0_21 = arith.constant 0 : index
      %c0_22 = arith.constant 0 : index
      %25 = vector.load %arg5[%c0_21, %c0_22] : memref<1x128xf32, #tpu.memory_space<vmem>>, vector<1x128xf32>
      tpu.vector_store %arg5[%c0_21, %c0_22], %24 {strides = array<i32>} : memref<1x128xf32, #tpu.memory_space<vmem>>, vector<1x128xf32>,
      %cst_23 = arith.constant 0.000000e+00 : f32
      %26 = vector.broadcast %cst_23 : f32 to vector<1x128xf32>
      %c0_24 = arith.constant 0 : index
      %c0_25 = arith.constant 0 : index
      %27 = vector.load %arg6[%c0_24, %c0_25] : memref<1x128xf32, #tpu.memory_space<vmem>>, vector<1x128xf32>
      tpu.vector_store %arg6[%c0_24, %c0_25], %26 {strides = array<i32>} : memref<1x128xf32, #tpu.memory_space<vmem>>, vector<1x128xf32>,
    } else {
    }
    %c0 = arith.constant 0 : index
    %c0_2 = arith.constant 0 : index
    %c0_3 = arith.constant 0 : index
    %5 = vector.load %arg2[%c0, %c0_2, %c0_3] : memref<1x32x256xbf16, #tpu.memory_space<vmem>>, vector<1x32x256xbf16>
    %6 = vector.shape_cast %5 : vector<1x32x256xbf16> to vector<32x256xbf16>
    %c0_4 = arith.constant 0 : index
    %c0_5 = arith.constant 0 : index
    %c0_6 = arith.constant 0 : index
    %7 = vector.load %arg3[%c0_4, %c0_5, %c0_6] : memref<1x256x128xbf16, #tpu.memory_space<vmem>>, vector<1x256x128xbf16>
    %8 = vector.shape_cast %7 : vector<1x256x128xbf16> to vector<256x128xbf16>
    %cst = arith.constant dense<0.000000e+00> : vector<32x128xf32>
    %9 = tpu.matmul %6, %8, %cst {dimension_numbers = #tpu.dot_dimension_numbers<[1], [0], [0], [1], [0, 0, 1, 1], [], []>} : vector<32x256xbf16>, vector<256x128xbf16>, vector<32x128xf32> -> vector<32x128xf32>
    %c0_7 = arith.constant 0 : index
    %c0_8 = arith.constant 0 : index
    %c0_9 = arith.constant 0 : index
    %10 = vector.load %arg4[%c0_7, %c0_8, %c0_9] : memref<1x32x128xf32, #tpu.memory_space<vmem>>, vector<1x32x128xf32>
    %11 = vector.shape_cast %10 : vector<1x32x128xf32> to vector<32x128xf32>
    %12 = vector.shape_cast %9 : vector<32x128xf32> to vector<1x32x128xf32>
    tpu.vector_store %arg4[%c0_7, %c0_8, %c0_9], %12 {strides = array<i32>} : memref<1x32x128xf32, #tpu.memory_space<vmem>>, vector<1x32x128xf32>,
    %c0_10 = arith.constant 0 : index
    %c0_11 = arith.constant 0 : index
    %13 = vector.load %arg5[%c0_10, %c0_11] : memref<1x128xf32, #tpu.memory_space<vmem>>, vector<1x128xf32>
    %cst_12 = arith.constant dense<0.000000e+00> : vector<128xf32>
    %14 = vector.multi_reduction <add>, %9, %cst_12 [0] : vector<32x128xf32> to vector<128xf32>
    %15 = vector.shape_cast %14 : vector<128xf32> to vector<1x128xf32>
    %16 = arith.addf %13, %15 : vector<1x128xf32>
    %c0_13 = arith.constant 0 : index
    %c0_14 = arith.constant 0 : index
    %17 = vector.load %arg5[%c0_13, %c0_14] : memref<1x128xf32, #tpu.memory_space<vmem>>, vector<1x128xf32>
    tpu.vector_store %arg5[%c0_13, %c0_14], %16 {strides = array<i32>} : memref<1x128xf32, #tpu.memory_space<vmem>>, vector<1x128xf32>,
    %c0_15 = arith.constant 0 : index
    %c0_16 = arith.constant 0 : index
    %18 = vector.load %arg6[%c0_15, %c0_16] : memref<1x128xf32, #tpu.memory_space<vmem>>, vector<1x128xf32>
    %19 = arith.mulf %9, %9 : vector<32x128xf32>
    %cst_17 = arith.constant dense<0.000000e+00> : vector<128xf32>
    %20 = vector.multi_reduction <add>, %19, %cst_17 [0] : vector<32x128xf32> to vector<128xf32>
    %21 = vector.shape_cast %20 : vector<128xf32> to vector<1x128xf32>
    %22 = arith.addf %18, %21 : vector<1x128xf32>
    %c0_18 = arith.constant 0 : index
    %c0_19 = arith.constant 0 : index
    %23 = vector.load %arg6[%c0_18, %c0_19] : memref<1x128xf32, #tpu.memory_space<vmem>>, vector<1x128xf32>
    tpu.vector_store %arg6[%c0_18, %c0_19], %22 {strides = array<i32>} : memref<1x128xf32, #tpu.memory_space<vmem>>, vector<1x128xf32>,
    return
  }
  func.func @transform_0(%arg0: i32, %arg1: i32) -> (i32, i32, i32) {
    %c0_i32 = arith.constant 0 : i32
    %c0_i32_0 = arith.constant 0 : i32
    return %arg0, %arg1, %c0_i32 : i32, i32, i32
  }
  func.func @transform_1(%arg0: i32, %arg1: i32) -> (i32, i32, i32) {
    %c0_i32 = arith.constant 0 : i32
    %c0_i32_0 = arith.constant 0 : i32
    %c0_i32_1 = arith.constant 0 : i32
    return %arg0, %c0_i32, %c0_i32_0 : i32, i32, i32
  }
  func.func @transform_2(%arg0: i32, %arg1: i32) -> (i32, i32, i32) {
    %c0_i32 = arith.constant 0 : i32
    %c0_i32_0 = arith.constant 0 : i32
    return %arg0, %arg1, %c0_i32 : i32, i32, i32
  }
  func.func @transform_3(%arg0: i32, %arg1: i32) -> (i32, i32) {
    %c0_i32 = arith.constant 0 : i32
    %c0_i32_0 = arith.constant 0 : i32
    %c0_i32_1 = arith.constant 0 : i32
    return %c0_i32, %c0_i32_0 : i32, i32
  }
  func.func @transform_4(%arg0: i32, %arg1: i32) -> (i32, i32) {
    %c0_i32 = arith.constant 0 : i32
    %c0_i32_0 = arith.constant 0 : i32
    %c0_i32_1 = arith.constant 0 : i32
    return %c0_i32, %c0_i32_0 : i32, i32
  }
}

module attributes {stable_mosaic.version = 11 : i64} {
  func.func @_scale_shift_relu_kernel(%arg0: i32, %arg1: memref<128x128xf32, #tpu.memory_space<vmem>>, %arg2: memref<1x128xf32, #tpu.memory_space<vmem>>, %arg3: memref<1x128xf32, #tpu.memory_space<vmem>>, %arg4: memref<128x128xbf16, #tpu.memory_space<vmem>>) attributes {dimension_semantics = [#tpu.dimension_semantics<parallel>], iteration_bounds = array<i64: 1>, scalar_prefetch = 0 : i64, scratch_operands = 0 : i64, tpu.core_type = #tpu.core_type<tc>, window_params = [{transform_indices = @transform_0, window_bounds = array<i64: 128, 128>}, {pipeline_mode = #tpu.pipeline_mode<synchronous>, transform_indices = @transform_1, window_bounds = array<i64: 1, 128>}, {pipeline_mode = #tpu.pipeline_mode<synchronous>, transform_indices = @transform_2, window_bounds = array<i64: 1, 128>}, {transform_indices = @transform_3, window_bounds = array<i64: 128, 128>}]} {
    %c0 = arith.constant 0 : index
    %c0_0 = arith.constant 0 : index
    %0 = vector.load %arg1[%c0, %c0_0] : memref<128x128xf32, #tpu.memory_space<vmem>>, vector<128x128xf32>
    %c0_1 = arith.constant 0 : index
    %c0_2 = arith.constant 0 : index
    %1 = vector.load %arg2[%c0_1, %c0_2] : memref<1x128xf32, #tpu.memory_space<vmem>>, vector<1x128xf32>
    %2 = vector.broadcast %1 : vector<1x128xf32> to vector<128x128xf32>
    %3 = arith.mulf %0, %2 : vector<128x128xf32>
    %c0_3 = arith.constant 0 : index
    %c0_4 = arith.constant 0 : index
    %4 = vector.load %arg3[%c0_3, %c0_4] : memref<1x128xf32, #tpu.memory_space<vmem>>, vector<1x128xf32>
    %5 = vector.broadcast %4 : vector<1x128xf32> to vector<128x128xf32>
    %6 = arith.addf %3, %5 : vector<128x128xf32>
    %cst = arith.constant 0.000000e+00 : f32
    %7 = vector.broadcast %cst : f32 to vector<128x128xf32>
    %8 = arith.maximumf %6, %7 : vector<128x128xf32>
    %9 = arith.truncf %8 : vector<128x128xf32> to vector<128x128xbf16>
    %c0_5 = arith.constant 0 : index
    %c0_6 = arith.constant 0 : index
    %10 = vector.load %arg4[%c0_5, %c0_6] : memref<128x128xbf16, #tpu.memory_space<vmem>>, vector<128x128xbf16>
    tpu.vector_store %arg4[%c0_5, %c0_6], %9 {strides = array<i32>} : memref<128x128xbf16, #tpu.memory_space<vmem>>, vector<128x128xbf16>,
    return
  }
  func.func @transform_0(%arg0: i32) -> (i32, i32) {
    %c0_i32 = arith.constant 0 : i32
    %c0_i32_0 = arith.constant 0 : i32
    return %arg0, %c0_i32 : i32, i32
  }
  func.func @transform_1(%arg0: i32) -> (i32, i32) {
    %c0_i32 = arith.constant 0 : i32
    %c0_i32_0 = arith.constant 0 : i32
    %c0_i32_1 = arith.constant 0 : i32
    return %c0_i32, %c0_i32_0 : i32, i32
  }
  func.func @transform_2(%arg0: i32) -> (i32, i32) {
    %c0_i32 = arith.constant 0 : i32
    %c0_i32_0 = arith.constant 0 : i32
    %c0_i32_1 = arith.constant 0 : i32
    return %c0_i32, %c0_i32_0 : i32, i32
  }
  func.func @transform_3(%arg0: i32) -> (i32, i32) {
    %c0_i32 = arith.constant 0 : i32
    %c0_i32_0 = arith.constant 0 : i32
    return %arg0, %c0_i32 : i32, i32
  }
}

module attributes {stable_mosaic.version = 11 : i64} {
  func.func @_mm_bn_kernel(%arg0: i32, %arg1: i32, %arg2: memref<1x128x128xbf16, #tpu.memory_space<vmem>>, %arg3: memref<1x128x128xbf16, #tpu.memory_space<vmem>>, %arg4: memref<1x128x128xf32, #tpu.memory_space<vmem>>, %arg5: memref<1x128xf32, #tpu.memory_space<vmem>>, %arg6: memref<1x128xf32, #tpu.memory_space<vmem>>) attributes {dimension_semantics = [#tpu.dimension_semantics<arbitrary>, #tpu.dimension_semantics<arbitrary>], iteration_bounds = array<i64: 4, 1>, scalar_prefetch = 0 : i64, scratch_operands = 0 : i64, tpu.core_type = #tpu.core_type<tc>, window_params = [{transform_indices = @transform_0, window_bounds = array<i64: 1, 128, 128>}, {transform_indices = @transform_1, window_bounds = array<i64: 1, 128, 128>}, {transform_indices = @transform_2, window_bounds = array<i64: 1, 128, 128>}, {pipeline_mode = #tpu.pipeline_mode<synchronous>, transform_indices = @transform_3, window_bounds = array<i64: 1, 128>}, {pipeline_mode = #tpu.pipeline_mode<synchronous>, transform_indices = @transform_4, window_bounds = array<i64: 1, 128>}]} {
    %c0_i32 = arith.constant 0 : i32
    %0 = arith.cmpi eq, %arg0, %c0_i32 : i32
    %c0_i32_0 = arith.constant 0 : i32
    %1 = arith.cmpi eq, %arg1, %c0_i32_0 : i32
    %2 = arith.andi %0, %1 : i1
    %3 = arith.extui %2 : i1 to i32
    %c0_i32_1 = arith.constant 0 : i32
    %4 = arith.cmpi ne, %3, %c0_i32_1 : i32
    scf.if %4 {
      %cst_20 = arith.constant 0.000000e+00 : f32
      %24 = vector.broadcast %cst_20 : f32 to vector<1x128xf32>
      %c0_21 = arith.constant 0 : index
      %c0_22 = arith.constant 0 : index
      %25 = vector.load %arg5[%c0_21, %c0_22] : memref<1x128xf32, #tpu.memory_space<vmem>>, vector<1x128xf32>
      tpu.vector_store %arg5[%c0_21, %c0_22], %24 {strides = array<i32>} : memref<1x128xf32, #tpu.memory_space<vmem>>, vector<1x128xf32>,
      %cst_23 = arith.constant 0.000000e+00 : f32
      %26 = vector.broadcast %cst_23 : f32 to vector<1x128xf32>
      %c0_24 = arith.constant 0 : index
      %c0_25 = arith.constant 0 : index
      %27 = vector.load %arg6[%c0_24, %c0_25] : memref<1x128xf32, #tpu.memory_space<vmem>>, vector<1x128xf32>
      tpu.vector_store %arg6[%c0_24, %c0_25], %26 {strides = array<i32>} : memref<1x128xf32, #tpu.memory_space<vmem>>, vector<1x128xf32>,
    } else {
    }
    %c0 = arith.constant 0 : index
    %c0_2 = arith.constant 0 : index
    %c0_3 = arith.constant 0 : index
    %5 = vector.load %arg2[%c0, %c0_2, %c0_3] : memref<1x128x128xbf16, #tpu.memory_space<vmem>>, vector<1x128x128xbf16>
    %6 = vector.shape_cast %5 : vector<1x128x128xbf16> to vector<128x128xbf16>
    %c0_4 = arith.constant 0 : index
    %c0_5 = arith.constant 0 : index
    %c0_6 = arith.constant 0 : index
    %7 = vector.load %arg3[%c0_4, %c0_5, %c0_6] : memref<1x128x128xbf16, #tpu.memory_space<vmem>>, vector<1x128x128xbf16>
    %8 = vector.shape_cast %7 : vector<1x128x128xbf16> to vector<128x128xbf16>
    %cst = arith.constant dense<0.000000e+00> : vector<128x128xf32>
    %9 = tpu.matmul %6, %8, %cst {dimension_numbers = #tpu.dot_dimension_numbers<[1], [0], [0], [1], [0, 0, 1, 1], [], []>} : vector<128x128xbf16>, vector<128x128xbf16>, vector<128x128xf32> -> vector<128x128xf32>
    %c0_7 = arith.constant 0 : index
    %c0_8 = arith.constant 0 : index
    %c0_9 = arith.constant 0 : index
    %10 = vector.load %arg4[%c0_7, %c0_8, %c0_9] : memref<1x128x128xf32, #tpu.memory_space<vmem>>, vector<1x128x128xf32>
    %11 = vector.shape_cast %10 : vector<1x128x128xf32> to vector<128x128xf32>
    %12 = vector.shape_cast %9 : vector<128x128xf32> to vector<1x128x128xf32>
    tpu.vector_store %arg4[%c0_7, %c0_8, %c0_9], %12 {strides = array<i32>} : memref<1x128x128xf32, #tpu.memory_space<vmem>>, vector<1x128x128xf32>,
    %c0_10 = arith.constant 0 : index
    %c0_11 = arith.constant 0 : index
    %13 = vector.load %arg5[%c0_10, %c0_11] : memref<1x128xf32, #tpu.memory_space<vmem>>, vector<1x128xf32>
    %cst_12 = arith.constant dense<0.000000e+00> : vector<128xf32>
    %14 = vector.multi_reduction <add>, %9, %cst_12 [0] : vector<128x128xf32> to vector<128xf32>
    %15 = vector.shape_cast %14 : vector<128xf32> to vector<1x128xf32>
    %16 = arith.addf %13, %15 : vector<1x128xf32>
    %c0_13 = arith.constant 0 : index
    %c0_14 = arith.constant 0 : index
    %17 = vector.load %arg5[%c0_13, %c0_14] : memref<1x128xf32, #tpu.memory_space<vmem>>, vector<1x128xf32>
    tpu.vector_store %arg5[%c0_13, %c0_14], %16 {strides = array<i32>} : memref<1x128xf32, #tpu.memory_space<vmem>>, vector<1x128xf32>,
    %c0_15 = arith.constant 0 : index
    %c0_16 = arith.constant 0 : index
    %18 = vector.load %arg6[%c0_15, %c0_16] : memref<1x128xf32, #tpu.memory_space<vmem>>, vector<1x128xf32>
    %19 = arith.mulf %9, %9 : vector<128x128xf32>
    %cst_17 = arith.constant dense<0.000000e+00> : vector<128xf32>
    %20 = vector.multi_reduction <add>, %19, %cst_17 [0] : vector<128x128xf32> to vector<128xf32>
    %21 = vector.shape_cast %20 : vector<128xf32> to vector<1x128xf32>
    %22 = arith.addf %18, %21 : vector<1x128xf32>
    %c0_18 = arith.constant 0 : index
    %c0_19 = arith.constant 0 : index
    %23 = vector.load %arg6[%c0_18, %c0_19] : memref<1x128xf32, #tpu.memory_space<vmem>>, vector<1x128xf32>
    tpu.vector_store %arg6[%c0_18, %c0_19], %22 {strides = array<i32>} : memref<1x128xf32, #tpu.memory_space<vmem>>, vector<1x128xf32>,
    return
  }
  func.func @transform_0(%arg0: i32, %arg1: i32) -> (i32, i32, i32) {
    %c0_i32 = arith.constant 0 : i32
    %c0_i32_0 = arith.constant 0 : i32
    return %arg0, %arg1, %c0_i32 : i32, i32, i32
  }
  func.func @transform_1(%arg0: i32, %arg1: i32) -> (i32, i32, i32) {
    %c0_i32 = arith.constant 0 : i32
    %c0_i32_0 = arith.constant 0 : i32
    %c0_i32_1 = arith.constant 0 : i32
    return %arg0, %c0_i32, %c0_i32_0 : i32, i32, i32
  }
  func.func @transform_2(%arg0: i32, %arg1: i32) -> (i32, i32, i32) {
    %c0_i32 = arith.constant 0 : i32
    %c0_i32_0 = arith.constant 0 : i32
    return %arg0, %arg1, %c0_i32 : i32, i32, i32
  }
  func.func @transform_3(%arg0: i32, %arg1: i32) -> (i32, i32) {
    %c0_i32 = arith.constant 0 : i32
    %c0_i32_0 = arith.constant 0 : i32
    %c0_i32_1 = arith.constant 0 : i32
    return %c0_i32, %c0_i32_0 : i32, i32
  }
  func.func @transform_4(%arg0: i32, %arg1: i32) -> (i32, i32) {
    %c0_i32 = arith.constant 0 : i32
    %c0_i32_0 = arith.constant 0 : i32
    %c0_i32_1 = arith.constant 0 : i32
    return %c0_i32, %c0_i32_0 : i32, i32
  }
}

module attributes {stable_mosaic.version = 11 : i64} {
  func.func @_scale_shift_relu_kernel(%arg0: i32, %arg1: memref<512x128xf32, #tpu.memory_space<vmem>>, %arg2: memref<1x128xf32, #tpu.memory_space<vmem>>, %arg3: memref<1x128xf32, #tpu.memory_space<vmem>>, %arg4: memref<512x128xbf16, #tpu.memory_space<vmem>>) attributes {dimension_semantics = [#tpu.dimension_semantics<parallel>], iteration_bounds = array<i64: 1>, scalar_prefetch = 0 : i64, scratch_operands = 0 : i64, tpu.core_type = #tpu.core_type<tc>, window_params = [{transform_indices = @transform_0, window_bounds = array<i64: 512, 128>}, {pipeline_mode = #tpu.pipeline_mode<synchronous>, transform_indices = @transform_1, window_bounds = array<i64: 1, 128>}, {pipeline_mode = #tpu.pipeline_mode<synchronous>, transform_indices = @transform_2, window_bounds = array<i64: 1, 128>}, {transform_indices = @transform_3, window_bounds = array<i64: 512, 128>}]} {
    %c0 = arith.constant 0 : index
    %c0_0 = arith.constant 0 : index
    %0 = vector.load %arg1[%c0, %c0_0] : memref<512x128xf32, #tpu.memory_space<vmem>>, vector<512x128xf32>
    %c0_1 = arith.constant 0 : index
    %c0_2 = arith.constant 0 : index
    %1 = vector.load %arg2[%c0_1, %c0_2] : memref<1x128xf32, #tpu.memory_space<vmem>>, vector<1x128xf32>
    %2 = vector.broadcast %1 : vector<1x128xf32> to vector<512x128xf32>
    %3 = arith.mulf %0, %2 : vector<512x128xf32>
    %c0_3 = arith.constant 0 : index
    %c0_4 = arith.constant 0 : index
    %4 = vector.load %arg3[%c0_3, %c0_4] : memref<1x128xf32, #tpu.memory_space<vmem>>, vector<1x128xf32>
    %5 = vector.broadcast %4 : vector<1x128xf32> to vector<512x128xf32>
    %6 = arith.addf %3, %5 : vector<512x128xf32>
    %cst = arith.constant 0.000000e+00 : f32
    %7 = vector.broadcast %cst : f32 to vector<512x128xf32>
    %8 = arith.maximumf %6, %7 : vector<512x128xf32>
    %9 = arith.truncf %8 : vector<512x128xf32> to vector<512x128xbf16>
    %c0_5 = arith.constant 0 : index
    %c0_6 = arith.constant 0 : index
    %10 = vector.load %arg4[%c0_5, %c0_6] : memref<512x128xbf16, #tpu.memory_space<vmem>>, vector<512x128xbf16>
    tpu.vector_store %arg4[%c0_5, %c0_6], %9 {strides = array<i32>} : memref<512x128xbf16, #tpu.memory_space<vmem>>, vector<512x128xbf16>,
    return
  }
  func.func @transform_0(%arg0: i32) -> (i32, i32) {
    %c0_i32 = arith.constant 0 : i32
    %c0_i32_0 = arith.constant 0 : i32
    return %arg0, %c0_i32 : i32, i32
  }
  func.func @transform_1(%arg0: i32) -> (i32, i32) {
    %c0_i32 = arith.constant 0 : i32
    %c0_i32_0 = arith.constant 0 : i32
    %c0_i32_1 = arith.constant 0 : i32
    return %c0_i32, %c0_i32_0 : i32, i32
  }
  func.func @transform_2(%arg0: i32) -> (i32, i32) {
    %c0_i32 = arith.constant 0 : i32
    %c0_i32_0 = arith.constant 0 : i32
    %c0_i32_1 = arith.constant 0 : i32
    return %c0_i32, %c0_i32_0 : i32, i32
  }
  func.func @transform_3(%arg0: i32) -> (i32, i32) {
    %c0_i32 = arith.constant 0 : i32
    %c0_i32_0 = arith.constant 0 : i32
    return %arg0, %c0_i32 : i32, i32
  }
}

module attributes {stable_mosaic.version = 11 : i64} {
  func.func @_scale_shift_relu_kernel(%arg0: i32, %arg1: memref<1024x128xf32, #tpu.memory_space<vmem>>, %arg2: memref<1x128xf32, #tpu.memory_space<vmem>>, %arg3: memref<1x128xf32, #tpu.memory_space<vmem>>, %arg4: memref<1024x128xbf16, #tpu.memory_space<vmem>>) attributes {dimension_semantics = [#tpu.dimension_semantics<parallel>], iteration_bounds = array<i64: 2>, scalar_prefetch = 0 : i64, scratch_operands = 0 : i64, tpu.core_type = #tpu.core_type<tc>, window_params = [{transform_indices = @transform_0, window_bounds = array<i64: 1024, 128>}, {pipeline_mode = #tpu.pipeline_mode<synchronous>, transform_indices = @transform_1, window_bounds = array<i64: 1, 128>}, {pipeline_mode = #tpu.pipeline_mode<synchronous>, transform_indices = @transform_2, window_bounds = array<i64: 1, 128>}, {transform_indices = @transform_3, window_bounds = array<i64: 1024, 128>}]} {
    %c0 = arith.constant 0 : index
    %c0_0 = arith.constant 0 : index
    %0 = vector.load %arg1[%c0, %c0_0] : memref<1024x128xf32, #tpu.memory_space<vmem>>, vector<1024x128xf32>
    %c0_1 = arith.constant 0 : index
    %c0_2 = arith.constant 0 : index
    %1 = vector.load %arg2[%c0_1, %c0_2] : memref<1x128xf32, #tpu.memory_space<vmem>>, vector<1x128xf32>
    %2 = vector.broadcast %1 : vector<1x128xf32> to vector<1024x128xf32>
    %3 = arith.mulf %0, %2 : vector<1024x128xf32>
    %c0_3 = arith.constant 0 : index
    %c0_4 = arith.constant 0 : index
    %4 = vector.load %arg3[%c0_3, %c0_4] : memref<1x128xf32, #tpu.memory_space<vmem>>, vector<1x128xf32>
    %5 = vector.broadcast %4 : vector<1x128xf32> to vector<1024x128xf32>
    %6 = arith.addf %3, %5 : vector<1024x128xf32>
    %cst = arith.constant 0.000000e+00 : f32
    %7 = vector.broadcast %cst : f32 to vector<1024x128xf32>
    %8 = arith.maximumf %6, %7 : vector<1024x128xf32>
    %9 = arith.truncf %8 : vector<1024x128xf32> to vector<1024x128xbf16>
    %c0_5 = arith.constant 0 : index
    %c0_6 = arith.constant 0 : index
    %10 = vector.load %arg4[%c0_5, %c0_6] : memref<1024x128xbf16, #tpu.memory_space<vmem>>, vector<1024x128xbf16>
    tpu.vector_store %arg4[%c0_5, %c0_6], %9 {strides = array<i32>} : memref<1024x128xbf16, #tpu.memory_space<vmem>>, vector<1024x128xbf16>,
    return
  }
  func.func @transform_0(%arg0: i32) -> (i32, i32) {
    %c0_i32 = arith.constant 0 : i32
    %c0_i32_0 = arith.constant 0 : i32
    return %arg0, %c0_i32 : i32, i32
  }
  func.func @transform_1(%arg0: i32) -> (i32, i32) {
    %c0_i32 = arith.constant 0 : i32
    %c0_i32_0 = arith.constant 0 : i32
    %c0_i32_1 = arith.constant 0 : i32
    return %c0_i32, %c0_i32_0 : i32, i32
  }
  func.func @transform_2(%arg0: i32) -> (i32, i32) {
    %c0_i32 = arith.constant 0 : i32
    %c0_i32_0 = arith.constant 0 : i32
    %c0_i32_1 = arith.constant 0 : i32
    return %c0_i32, %c0_i32_0 : i32, i32
  }
  func.func @transform_3(%arg0: i32) -> (i32, i32) {
    %c0_i32 = arith.constant 0 : i32
    %c0_i32_0 = arith.constant 0 : i32
    return %arg0, %c0_i32 : i32, i32
  }
}

module attributes {stable_mosaic.version = 11 : i64} {
  func.func @_mm_bn_kernel(%arg0: i32, %arg1: i32, %arg2: memref<1x512x64xbf16, #tpu.memory_space<vmem>>, %arg3: memref<1x64x128xbf16, #tpu.memory_space<vmem>>, %arg4: memref<1x512x128xf32, #tpu.memory_space<vmem>>, %arg5: memref<1x128xf32, #tpu.memory_space<vmem>>, %arg6: memref<1x128xf32, #tpu.memory_space<vmem>>) attributes {dimension_semantics = [#tpu.dimension_semantics<arbitrary>, #tpu.dimension_semantics<arbitrary>], iteration_bounds = array<i64: 4, 1>, scalar_prefetch = 0 : i64, scratch_operands = 0 : i64, tpu.core_type = #tpu.core_type<tc>, window_params = [{transform_indices = @transform_0, window_bounds = array<i64: 1, 512, 64>}, {transform_indices = @transform_1, window_bounds = array<i64: 1, 64, 128>}, {transform_indices = @transform_2, window_bounds = array<i64: 1, 512, 128>}, {pipeline_mode = #tpu.pipeline_mode<synchronous>, transform_indices = @transform_3, window_bounds = array<i64: 1, 128>}, {pipeline_mode = #tpu.pipeline_mode<synchronous>, transform_indices = @transform_4, window_bounds = array<i64: 1, 128>}]} {
    %c0_i32 = arith.constant 0 : i32
    %0 = arith.cmpi eq, %arg0, %c0_i32 : i32
    %c0_i32_0 = arith.constant 0 : i32
    %1 = arith.cmpi eq, %arg1, %c0_i32_0 : i32
    %2 = arith.andi %0, %1 : i1
    %3 = arith.extui %2 : i1 to i32
    %c0_i32_1 = arith.constant 0 : i32
    %4 = arith.cmpi ne, %3, %c0_i32_1 : i32
    scf.if %4 {
      %cst_20 = arith.constant 0.000000e+00 : f32
      %24 = vector.broadcast %cst_20 : f32 to vector<1x128xf32>
      %c0_21 = arith.constant 0 : index
      %c0_22 = arith.constant 0 : index
      %25 = vector.load %arg5[%c0_21, %c0_22] : memref<1x128xf32, #tpu.memory_space<vmem>>, vector<1x128xf32>
      tpu.vector_store %arg5[%c0_21, %c0_22], %24 {strides = array<i32>} : memref<1x128xf32, #tpu.memory_space<vmem>>, vector<1x128xf32>,
      %cst_23 = arith.constant 0.000000e+00 : f32
      %26 = vector.broadcast %cst_23 : f32 to vector<1x128xf32>
      %c0_24 = arith.constant 0 : index
      %c0_25 = arith.constant 0 : index
      %27 = vector.load %arg6[%c0_24, %c0_25] : memref<1x128xf32, #tpu.memory_space<vmem>>, vector<1x128xf32>
      tpu.vector_store %arg6[%c0_24, %c0_25], %26 {strides = array<i32>} : memref<1x128xf32, #tpu.memory_space<vmem>>, vector<1x128xf32>,
    } else {
    }
    %c0 = arith.constant 0 : index
    %c0_2 = arith.constant 0 : index
    %c0_3 = arith.constant 0 : index
    %5 = vector.load %arg2[%c0, %c0_2, %c0_3] : memref<1x512x64xbf16, #tpu.memory_space<vmem>>, vector<1x512x64xbf16>
    %6 = vector.shape_cast %5 : vector<1x512x64xbf16> to vector<512x64xbf16>
    %c0_4 = arith.constant 0 : index
    %c0_5 = arith.constant 0 : index
    %c0_6 = arith.constant 0 : index
    %7 = vector.load %arg3[%c0_4, %c0_5, %c0_6] : memref<1x64x128xbf16, #tpu.memory_space<vmem>>, vector<1x64x128xbf16>
    %8 = vector.shape_cast %7 : vector<1x64x128xbf16> to vector<64x128xbf16>
    %cst = arith.constant dense<0.000000e+00> : vector<512x128xf32>
    %9 = tpu.matmul %6, %8, %cst {dimension_numbers = #tpu.dot_dimension_numbers<[1], [0], [0], [1], [0, 0, 1, 1], [], []>} : vector<512x64xbf16>, vector<64x128xbf16>, vector<512x128xf32> -> vector<512x128xf32>
    %c0_7 = arith.constant 0 : index
    %c0_8 = arith.constant 0 : index
    %c0_9 = arith.constant 0 : index
    %10 = vector.load %arg4[%c0_7, %c0_8, %c0_9] : memref<1x512x128xf32, #tpu.memory_space<vmem>>, vector<1x512x128xf32>
    %11 = vector.shape_cast %10 : vector<1x512x128xf32> to vector<512x128xf32>
    %12 = vector.shape_cast %9 : vector<512x128xf32> to vector<1x512x128xf32>
    tpu.vector_store %arg4[%c0_7, %c0_8, %c0_9], %12 {strides = array<i32>} : memref<1x512x128xf32, #tpu.memory_space<vmem>>, vector<1x512x128xf32>,
    %c0_10 = arith.constant 0 : index
    %c0_11 = arith.constant 0 : index
    %13 = vector.load %arg5[%c0_10, %c0_11] : memref<1x128xf32, #tpu.memory_space<vmem>>, vector<1x128xf32>
    %cst_12 = arith.constant dense<0.000000e+00> : vector<128xf32>
    %14 = vector.multi_reduction <add>, %9, %cst_12 [0] : vector<512x128xf32> to vector<128xf32>
    %15 = vector.shape_cast %14 : vector<128xf32> to vector<1x128xf32>
    %16 = arith.addf %13, %15 : vector<1x128xf32>
    %c0_13 = arith.constant 0 : index
    %c0_14 = arith.constant 0 : index
    %17 = vector.load %arg5[%c0_13, %c0_14] : memref<1x128xf32, #tpu.memory_space<vmem>>, vector<1x128xf32>
    tpu.vector_store %arg5[%c0_13, %c0_14], %16 {strides = array<i32>} : memref<1x128xf32, #tpu.memory_space<vmem>>, vector<1x128xf32>,
    %c0_15 = arith.constant 0 : index
    %c0_16 = arith.constant 0 : index
    %18 = vector.load %arg6[%c0_15, %c0_16] : memref<1x128xf32, #tpu.memory_space<vmem>>, vector<1x128xf32>
    %19 = arith.mulf %9, %9 : vector<512x128xf32>
    %cst_17 = arith.constant dense<0.000000e+00> : vector<128xf32>
    %20 = vector.multi_reduction <add>, %19, %cst_17 [0] : vector<512x128xf32> to vector<128xf32>
    %21 = vector.shape_cast %20 : vector<128xf32> to vector<1x128xf32>
    %22 = arith.addf %18, %21 : vector<1x128xf32>
    %c0_18 = arith.constant 0 : index
    %c0_19 = arith.constant 0 : index
    %23 = vector.load %arg6[%c0_18, %c0_19] : memref<1x128xf32, #tpu.memory_space<vmem>>, vector<1x128xf32>
    tpu.vector_store %arg6[%c0_18, %c0_19], %22 {strides = array<i32>} : memref<1x128xf32, #tpu.memory_space<vmem>>, vector<1x128xf32>,
    return
  }
  func.func @transform_0(%arg0: i32, %arg1: i32) -> (i32, i32, i32) {
    %c0_i32 = arith.constant 0 : i32
    %c0_i32_0 = arith.constant 0 : i32
    return %arg0, %arg1, %c0_i32 : i32, i32, i32
  }
  func.func @transform_1(%arg0: i32, %arg1: i32) -> (i32, i32, i32) {
    %c0_i32 = arith.constant 0 : i32
    %c0_i32_0 = arith.constant 0 : i32
    %c0_i32_1 = arith.constant 0 : i32
    return %arg0, %c0_i32, %c0_i32_0 : i32, i32, i32
  }
  func.func @transform_2(%arg0: i32, %arg1: i32) -> (i32, i32, i32) {
    %c0_i32 = arith.constant 0 : i32
    %c0_i32_0 = arith.constant 0 : i32
    return %arg0, %arg1, %c0_i32 : i32, i32, i32
  }
  func.func @transform_3(%arg0: i32, %arg1: i32) -> (i32, i32) {
    %c0_i32 = arith.constant 0 : i32
    %c0_i32_0 = arith.constant 0 : i32
    %c0_i32_1 = arith.constant 0 : i32
    return %c0_i32, %c0_i32_0 : i32, i32
  }
  func.func @transform_4(%arg0: i32, %arg1: i32) -> (i32, i32) {
    %c0_i32 = arith.constant 0 : i32
    %c0_i32_0 = arith.constant 0 : i32
    %c0_i32_1 = arith.constant 0 : i32
    return %c0_i32, %c0_i32_0 : i32, i32
  }
}

module attributes {stable_mosaic.version = 11 : i64} {
  func.func @_mm_tanh_kernel(%arg0: i32, %arg1: i32, %arg2: memref<1x1024x32xbf16, #tpu.memory_space<vmem>>, %arg3: memref<1x32x128xbf16, #tpu.memory_space<vmem>>, %arg4: memref<1x1024x128xf32, #tpu.memory_space<vmem>>) attributes {dimension_semantics = [#tpu.dimension_semantics<parallel>, #tpu.dimension_semantics<parallel>], iteration_bounds = array<i64: 4, 2>, scalar_prefetch = 0 : i64, scratch_operands = 0 : i64, tpu.core_type = #tpu.core_type<tc>, window_params = [{transform_indices = @transform_0, window_bounds = array<i64: 1, 1024, 32>}, {transform_indices = @transform_1, window_bounds = array<i64: 1, 32, 128>}, {transform_indices = @transform_2, window_bounds = array<i64: 1, 1024, 128>}]} {
    %c0 = arith.constant 0 : index
    %c0_0 = arith.constant 0 : index
    %c0_1 = arith.constant 0 : index
    %0 = vector.load %arg2[%c0, %c0_0, %c0_1] : memref<1x1024x32xbf16, #tpu.memory_space<vmem>>, vector<1x1024x32xbf16>
    %1 = vector.shape_cast %0 : vector<1x1024x32xbf16> to vector<1024x32xbf16>
    %c0_2 = arith.constant 0 : index
    %c0_3 = arith.constant 0 : index
    %c0_4 = arith.constant 0 : index
    %2 = vector.load %arg3[%c0_2, %c0_3, %c0_4] : memref<1x32x128xbf16, #tpu.memory_space<vmem>>, vector<1x32x128xbf16>
    %3 = vector.shape_cast %2 : vector<1x32x128xbf16> to vector<32x128xbf16>
    %cst = arith.constant dense<0.000000e+00> : vector<1024x128xf32>
    %4 = tpu.matmul %1, %3, %cst {dimension_numbers = #tpu.dot_dimension_numbers<[1], [0], [0], [1], [0, 0, 1, 1], [], []>} : vector<1024x32xbf16>, vector<32x128xbf16>, vector<1024x128xf32> -> vector<1024x128xf32>
    %5 = math.tanh %4 : vector<1024x128xf32>
    %c0_5 = arith.constant 0 : index
    %c0_6 = arith.constant 0 : index
    %c0_7 = arith.constant 0 : index
    %6 = vector.load %arg4[%c0_5, %c0_6, %c0_7] : memref<1x1024x128xf32, #tpu.memory_space<vmem>>, vector<1x1024x128xf32>
    %7 = vector.shape_cast %6 : vector<1x1024x128xf32> to vector<1024x128xf32>
    %8 = vector.shape_cast %5 : vector<1024x128xf32> to vector<1x1024x128xf32>
    tpu.vector_store %arg4[%c0_5, %c0_6, %c0_7], %8 {strides = array<i32>} : memref<1x1024x128xf32, #tpu.memory_space<vmem>>, vector<1x1024x128xf32>,
    return
  }
  func.func @transform_0(%arg0: i32, %arg1: i32) -> (i32, i32, i32) {
    %c0_i32 = arith.constant 0 : i32
    %c0_i32_0 = arith.constant 0 : i32
    return %arg0, %arg1, %c0_i32 : i32, i32, i32
  }
  func.func @transform_1(%arg0: i32, %arg1: i32) -> (i32, i32, i32) {
    %c0_i32 = arith.constant 0 : i32
    %c0_i32_0 = arith.constant 0 : i32
    %c0_i32_1 = arith.constant 0 : i32
    return %arg0, %c0_i32, %c0_i32_0 : i32, i32, i32
  }
  func.func @transform_2(%arg0: i32, %arg1: i32) -> (i32, i32, i32) {
    %c0_i32 = arith.constant 0 : i32
    %c0_i32_0 = arith.constant 0 : i32
    return %arg0, %arg1, %c0_i32 : i32, i32, i32
  }
}

</mosaic_0001>

<bundles_post_ra>
// kernel: generator_forward.9
= control target key start
LH: loop header
LB: loop body
LE: loop exit
PB: predicated region body
PF: predicated region fallthrough
CT: control target
= control target key end

     0   :  { %10 = vsyncpa [#allocation3], 0  ;;  %s712_s0 = inlined_call_operand.vmem [shape: bf16[1,2,16], index: 0, kind: input, shape index: {}]   ;;  %s713_s1 = inlined_call_operand.hbm [shape: bf16[16,16,128], index: 1, kind: input, shape index: {}]   ;;  %s714_s2 = inlined_call_operand.vmem [shape: f32[16,2,128], index: 2, kind: output, shape index: {0}]   ;;  %s715_s3 = inlined_call_operand.vmem [shape: f32[1,128], index: 3, kind: output, shape index: {1}]   ;;  %s716_s4 = inlined_call_operand.vmem [shape: f32[1,128], index: 4, kind: output, shape index: {2}]  }
   0x1   :  { %12 = vsyncpa [#allocation3 + $0x1], 0  ;;  %s602_s15 = smov 0   ;;  %s604_s16 = smov 0  }
   0x2   :  { %s606_s17 = smov 0   ;;  %s608_s18 = smov 0  }
   0x3   :  { %s610_s19 = smov 0   ;;  %s612_s20 = smov 0  }
   0x4 LB: > { %s412_s21 = sadd.s32 4294967295, %s572_s20   ;;  %s30_s22 = sadd.s32 1, %s568_s19  ;;  %s572_s20 = sphi %s612_s20, %s18_s20   ;;  %s568_s19 = sphi %s610_s19, %s723_s19   ;;  %s564_s18 = sphi %s608_s18, %s722_s18   ;;  %s560_s17 = sphi %s606_s17, %s721_s17   ;;  %s556_s16 = sphi %s604_s16, %s720_s16   ;;  %s552_s15 = sphi %s602_s15, %s719_s15  }
   0x5   : > { %p32_p0 = scmp.ge.s32.totalorder %s30_s22, 16  ;;  %s63_s23 = sadd.s32 1, %s560_s17 }
   0x6   : > { %p70_p1 = scmp.ne.s32.totalorder %s560_s17, %s556_s16  ;;  %p71_p2 = scmp.eq.s32.totalorder %s572_s20, 0 }
   0x7   : > { %s725_s22 = smov (%p32_p0, %s30_s22), 0  ;;  %p76_p4 = scmp.ne.s32.totalorder %s556_s16, %s552_s15 }
   0x8   : > { %p638_p3 = por %p71_p2, %p70_p1  ;;  %s60_s25 = ssub.s32 %s568_s19, %s725_s22 }
   0x9   : > { %p77_p5 = scmp.eq.s32.totalorder %s412_s21, 0  ;;  %p61_p6 = scmp.eq.s32.totalorder %s60_s25, 0 }
   0xa   : > { %p440_p8 = scmp.lt.s32.totalorder %s572_s20, 16  ;;  %s176_s28 = sand.u32 1, %s560_s17  }
   0xb   : > { %p645_p7 = por %p77_p5, %p76_p4  ;;  %s431_s29 = sshll.u32 %s568_s19, 3 }
   0xc   : > { %s651_s27 = scalar_select %p61_p6, %s560_s17, %s63_s23  }
   0xd   : > { %s417_s30 = sshll.u32 %s176_s28, 3  ;;  %s185_s7 = scalar_lea.hbm %s713_s1, %s431_s29 }
   0xe   : > { %s186_s8 = sshll.u32 %s185_s7, 4  ;;  %s180_s9 = scalar_lea.vmem [#allocation2], %s417_s30  ;;  %s187_s8 = int_to_ptr.hbm [resolvable:$true] %s186_s8 }
   0xf   : > { %s188_s10 = sshll.u32 %s180_s9, 4  ;;  %p437_p9 = pnand %p440_p8, %p638_p3  ;;  %s189_s10 = int_to_ptr.vmem [resolvable:$true] %s188_s10 }
  0x10   : > { %p420_p10 = scmp.ge.s32.totalorder %s572_s20, 1  ;;  %p196_p11 = scmp.lt.s32.totalorder %s572_s20, 17 }
  0x11   : > { %s177_s11 = scalar_lea.sflag [#allocation3], %s176_s28  ;;  %s574_s12 = smov 64  }
  0x12   : > { %s575_s13 = smov 4   ;;  %p197_p12 = pnand %p420_p10, %p196_p11 }
  0x13   : > { %439 = dma.hbm_to_vmem [thread:$0]  (!%p437_p9), %s187_s8, 128, %s189_s10, %s177_s11, %s574_s12, %s574_s12, %s575_s13  }
  0x14   : > { %200 = sbr.rel (%p197_p12) target bundleno = 181 (0xb5), region = 28  ;;  %s202_s14 = sand.u32 (!%p197_p12), 1, %s556_s16  }
  0x15   : > { %s421_s15 = sshll.u32 (!%p197_p12), %s202_s14, 3  ;;  %s203_s21 = scalar_lea.sflag (!%p197_p12), [#allocation3], %s202_s14 }
  0x16   : > { %s206_s23 = scalar_lea.vmem (!%p197_p12), [#allocation2], %s421_s15 }
  0x19   : > { %547 = dma.done.wait (%p645_p7), %s203_s21, 128  }
  0x1a   : > { %549 = vsyncadd (%p645_p7), %s203_s21, 4294967168  ;;  %p240_p13 = scmp.lt.s32.totalorder %s564_s18, 15  ;;  %p248_p0 = scmp.eq.s32.totalorder %s564_s18, 0 }
  0x1b   : > { %v576_v0 = vmov (%p248_p0), 0.0  }
  0x1c   : > { %s727_s18 = smov (!%p240_p13, %s564_s18), 15  ;;  %253 = sbr.rel (!%p248_p0) target bundleno = 33 (0x21), region = 36  ;;  %254 = vst [vmem:[%s715_s3] sm:$0x1] (%p248_p0), %v576_v0 }
  0x1d   : > { %s422_s24 = sshll.u32 %s727_s18, 1  ;;  %255 = vst [vmem:[%s716_s4] sm:$0x1] (%p248_p0), %v576_v0 }
  0x1e   : > { %s246_s29 = scalar_lea.vmem %s714_s2, %s422_s24 }
  0x21 PF: > { %v433_v1 = vld [vmem:[%s206_s23] sm:$0xff]  ;;  %vm265_vm0 = vcmask 130048   ;;  %vm284_vm1 = vcmask 1041408  }
  0x22   : > { %276 = vmatpush.bf16.msra.mxu0 %v433_v1  ;;  %v256_v2 = vld [vmem:[%s712_s0] sm:$0x1] }
  0x23   : > { %v283_v17 = vld [vmem:[%s715_s3] sm:$0x1] }
  0x24   : > { %v294_v20 = vld [vmem:[%s716_s4] sm:$0x1] }
  0x25   : > { %428 = vmatmul.msk.bf16.vlgmr.msra.gmra.mxu0 %vm265_vm0, %v256_v2 }
  0xa2   : > { %v278_v3 = vpop.f32.mrf.mxu0 }
  0xa3   : > { %282 = vst [vmem:[%s246_s29] sm:$0x3] %v278_v3  ;;  %v285_v4 = vsel %vm284_vm1, %v278_v3, 0.0  ;;  %v295_v5 = vmul.f32 %v278_v3, %v278_v3 }
  0xa4   : > { %v286_v6 = vrot.slane %v285_v4, 4 }
  0xa5   : > { %v296_v7 = vsel %vm284_vm1, %v295_v5, 0.0 }
  0xa6   : > { %v287_v8 = vadd.f32 %v286_v6, %v285_v4  ;;  %v297_v9 = vrot.slane %v296_v7, 4 }
  0xa8   : > { %v288_v10 = vrot.slane %v287_v8, 2  ;;  %v298_v11 = vadd.f32 %v297_v9, %v296_v7 }
  0xaa   : > { %v289_v12 = vadd.f32 %v288_v10, %v287_v8  ;;  %v299_v13 = vrot.slane %v298_v11, 2  ;;  %v280_v14 = vpop.f32.mrf.mxu0 }
  0xac   : > { %v290_v15 = vrot.slane %v289_v12, 1  ;;  %v300_v16 = vadd.f32 %v299_v13, %v298_v11 }
  0xae   : > { %v291_v18 = vadd.f32 %v290_v15, %v289_v12  ;;  %v301_v19 = vrot.slane %v300_v16, 1 }
  0xb0   : > { %v292_v21 = vadd.f32 %v291_v18, %v283_v17  ;;  %v302_v22 = vadd.f32 %v301_v19, %v300_v16 }
  0xb2   : > { %293 = vst [vmem:[%s715_s3] sm:$0x1] %v292_v21  ;;  %v303_v23 = vadd.f32 %v302_v22, %v294_v20 }
  0xb4   : > { %304 = vst [vmem:[%s716_s4] sm:$0x1] %v303_v23 }
  0xb5 PF: > { %s18_s20 = sadd.s32 1, %s572_s20   ;;  %s719_s15 = smov %s556_s16 }
  0xb6   : > { %p15_p1 = scmp.ge.s32.totalorder %s18_s20, 18   ;;  %s720_s16 = smov %s560_s17 }
  0xb7   : > { %s721_s17 = smov %s651_s27  ;;  %s722_s18 = smov %s568_s19 }
  0xb8   : > { %s723_s19 = smov %s725_s22  ;;  %17 = sbr.rel (!%p15_p1) target bundleno = 4 (0x4), region = 91 }
  0xbd   :  { %342 = vsyncpa [#allocation3], 1 }
  0xbe   :  { %344 = vsyncpa [#allocation3 + $0x1], 1 }

// kernel: generator_forward.10
= control target key start
LH: loop header
LB: loop body
LE: loop exit
PB: predicated region body
PF: predicated region fallthrough
CT: control target
= control target key end

     0   :  { %s107_s0 = inlined_call_operand.vmem [shape: f32[32,128], index: 0, kind: input, shape index: {}]   ;;  %s108_s1 = inlined_call_operand.vmem [shape: f32[1,128], index: 1, kind: input, shape index: {}]   ;;  %s109_s2 = inlined_call_operand.vmem [shape: f32[1,128], index: 2, kind: input, shape index: {}]   ;;  %s110_s3 = inlined_call_operand.vmem [shape: bf16[32,128], index: 3, kind: output, shape index: {}]  }
   0x1   :  { %v14_v0 = vld [vmem:[%s107_s0] sm:$0xff]  ;;  %v15_v1 = vld [vmem:[%s107_s0 + $0x8] sm:$0xff]  ;;  %v16_v4 = vld [vmem:[%s107_s0 + $0x10] sm:$0xff] }
   0x2   :  { %v61_v2 = vld [vmem:[%s108_s1] ss:$0 sm:$0xff]  ;;  %v17_v5 = vld [vmem:[%s107_s0 + $0x18] sm:$0xff] }
   0x3   :  { %v62_v3 = vld [vmem:[%s109_s2] ss:$0 sm:$0xff]  ;;  %v22_v6 = vmul.f32 %v61_v2, %v14_v0  ;;  %v23_v7 = vmul.f32 %v61_v2, %v15_v1  ;;  %v24_v8 = vmul.f32 %v61_v2, %v16_v4  ;;  %v25_v9 = vmul.f32 %v61_v2, %v17_v5 }
   0x5   :  { %v30_v10 = vadd.f32 %v62_v3, %v22_v6  ;;  %v31_v11 = vadd.f32 %v62_v3, %v23_v7  ;;  %v32_v12 = vadd.f32 %v62_v3, %v24_v8  ;;  %v33_v13 = vadd.f32 %v62_v3, %v25_v9 }
   0x7   :  { %v34_v14 = vmax.f32 %v30_v10, 0.0  ;;  %v35_v15 = vmax.f32 %v31_v11, 0.0  ;;  %v36_v16 = vmax.f32 %v32_v12, 0.0  ;;  %v37_v17 = vmax.f32 %v33_v13, 0.0 }
   0x9   :  { %v53_v18 = vpack.c.bf16 %v35_v15, %v34_v14  ;;  %v58_v19 = vpack.c.bf16 %v37_v17, %v36_v16 }
   0xb   :  { %54 = vst [vmem:[%s110_s3] sm:$0xff] %v53_v18  }
   0xc   :  { %60 = vst [vmem:[%s110_s3 + $0x8] sm:$0xff] %v58_v19  }

// kernel: generator_forward.12
= control target key start
LH: loop header
LB: loop body
LE: loop exit
PB: predicated region body
PF: predicated region fallthrough
CT: control target
= control target key end

     0   :  { %s287_s0 = inlined_call_operand.vmem [shape: f32[128,128], index: 0, kind: input, shape index: {}]   ;;  %s288_s1 = inlined_call_operand.vmem [shape: f32[1,128], index: 1, kind: input, shape index: {}]   ;;  %s289_s2 = inlined_call_operand.vmem [shape: f32[1,128], index: 2, kind: input, shape index: {}]   ;;  %s290_s3 = inlined_call_operand.vmem [shape: bf16[128,128], index: 3, kind: output, shape index: {}]  }
   0x1   :  { %v14_v0 = vld [vmem:[%s287_s0] sm:$0xff]  ;;  %v15_v1 = vld [vmem:[%s287_s0 + $0x8] sm:$0xff]  ;;  %v16_v4 = vld [vmem:[%s287_s0 + $0x10] sm:$0xff] }
   0x2   :  { %v169_v2 = vld [vmem:[%s288_s1] ss:$0 sm:$0xff]  ;;  %v17_v5 = vld [vmem:[%s287_s0 + $0x18] sm:$0xff]  ;;  %v19_v11 = vld [vmem:[%s287_s0 + $0x28] sm:$0xff] }
   0x3   :  { %v203_v3 = vld [vmem:[%s289_s2] ss:$0 sm:$0xff]  ;;  %v34_v7 = vmul.f32 %v169_v2, %v14_v0  ;;  %v35_v8 = vmul.f32 %v169_v2, %v15_v1  ;;  %v36_v9 = vmul.f32 %v169_v2, %v16_v4  ;;  %v37_v10 = vmul.f32 %v169_v2, %v17_v5  ;;  %v20_v12 = vld [vmem:[%s287_s0 + $0x30] sm:$0xff]  ;;  %v21_v13 = vld [vmem:[%s287_s0 + $0x38] sm:$0xff] }
   0x4   :  { %v18_v6 = vld [vmem:[%s287_s0 + $0x20] sm:$0xff]  ;;  %v39_v15 = vmul.f32 %v169_v2, %v19_v11  ;;  %v40_v16 = vmul.f32 %v169_v2, %v20_v12  ;;  %v41_v17 = vmul.f32 %v169_v2, %v21_v13  ;;  %v23_v27 = vld [vmem:[%s287_s0 + $0x48] sm:$0xff]  ;;  %v24_v32 = vld [vmem:[%s287_s0 + $0x50] sm:$0xff] }
   0x5   :  { %v38_v14 = vmul.f32 %v169_v2, %v18_v6  ;;  %v54_v18 = vadd.f32 %v203_v3, %v34_v7  ;;  %v55_v19 = vadd.f32 %v203_v3, %v35_v8  ;;  %v56_v20 = vadd.f32 %v203_v3, %v36_v9  ;;  %v22_v26 = vld [vmem:[%s287_s0 + $0x40] sm:$0xff]  ;;  %v25_v33 = vld [vmem:[%s287_s0 + $0x58] sm:$0xff]  ;;  %v27_v39 = vld [vmem:[%s287_s0 + $0x68] sm:$0xff] }
   0x6   :  { %v57_v21 = vadd.f32 %v203_v3, %v37_v10  ;;  %v59_v23 = vadd.f32 %v203_v3, %v39_v15  ;;  %v60_v24 = vadd.f32 %v203_v3, %v40_v16  ;;  %v61_v25 = vadd.f32 %v203_v3, %v41_v17  ;;  %v26_v38 = vld [vmem:[%s287_s0 + $0x60] sm:$0xff]  ;;  %v28_v44 = vld [vmem:[%s287_s0 + $0x70] sm:$0xff]  ;;  %v29_v45 = vld [vmem:[%s287_s0 + $0x78] sm:$0xff] }
   0x7   :  { %v58_v22 = vadd.f32 %v203_v3, %v38_v14  ;;  %v70_v28 = vmax.f32 %v54_v18, 0.0  ;;  %v71_v29 = vmax.f32 %v55_v19, 0.0  ;;  %v72_v30 = vmax.f32 %v56_v20, 0.0 }
   0x8   :  { %v73_v31 = vmax.f32 %v57_v21, 0.0  ;;  %v75_v35 = vmax.f32 %v59_v23, 0.0  ;;  %v76_v36 = vmax.f32 %v60_v24, 0.0  ;;  %v77_v37 = vmax.f32 %v61_v25, 0.0 }
   0x9   :  { %v74_v34 = vmax.f32 %v58_v22, 0.0  ;;  %v125_v40 = vpack.c.bf16 %v71_v29, %v70_v28  ;;  %v42_v42 = vmul.f32 %v169_v2, %v22_v26  ;;  %v43_v43 = vmul.f32 %v169_v2, %v23_v27 }
   0xa   :  { %v130_v41 = vpack.c.bf16 %v73_v31, %v72_v30  ;;  %v140_v47 = vpack.c.bf16 %v77_v37, %v76_v36  ;;  %v44_v48 = vmul.f32 %v169_v2, %v24_v32  ;;  %v45_v49 = vmul.f32 %v169_v2, %v25_v33 }
   0xb   :  { %v135_v46 = vpack.c.bf16 %v75_v35, %v74_v34  ;;  %126 = vst [vmem:[%s290_s3] sm:$0xff] %v125_v40   ;;  %v62_v50 = vadd.f32 %v203_v3, %v42_v42  ;;  %v63_v51 = vadd.f32 %v203_v3, %v43_v43  ;;  %v46_v52 = vmul.f32 %v169_v2, %v26_v38 }
   0xc   :  { %v47_v53 = vmul.f32 %v169_v2, %v27_v39  ;;  %162 = vst [vmem:[%s290_s3 + $0x8] sm:$0xff] %v130_v41   ;;  %v64_v54 = vadd.f32 %v203_v3, %v44_v48  ;;  %v65_v55 = vadd.f32 %v203_v3, %v45_v49  ;;  %v48_v56 = vmul.f32 %v169_v2, %v28_v44 }
   0xd   :  { %v49_v57 = vmul.f32 %v169_v2, %v29_v45  ;;  %163 = vst [vmem:[%s290_s3 + $0x10] sm:$0xff] %v135_v46   ;;  %v78_v58 = vmax.f32 %v62_v50, 0.0  ;;  %v79_v59 = vmax.f32 %v63_v51, 0.0  ;;  %v66_v60 = vadd.f32 %v203_v3, %v46_v52 }
   0xe   :  { %v67_v61 = vadd.f32 %v203_v3, %v47_v53  ;;  %164 = vst [vmem:[%s290_s3 + $0x18] sm:$0xff] %v140_v47   ;;  %v80_v62 = vmax.f32 %v64_v54, 0.0  ;;  %v81_v63 = vmax.f32 %v65_v55, 0.0  ;;  %v68_v0 = vadd.f32 %v203_v3, %v48_v56 }
   0xf   :  { %v69_v1 = vadd.f32 %v203_v3, %v49_v57  ;;  %v145_v2 = vpack.c.bf16 %v79_v59, %v78_v58  ;;  %v82_v4 = vmax.f32 %v66_v60, 0.0 }
  0x10   :  { %v83_v5 = vmax.f32 %v67_v61, 0.0  ;;  %v150_v6 = vpack.c.bf16 %v81_v63, %v80_v62  ;;  %v84_v7 = vmax.f32 %v68_v0, 0.0 }
  0x11   :  { %v85_v8 = vmax.f32 %v69_v1, 0.0  ;;  %165 = vst [vmem:[%s290_s3 + $0x20] sm:$0xff] %v145_v2  }
  0x12   :  { %v155_v9 = vpack.c.bf16 %v83_v5, %v82_v4  ;;  %166 = vst [vmem:[%s290_s3 + $0x28] sm:$0xff] %v150_v6  }
  0x13   :  { %v160_v10 = vpack.c.bf16 %v85_v8, %v84_v7 }
  0x14   :  { %167 = vst [vmem:[%s290_s3 + $0x30] sm:$0xff] %v155_v9  }
  0x15   :  { %168 = vst [vmem:[%s290_s3 + $0x38] sm:$0xff] %v160_v10  }

// kernel: generator_forward.11
= control target key start
LH: loop header
LB: loop body
LE: loop exit
PB: predicated region body
PF: predicated region fallthrough
CT: control target
= control target key end

     0   :  { %10 = vsyncpa [#allocation3], 0  ;;  %s1080_s0 = inlined_call_operand.vmem [shape: bf16[4,32,256], index: 0, kind: input, shape index: {}]   ;;  %s1081_s1 = inlined_call_operand.hbm [shape: bf16[4,256,128], index: 1, kind: input, shape index: {}]   ;;  %s1082_s2 = inlined_call_operand.vmem [shape: f32[4,32,128], index: 2, kind: output, shape index: {0}]   ;;  %s1083_s3 = inlined_call_operand.vmem [shape: f32[1,128], index: 3, kind: output, shape index: {1}]   ;;  %s1084_s4 = inlined_call_operand.vmem [shape: f32[1,128], index: 4, kind: output, shape index: {2}]  }
   0x1   :  { %12 = vsyncpa [#allocation3 + $0x1], 0  ;;  %s936_s15 = smov 0   ;;  %s938_s16 = smov 0  }
   0x2   :  { %s940_s17 = smov 0   ;;  %s942_s18 = smov 0  }
   0x3   :  { %s944_s19 = smov 0   ;;  %s946_s20 = smov 0  }
   0x4 LB: > { %s632_s21 = sadd.s32 4294967295, %s906_s20   ;;  %s30_s22 = sadd.s32 1, %s902_s19  ;;  %s906_s20 = sphi %s946_s20, %s18_s20   ;;  %s902_s19 = sphi %s944_s19, %s1091_s19   ;;  %s898_s18 = sphi %s942_s18, %s1090_s18   ;;  %s894_s17 = sphi %s940_s17, %s1089_s17   ;;  %s890_s16 = sphi %s938_s16, %s1088_s16   ;;  %s886_s15 = sphi %s936_s15, %s1087_s15  }
   0x5   : > { %p32_p0 = scmp.ge.s32.totalorder %s30_s22, 4  ;;  %s65_s23 = sadd.s32 1, %s894_s17 }
   0x6   : > { %p72_p1 = scmp.ne.s32.totalorder %s894_s17, %s890_s16  ;;  %p73_p2 = scmp.eq.s32.totalorder %s906_s20, 0 }
   0x7   : > { %s1093_s22 = smov (%p32_p0, %s30_s22), 0  ;;  %p78_p4 = scmp.ne.s32.totalorder %s890_s16, %s886_s15 }
   0x8   : > { %p972_p3 = por %p73_p2, %p72_p1  ;;  %s62_s25 = ssub.s32 %s902_s19, %s1093_s22 }
   0x9   : > { %p79_p5 = scmp.eq.s32.totalorder %s632_s21, 0  ;;  %p63_p6 = scmp.eq.s32.totalorder %s62_s25, 0 }
   0xa   : > { %p774_p8 = scmp.lt.s32.totalorder %s906_s20, 4  ;;  %s186_s28 = sand.u32 1, %s894_s17  }
   0xb   : > { %p979_p7 = por %p79_p5, %p78_p4  ;;  %s728_s29 = sshll.u32 %s902_s19, 7 }
   0xc   : > { %s985_s27 = scalar_select %p63_p6, %s894_s17, %s65_s23  }
   0xd   : > { %s636_s30 = sshll.u32 %s186_s28, 7  ;;  %s195_s7 = scalar_lea.hbm %s1081_s1, %s728_s29 }
   0xe   : > { %s196_s8 = sshll.u32 %s195_s7, 4  ;;  %s190_s9 = scalar_lea.vmem [#allocation2], %s636_s30  ;;  %s197_s8 = int_to_ptr.hbm [resolvable:$true] %s196_s8 }
   0xf   : > { %s198_s10 = sshll.u32 %s190_s9, 4  ;;  %p771_p9 = pnand %p774_p8, %p972_p3  ;;  %s199_s10 = int_to_ptr.vmem [resolvable:$true] %s198_s10 }
  0x10   : > { %p639_p10 = scmp.ge.s32.totalorder %s906_s20, 1  ;;  %p206_p11 = scmp.lt.s32.totalorder %s906_s20, 5 }
  0x11   : > { %s187_s11 = scalar_lea.sflag [#allocation3], %s186_s28  ;;  %s908_s12 = smov 64  }
  0x12   : > { %s909_s13 = smov 4   ;;  %p207_p12 = pnand %p639_p10, %p206_p11 }
  0x13   : > { %773 = dma.hbm_to_vmem [thread:$0]  (!%p771_p9), %s197_s8, 2048, %s199_s10, %s187_s11, %s908_s12, %s908_s12, %s909_s13  }
  0x14   : > { %210 = sbr.rel (%p207_p12) target bundleno = 227 (0xe3), region = 28  ;;  %s212_s14 = sand.u32 (!%p207_p12), 1, %s890_s16  }
  0x15   : > { %s640_s15 = sshll.u32 (!%p207_p12), %s212_s14, 7  ;;  %s213_s21 = scalar_lea.sflag (!%p207_p12), [#allocation3], %s212_s14 }
  0x16   : > { %s997_s23 = scalar_lea.vmem (!%p207_p12), [#allocation2], %s640_s15 }
  0x19   : > { %881 = dma.done.wait (%p979_p7), %s213_s21, 2048  }
  0x1a   : > { %883 = vsyncadd (%p979_p7), %s213_s21, 4294965248  ;;  %p257_p13 = scmp.lt.s32.totalorder %s898_s18, 3  ;;  %p277_p0 = scmp.eq.s32.totalorder %s898_s18, 0 }
  0x1b   : > { %v910_v0 = vmov (%p277_p0), 0.0  }
  0x1c   : > { %s1095_s18 = smov (!%p257_p13, %s898_s18), 3  ;;  %282 = sbr.rel (!%p277_p0) target bundleno = 33 (0x21), region = 36  ;;  %283 = vst [vmem:[%s1083_s3] sm:$0x1] (%p277_p0), %v910_v0 }
  0x1d   : > { %s729_s24 = sshll.u32 %s1095_s18, 5  ;;  %284 = vst [vmem:[%s1084_s4] sm:$0x1] (%p277_p0), %v910_v0 }
  0x1e   : > { %s1009_s29 = scalar_lea.vmem %s1080_s0, %s729_s24  ;;  %s1014_s6 = scalar_lea.vmem %s1082_s2, %s729_s24 }
  0x21 PF: > { %v743_v1 = vld [vmem:[%s997_s23 + $0x38] sm:$0xff]  ;;  %v742_v3 = vld [vmem:[%s997_s23 + $0x30] sm:$0xff]  ;;  %v741_v5 = vld [vmem:[%s997_s23 + $0x28] sm:$0xff] }
  0x22   : > { %v751_v2 = vld [vmem:[%s997_s23 + $0x78] sm:$0xff]  ;;  %437 = vmatpush.bf16.msra.mxu0 %v743_v1  ;;  %752 = vmatpush.bf16.msra.mxu2 %v743_v1  ;;  %v750_v4 = vld [vmem:[%s997_s23 + $0x70] sm:$0xff]  ;;  %v749_v6 = vld [vmem:[%s997_s23 + $0x68] sm:$0xff] }
  0x23   : > { %456 = vmatpush.bf16.msra.mxu1 %v751_v2  ;;  %760 = vmatpush.bf16.msra.mxu3 %v751_v2  ;;  %v740_v7 = vld [vmem:[%s997_s23 + $0x20] sm:$0xff]  ;;  %v739_v9 = vld [vmem:[%s997_s23 + $0x18] sm:$0xff]  ;;  %v738_v11 = vld [vmem:[%s997_s23 + $0x10] sm:$0xff] }
  0x24   : > { %v748_v8 = vld [vmem:[%s997_s23 + $0x60] sm:$0xff]  ;;  %v747_v10 = vld [vmem:[%s997_s23 + $0x58] sm:$0xff]  ;;  %v746_v12 = vld [vmem:[%s997_s23 + $0x50] sm:$0xff] }
  0x25   : > { %v737_v13 = vld [vmem:[%s997_s23 + $0x8] sm:$0xff]  ;;  %v736_v15 = vld [vmem:[%s997_s23] sm:$0xff]  ;;  %v656_v19 = vld [vmem:[%s1009_s29 + $0x10] sm:$0xf] }
  0x26   : > { %438 = vmatpush.bf16.msra.mxu0 %v742_v3  ;;  %753 = vmatpush.bf16.msra.mxu2 %v742_v3  ;;  %v745_v14 = vld [vmem:[%s997_s23 + $0x48] sm:$0xff]  ;;  %v744_v16 = vld [vmem:[%s997_s23 + $0x40] sm:$0xff]  ;;  %v735_v20 = vld [vmem:[%s1009_s29 + $0x14] sm:$0xf0] }
  0x27   : > { %457 = vmatpush.bf16.msra.mxu1 %v750_v4  ;;  %761 = vmatpush.bf16.msra.mxu3 %v750_v4  ;;  %v648_v17 = vld [vmem:[%s1009_s29] sm:$0xf]  ;;  %v733_v18 = vld [vmem:[%s1009_s29 + $0x4] sm:$0xf0]  ;;  %v732_v21 = vld [vmem:[%s1009_s29 + $0x4] sm:$0xf]  ;;  %v657_v26 = vor.u32 %v735_v20, %v656_v19 }
  0x28   : > { %v650_v22 = vld [vmem:[%s1009_s29 + $0x8] sm:$0xf0]  ;;  %v734_v23 = vld [vmem:[%s1009_s29 + $0x14] sm:$0xf]  ;;  %v658_v24 = vld [vmem:[%s1009_s29 + $0x18] sm:$0xf0]  ;;  %v649_v25 = vor.u32 %v733_v18, %v648_v17 }
  0x29   : > { %v653_v27 = vor.u32 %v732_v21, %v650_v22  ;;  %v661_v28 = vor.u32 %v734_v23, %v658_v24  ;;  %v479_v60 = vld [vmem:[%s1083_s3] sm:$0x1] }
  0x2a   : > { %439 = vmatpush.bf16.msra.mxu0 %v741_v5  ;;  %754 = vmatpush.bf16.msra.mxu2 %v741_v5  ;;  %v491_v63 = vld [vmem:[%s1084_s4] sm:$0x1] }
  0x2b   : > { %458 = vmatpush.bf16.msra.mxu1 %v749_v6  ;;  %762 = vmatpush.bf16.msra.mxu3 %v749_v6 }
  0x2e   : > { %440 = vmatpush.bf16.msra.mxu0 %v740_v7  ;;  %755 = vmatpush.bf16.msra.mxu2 %v740_v7 }
  0x2f   : > { %459 = vmatpush.bf16.msra.mxu1 %v748_v8  ;;  %763 = vmatpush.bf16.msra.mxu3 %v748_v8 }
  0x32   : > { %441 = vmatpush.bf16.msra.mxu0 %v739_v9  ;;  %756 = vmatpush.bf16.msra.mxu2 %v739_v9 }
  0x33   : > { %460 = vmatpush.bf16.msra.mxu1 %v747_v10  ;;  %764 = vmatpush.bf16.msra.mxu3 %v747_v10 }
  0x36   : > { %442 = vmatpush.bf16.msra.mxu0 %v738_v11  ;;  %757 = vmatpush.bf16.msra.mxu2 %v738_v11 }
  0x37   : > { %461 = vmatpush.bf16.msra.mxu1 %v746_v12  ;;  %765 = vmatpush.bf16.msra.mxu3 %v746_v12 }
  0x3a   : > { %443 = vmatpush.bf16.msra.mxu0 %v737_v13  ;;  %758 = vmatpush.bf16.msra.mxu2 %v737_v13 }
  0x3b   : > { %462 = vmatpush.bf16.msra.mxu1 %v745_v14  ;;  %766 = vmatpush.bf16.msra.mxu3 %v745_v14 }
  0x3e   : > { %444 = vmatpush.bf16.msra.mxu0 %v736_v15  ;;  %759 = vmatpush.bf16.msra.mxu2 %v736_v15 }
  0x3f   : > { %463 = vmatpush.bf16.msra.mxu1 %v744_v16  ;;  %767 = vmatpush.bf16.msra.mxu3 %v744_v16 }
  0x41   : > { %445 = vmatmul.bf16.vlgmr.msra.gmra.mxu0 %v649_v25  ;;  %450 = vmatmul.bf16.vlgmr.msra.gmra.mxu2 %v657_v26 }
  0x42   : > { %464 = vmatmul.bf16.vlgmr.msra.gmra.mxu1 %v653_v27  ;;  %469 = vmatmul.bf16.vlgmr.msra.gmra.mxu3 %v661_v28 }
  0xbe   : > { %v446_v29 = vpop.f32.mrf.mxu0 }
  0xbf   : > { %v465_v30 = vpop.f32.mrf.mxu1 }
  0xc0   : > { %v466_v31 = vadd.f32 %v465_v30, %v446_v29 }
  0xc2   : > { %475 = vst [vmem:[%s1014_s6] sm:$0xff] %v466_v31  ;;  %v492_v38 = vmul.f32 %v466_v31, %v466_v31 }
  0xc4   : > { %v451_v32 = vpop.f32.mrf.mxu2 }
  0xc5   : > { %v470_v33 = vpop.f32.mrf.mxu3 }
  0xc6   : > { %v471_v34 = vadd.f32 %v470_v33, %v451_v32  ;;  %v448_v35 = vpop.f32.mrf.mxu0 }
  0xc7   : > { %v467_v36 = vpop.f32.mrf.mxu1 }
  0xc8   : > { %477 = vst [vmem:[%s1014_s6 + $0x10] sm:$0xff] %v471_v34  ;;  %v468_v37 = vadd.f32 %v467_v36, %v448_v35  ;;  %v494_v44 = vmul.f32 %v471_v34, %v471_v34 }
  0xca   : > { %476 = vst [vmem:[%s1014_s6 + $0x8] sm:$0xff] %v468_v37  ;;  %v480_v39 = vadd.f32 %v468_v37, %v466_v31  ;;  %v493_v40 = vmul.f32 %v468_v37, %v468_v37 }
  0xcc   : > { %v496_v41 = vadd.f32 %v493_v40, %v492_v38  ;;  %v453_v42 = vpop.f32.mrf.mxu2  ;;  %v481_v46 = vadd.f32 %v480_v39, %v471_v34 }
  0xcd   : > { %v472_v43 = vpop.f32.mrf.mxu3 }
  0xce   : > { %v473_v45 = vadd.f32 %v472_v43, %v453_v42  ;;  %v497_v49 = vadd.f32 %v496_v41, %v494_v44 }
  0xd0   : > { %478 = vst [vmem:[%s1014_s6 + $0x18] sm:$0xff] %v473_v45  ;;  %v482_v47 = vadd.f32 %v481_v46, %v473_v45  ;;  %v495_v48 = vmul.f32 %v473_v45, %v473_v45 }
  0xd2   : > { %v483_v50 = vrot.slane %v482_v47, 4  ;;  %v498_v51 = vadd.f32 %v497_v49, %v495_v48 }
  0xd4   : > { %v484_v52 = vadd.f32 %v483_v50, %v482_v47  ;;  %v499_v53 = vrot.slane %v498_v51, 4 }
  0xd6   : > { %v485_v54 = vrot.slane %v484_v52, 2  ;;  %v500_v55 = vadd.f32 %v499_v53, %v498_v51 }
  0xd8   : > { %v486_v56 = vadd.f32 %v485_v54, %v484_v52  ;;  %v501_v57 = vrot.slane %v500_v55, 2 }
  0xda   : > { %v487_v58 = vrot.slane %v486_v56, 1  ;;  %v502_v59 = vadd.f32 %v501_v57, %v500_v55 }
  0xdc   : > { %v488_v61 = vadd.f32 %v487_v58, %v486_v56  ;;  %v503_v62 = vrot.slane %v502_v59, 1 }
  0xde   : > { %v489_v0 = vadd.f32 %v488_v61, %v479_v60  ;;  %v504_v1 = vadd.f32 %v503_v62, %v502_v59 }
  0xe0   : > { %490 = vst [vmem:[%s1083_s3] sm:$0x1] %v489_v0  ;;  %v505_v2 = vadd.f32 %v504_v1, %v491_v63 }
  0xe2   : > { %506 = vst [vmem:[%s1084_s4] sm:$0x1] %v505_v2 }
  0xe3 PF: > { %s18_s20 = sadd.s32 1, %s906_s20   ;;  %s1087_s15 = smov %s890_s16 }
  0xe4   : > { %p15_p1 = scmp.ge.s32.totalorder %s18_s20, 6   ;;  %s1088_s16 = smov %s894_s17 }
  0xe5   : > { %s1089_s17 = smov %s985_s27  ;;  %s1090_s18 = smov %s902_s19 }
  0xe6   : > { %s1091_s19 = smov %s1093_s22  ;;  %17 = sbr.rel (!%p15_p1) target bundleno = 4 (0x4), region = 91 }
  0xeb   :  { %549 = vsyncpa [#allocation3], 1 }
  0xec   :  { %551 = vsyncpa [#allocation3 + $0x1], 1 }

// kernel: generator_forward.13
= control target key start
LH: loop header
LB: loop body
LE: loop exit
PB: predicated region body
PF: predicated region fallthrough
CT: control target
= control target key end

     0   :  { %10 = vsyncpa [#allocation3], 0  ;;  %s1101_s0 = inlined_call_operand.vmem [shape: bf16[4,128,128], index: 0, kind: input, shape index: {}]   ;;  %s1102_s1 = inlined_call_operand.hbm [shape: bf16[4,128,128], index: 1, kind: input, shape index: {}]   ;;  %s1103_s2 = inlined_call_operand.vmem [shape: f32[4,128,128], index: 2, kind: output, shape index: {0}]   ;;  %s1104_s3 = inlined_call_operand.vmem [shape: f32[1,128], index: 3, kind: output, shape index: {1}]   ;;  %s1105_s4 = inlined_call_operand.vmem [shape: f32[1,128], index: 4, kind: output, shape index: {2}]  }
   0x1   :  { %12 = vsyncpa [#allocation3 + $0x1], 0  ;;  %s953_s15 = smov 0   ;;  %s955_s16 = smov 0  }
   0x2   :  { %s957_s17 = smov 0   ;;  %s959_s18 = smov 0  }
   0x3   :  { %s961_s19 = smov 0   ;;  %s963_s20 = smov 0  }
   0x4 LB: > { %s661_s21 = sadd.s32 4294967295, %s923_s20   ;;  %s30_s22 = sadd.s32 1, %s919_s19  ;;  %s923_s20 = sphi %s963_s20, %s18_s20   ;;  %s919_s19 = sphi %s961_s19, %s1112_s19   ;;  %s915_s18 = sphi %s959_s18, %s1111_s18   ;;  %s911_s17 = sphi %s957_s17, %s1110_s17   ;;  %s907_s16 = sphi %s955_s16, %s1109_s16   ;;  %s903_s15 = sphi %s953_s15, %s1108_s15  }
   0x5   : > { %p32_p0 = scmp.ge.s32.totalorder %s30_s22, 4  ;;  %s65_s23 = sadd.s32 1, %s911_s17 }
   0x6   : > { %p72_p1 = scmp.ne.s32.totalorder %s911_s17, %s907_s16  ;;  %p73_p2 = scmp.eq.s32.totalorder %s923_s20, 0 }
   0x7   : > { %s1114_s22 = smov (%p32_p0, %s30_s22), 0  ;;  %p78_p4 = scmp.ne.s32.totalorder %s907_s16, %s903_s15 }
   0x8   : > { %p989_p3 = por %p73_p2, %p72_p1  ;;  %s62_s25 = ssub.s32 %s919_s19, %s1114_s22 }
   0x9   : > { %p79_p5 = scmp.eq.s32.totalorder %s661_s21, 0  ;;  %p63_p6 = scmp.eq.s32.totalorder %s62_s25, 0 }
   0xa   : > { %p791_p8 = scmp.lt.s32.totalorder %s923_s20, 4  ;;  %s185_s28 = sand.u32 1, %s911_s17  }
   0xb   : > { %p996_p7 = por %p79_p5, %p78_p4  ;;  %s741_s29 = sshll.u32 %s919_s19, 6 }
   0xc   : > { %s1002_s27 = scalar_select %p63_p6, %s911_s17, %s65_s23  }
   0xd   : > { %s665_s30 = sshll.u32 %s185_s28, 6  ;;  %s194_s7 = scalar_lea.hbm %s1102_s1, %s741_s29 }
   0xe   : > { %s195_s8 = sshll.u32 %s194_s7, 4  ;;  %s189_s9 = scalar_lea.vmem [#allocation2], %s665_s30  ;;  %s196_s8 = int_to_ptr.hbm [resolvable:$true] %s195_s8 }
   0xf   : > { %s197_s10 = sshll.u32 %s189_s9, 4  ;;  %p788_p9 = pnand %p791_p8, %p989_p3  ;;  %s198_s10 = int_to_ptr.vmem [resolvable:$true] %s197_s10 }
  0x10   : > { %p668_p10 = scmp.ge.s32.totalorder %s923_s20, 1  ;;  %p205_p11 = scmp.lt.s32.totalorder %s923_s20, 5 }
  0x11   : > { %s186_s11 = scalar_lea.sflag [#allocation3], %s185_s28  ;;  %s925_s12 = smov 64  }
  0x12   : > { %s926_s13 = smov 4   ;;  %p206_p12 = pnand %p668_p10, %p205_p11 }
  0x13   : > { %790 = dma.hbm_to_vmem [thread:$0]  (!%p788_p9), %s196_s8, 1024, %s198_s10, %s186_s11, %s925_s12, %s925_s12, %s926_s13  }
  0x14   : > { %209 = sbr.rel (%p206_p12) target bundleno = 258 (0x102), region = 28  ;;  %s211_s14 = sand.u32 (!%p206_p12), 1, %s907_s16  }
  0x15   : > { %s669_s15 = sshll.u32 (!%p206_p12), %s211_s14, 6  ;;  %s212_s21 = scalar_lea.sflag (!%p206_p12), [#allocation3], %s211_s14 }
  0x16   : > { %s1014_s23 = scalar_lea.vmem (!%p206_p12), [#allocation2], %s669_s15 }
  0x19   : > { %898 = dma.done.wait (%p996_p7), %s212_s21, 1024  }
  0x1a   : > { %900 = vsyncadd (%p996_p7), %s212_s21, 4294966272  ;;  %p255_p13 = scmp.lt.s32.totalorder %s915_s18, 3  ;;  %p274_p0 = scmp.eq.s32.totalorder %s915_s18, 0 }
  0x1b   : > { %v927_v0 = vmov (%p274_p0), 0.0  }
  0x1c   : > { %s1116_s18 = smov (!%p255_p13, %s915_s18), 3  ;;  %279 = sbr.rel (!%p274_p0) target bundleno = 33 (0x21), region = 36  ;;  %280 = vst [vmem:[%s1104_s3] sm:$0x1] (%p274_p0), %v927_v0 }
  0x1d   : > { %s742_s24 = sshll.u32 %s1116_s18, 6  ;;  %s743_s25 = sshll.u32 %s1116_s18, 7  ;;  %281 = vst [vmem:[%s1105_s4] sm:$0x1] (%p274_p0), %v927_v0 }
  0x1e   : > { %s1026_s30 = scalar_lea.vmem %s1101_s0, %s742_s24  ;;  %s1031_s7 = scalar_lea.vmem %s1103_s2, %s743_s25 }
  0x21 PF: > { %v760_v1 = vld [vmem:[%s1014_s23 + $0x38] sm:$0xff]  ;;  %v759_v2 = vld [vmem:[%s1014_s23 + $0x30] sm:$0xff]  ;;  %v758_v3 = vld [vmem:[%s1014_s23 + $0x28] sm:$0xff] }
  0x22   : > { %410 = vmatpush.bf16.msra.mxu0 %v760_v1  ;;  %761 = vmatpush.bf16.msra.mxu1 %v760_v1  ;;  %v757_v4 = vld [vmem:[%s1014_s23 + $0x20] sm:$0xff]  ;;  %v756_v5 = vld [vmem:[%s1014_s23 + $0x18] sm:$0xff]  ;;  %v755_v6 = vld [vmem:[%s1014_s23 + $0x10] sm:$0xff] }
  0x23   : > { %762 = vmatpush.bf16.msra.mxu2 %v760_v1  ;;  %763 = vmatpush.bf16.msra.mxu3 %v760_v1  ;;  %v754_v7 = vld [vmem:[%s1014_s23 + $0x8] sm:$0xff]  ;;  %v753_v8 = vld [vmem:[%s1014_s23] sm:$0xff]  ;;  %v747_v10 = vld [vmem:[%s1026_s30 + $0x10] sm:$0xff] }
  0x24   : > { %v745_v9 = vld [vmem:[%s1026_s30] sm:$0xff]  ;;  %v751_v12 = vld [vmem:[%s1026_s30 + $0x30] sm:$0xff]  ;;  %v746_v13 = vld [vmem:[%s1026_s30 + $0x8] sm:$0xff] }
  0x25   : > { %v749_v11 = vld [vmem:[%s1026_s30 + $0x20] sm:$0xff]  ;;  %v748_v14 = vld [vmem:[%s1026_s30 + $0x18] sm:$0xff]  ;;  %v750_v15 = vld [vmem:[%s1026_s30 + $0x28] sm:$0xff] }
  0x26   : > { %411 = vmatpush.bf16.msra.mxu0 %v759_v2  ;;  %764 = vmatpush.bf16.msra.mxu1 %v759_v2  ;;  %v752_v16 = vld [vmem:[%s1026_s30 + $0x38] sm:$0xff] }
  0x27   : > { %765 = vmatpush.bf16.msra.mxu2 %v759_v2  ;;  %766 = vmatpush.bf16.msra.mxu3 %v759_v2 }
  0x2a   : > { %412 = vmatpush.bf16.msra.mxu0 %v758_v3  ;;  %767 = vmatpush.bf16.msra.mxu1 %v758_v3 }
  0x2b   : > { %768 = vmatpush.bf16.msra.mxu2 %v758_v3  ;;  %769 = vmatpush.bf16.msra.mxu3 %v758_v3 }
  0x2e   : > { %413 = vmatpush.bf16.msra.mxu0 %v757_v4  ;;  %770 = vmatpush.bf16.msra.mxu1 %v757_v4 }
  0x2f   : > { %771 = vmatpush.bf16.msra.mxu2 %v757_v4  ;;  %772 = vmatpush.bf16.msra.mxu3 %v757_v4 }
  0x32   : > { %414 = vmatpush.bf16.msra.mxu0 %v756_v5  ;;  %773 = vmatpush.bf16.msra.mxu1 %v756_v5 }
  0x33   : > { %774 = vmatpush.bf16.msra.mxu2 %v756_v5  ;;  %775 = vmatpush.bf16.msra.mxu3 %v756_v5 }
  0x36   : > { %415 = vmatpush.bf16.msra.mxu0 %v755_v6  ;;  %776 = vmatpush.bf16.msra.mxu1 %v755_v6 }
  0x37   : > { %777 = vmatpush.bf16.msra.mxu2 %v755_v6  ;;  %778 = vmatpush.bf16.msra.mxu3 %v755_v6 }
  0x3a   : > { %416 = vmatpush.bf16.msra.mxu0 %v754_v7  ;;  %779 = vmatpush.bf16.msra.mxu1 %v754_v7 }
  0x3b   : > { %780 = vmatpush.bf16.msra.mxu2 %v754_v7  ;;  %781 = vmatpush.bf16.msra.mxu3 %v754_v7 }
  0x3e   : > { %417 = vmatpush.bf16.msra.mxu0 %v753_v8  ;;  %782 = vmatpush.bf16.msra.mxu1 %v753_v8 }
  0x3f   : > { %783 = vmatpush.bf16.msra.mxu2 %v753_v8  ;;  %784 = vmatpush.bf16.msra.mxu3 %v753_v8 }
  0x41   : > { %418 = vmatmul.bf16.vlgmr.msra.gmra.mxu0 %v745_v9  ;;  %428 = vmatmul.bf16.vlgmr.msra.gmra.mxu1 %v747_v10 }
  0x42   : > { %438 = vmatmul.bf16.vlgmr.msra.gmra.mxu2 %v749_v11  ;;  %448 = vmatmul.bf16.vlgmr.msra.gmra.mxu3 %v751_v12 }
  0x51   : > { %423 = vmatmul.bf16.gmra.mxu0 %v746_v13  ;;  %433 = vmatmul.bf16.gmra.mxu1 %v748_v14 }
  0x52   : > { %443 = vmatmul.bf16.gmra.mxu2 %v750_v15  ;;  %453 = vmatmul.bf16.gmra.mxu3 %v752_v16 }
  0xbe   : > { %v419_v17 = vpop.f32.mrf.mxu0  ;;  %v429_v18 = vpop.f32.mrf.mxu1 }
  0xbf   : > { %459 = vst [vmem:[%s1031_s7] sm:$0xff] %v419_v17  ;;  %v500_v28 = vmul.f32 %v419_v17, %v419_v17  ;;  %v504_v40 = vmul.f32 %v429_v18, %v429_v18 }
  0xc0   : > { %463 = vst [vmem:[%s1031_s7 + $0x20] sm:$0xff] %v429_v18 }
  0xc5   : > { %v439_v19 = vpop.f32.mrf.mxu2  ;;  %v449_v20 = vpop.f32.mrf.mxu3 }
  0xc6   : > { %v421_v21 = vpop.f32.mrf.mxu0  ;;  %v431_v22 = vpop.f32.mrf.mxu1  ;;  %467 = vst [vmem:[%s1031_s7 + $0x40] sm:$0xff] %v439_v19  ;;  %v508_v54 = vmul.f32 %v439_v19, %v439_v19  ;;  %v512_v2 = vmul.f32 %v449_v20, %v449_v20 }
  0xc7   : > { %460 = vst [vmem:[%s1031_s7 + $0x8] sm:$0xff] %v421_v21  ;;  %v501_v27 = vmul.f32 %v421_v21, %v421_v21  ;;  %v476_v29 = vadd.f32 %v421_v21, %v419_v17  ;;  %v505_v43 = vmul.f32 %v431_v22, %v431_v22 }
  0xc8   : > { %464 = vst [vmem:[%s1031_s7 + $0x28] sm:$0xff] %v431_v22 }
  0xc9   : > { %471 = vst [vmem:[%s1031_s7 + $0x60] sm:$0xff] %v449_v20  ;;  %v516_v31 = vadd.f32 %v501_v27, %v500_v28  ;;  %v499_v27 = vld [vmem:[%s1105_s4] sm:$0x1] }
  0xcd   : > { %v441_v23 = vpop.f32.mrf.mxu2  ;;  %v451_v24 = vpop.f32.mrf.mxu3 }
  0xce   : > { %v424_v25 = vpop.f32.mrf.mxu0  ;;  %v434_v26 = vpop.f32.mrf.mxu1  ;;  %468 = vst [vmem:[%s1031_s7 + $0x48] sm:$0xff] %v441_v23  ;;  %v509_v57 = vmul.f32 %v441_v23, %v441_v23  ;;  %v513_v5 = vmul.f32 %v451_v24, %v451_v24 }
  0xcf   : > { %461 = vst [vmem:[%s1031_s7 + $0x10] sm:$0xff] %v424_v25  ;;  %v502_v30 = vmul.f32 %v424_v25, %v424_v25  ;;  %v477_v32 = vadd.f32 %v476_v29, %v424_v25  ;;  %v506_v46 = vmul.f32 %v434_v26, %v434_v26 }
  0xd0   : > { %465 = vst [vmem:[%s1031_s7 + $0x30] sm:$0xff] %v434_v26 }
  0xd1   : > { %472 = vst [vmem:[%s1031_s7 + $0x68] sm:$0xff] %v451_v24  ;;  %v517_v37 = vadd.f32 %v516_v31, %v502_v30 }
  0xd5   : > { %v444_v33 = vpop.f32.mrf.mxu2  ;;  %v454_v34 = vpop.f32.mrf.mxu3 }
  0xd6   : > { %v426_v35 = vpop.f32.mrf.mxu0  ;;  %v436_v36 = vpop.f32.mrf.mxu1  ;;  %469 = vst [vmem:[%s1031_s7 + $0x50] sm:$0xff] %v444_v33  ;;  %v510_v61 = vmul.f32 %v444_v33, %v444_v33  ;;  %v514_v9 = vmul.f32 %v454_v34, %v454_v34 }
  0xd7   : > { %462 = vst [vmem:[%s1031_s7 + $0x18] sm:$0xff] %v426_v35  ;;  %v478_v38 = vadd.f32 %v477_v32, %v426_v35  ;;  %v503_v39 = vmul.f32 %v426_v35, %v426_v35  ;;  %v507_v52 = vmul.f32 %v436_v36, %v436_v36 }
  0xd8   : > { %466 = vst [vmem:[%s1031_s7 + $0x38] sm:$0xff] %v436_v36 }
  0xd9   : > { %v479_v41 = vadd.f32 %v478_v38, %v429_v18  ;;  %v518_v42 = vadd.f32 %v517_v37, %v503_v39  ;;  %473 = vst [vmem:[%s1031_s7 + $0x70] sm:$0xff] %v454_v34 }
  0xdb   : > { %v519_v44 = vadd.f32 %v518_v42, %v504_v40  ;;  %v480_v45 = vadd.f32 %v479_v41, %v431_v22 }
  0xdd   : > { %v481_v47 = vadd.f32 %v480_v45, %v434_v26  ;;  %v520_v48 = vadd.f32 %v519_v44, %v505_v43  ;;  %v446_v49 = vpop.f32.mrf.mxu2  ;;  %v456_v50 = vpop.f32.mrf.mxu3 }
  0xde   : > { %470 = vst [vmem:[%s1031_s7 + $0x58] sm:$0xff] %v446_v49  ;;  %v511_v1 = vmul.f32 %v446_v49, %v446_v49  ;;  %v515_v13 = vmul.f32 %v456_v50, %v456_v50 }
  0xdf   : > { %v482_v51 = vadd.f32 %v481_v47, %v436_v36  ;;  %v521_v53 = vadd.f32 %v520_v48, %v506_v46  ;;  %474 = vst [vmem:[%s1031_s7 + $0x78] sm:$0xff] %v456_v50 }
  0xe1   : > { %v483_v55 = vadd.f32 %v482_v51, %v439_v19  ;;  %v522_v56 = vadd.f32 %v521_v53, %v507_v52 }
  0xe3   : > { %v523_v58 = vadd.f32 %v522_v56, %v508_v54  ;;  %v484_v59 = vadd.f32 %v483_v55, %v441_v23 }
  0xe5   : > { %v485_v60 = vadd.f32 %v484_v59, %v444_v33  ;;  %v524_v62 = vadd.f32 %v523_v58, %v509_v57 }
  0xe7   : > { %v525_v63 = vadd.f32 %v524_v62, %v510_v61  ;;  %v486_v0 = vadd.f32 %v485_v60, %v446_v49 }
  0xe9   : > { %v487_v3 = vadd.f32 %v486_v0, %v449_v20  ;;  %v526_v4 = vadd.f32 %v525_v63, %v511_v1 }
  0xeb   : > { %v527_v6 = vadd.f32 %v526_v4, %v512_v2  ;;  %v488_v7 = vadd.f32 %v487_v3, %v451_v24  ;;  %v475_v24 = vld [vmem:[%s1104_s3] sm:$0x1] }
  0xed   : > { %v489_v8 = vadd.f32 %v488_v7, %v454_v34  ;;  %v528_v10 = vadd.f32 %v527_v6, %v513_v5 }
  0xef   : > { %v529_v11 = vadd.f32 %v528_v10, %v514_v9  ;;  %v490_v12 = vadd.f32 %v489_v8, %v456_v50 }
  0xf1   : > { %v491_v14 = vrot.slane %v490_v12, 4  ;;  %v530_v15 = vadd.f32 %v529_v11, %v515_v13 }
  0xf3   : > { %v492_v16 = vadd.f32 %v491_v14, %v490_v12  ;;  %v531_v17 = vrot.slane %v530_v15, 4 }
  0xf5   : > { %v493_v18 = vrot.slane %v492_v16, 2  ;;  %v532_v19 = vadd.f32 %v531_v17, %v530_v15 }
  0xf7   : > { %v494_v21 = vadd.f32 %v493_v18, %v492_v16  ;;  %v533_v22 = vrot.slane %v532_v19, 2 }
  0xf9   : > { %v495_v23 = vrot.slane %v494_v21, 1  ;;  %v534_v20 = vadd.f32 %v533_v22, %v532_v19 }
  0xfb   : > { %v496_v25 = vadd.f32 %v495_v23, %v494_v21  ;;  %v535_v26 = vrot.slane %v534_v20, 1 }
  0xfd   : > { %v497_v28 = vadd.f32 %v496_v25, %v475_v24  ;;  %v536_v29 = vadd.f32 %v535_v26, %v534_v20 }
  0xff   : > { %498 = vst [vmem:[%s1104_s3] sm:$0x1] %v497_v28  ;;  %v537_v30 = vadd.f32 %v536_v29, %v499_v27 }
 0x101   : > { %538 = vst [vmem:[%s1105_s4] sm:$0x1] %v537_v30 }
 0x102 PF: > { %s18_s20 = sadd.s32 1, %s923_s20   ;;  %s1108_s15 = smov %s907_s16 }
 0x103   : > { %p15_p1 = scmp.ge.s32.totalorder %s18_s20, 6   ;;  %s1109_s16 = smov %s911_s17 }
 0x104   : > { %s1110_s17 = smov %s1002_s27  ;;  %s1111_s18 = smov %s919_s19 }
 0x105   : > { %s1112_s19 = smov %s1114_s22  ;;  %17 = sbr.rel (!%p15_p1) target bundleno = 4 (0x4), region = 91 }
 0x10a   :  { %581 = vsyncpa [#allocation3], 1 }
 0x10b   :  { %583 = vsyncpa [#allocation3 + $0x1], 1 }

// kernel: generator_forward.14
= control target key start
LH: loop header
LB: loop body
LE: loop exit
PB: predicated region body
PF: predicated region fallthrough
CT: control target
= control target key end

     0   :  { %s1049_s0 = inlined_call_operand.vmem [shape: f32[512,128], index: 0, kind: input, shape index: {}]   ;;  %s1050_s1 = inlined_call_operand.vmem [shape: f32[1,128], index: 1, kind: input, shape index: {}]   ;;  %s1051_s2 = inlined_call_operand.vmem [shape: f32[1,128], index: 2, kind: input, shape index: {}]   ;;  %s1052_s3 = inlined_call_operand.vmem [shape: bf16[512,128], index: 3, kind: output, shape index: {}]  }
   0x1   :  { %v14_v0 = vld [vmem:[%s1049_s0] sm:$0xff]  ;;  %v15_v1 = vld [vmem:[%s1049_s0 + $0x8] sm:$0xff]  ;;  %v16_v4 = vld [vmem:[%s1049_s0 + $0x10] sm:$0xff] }
   0x2   :  { %v632_v2 = vld [vmem:[%s1050_s1] ss:$0 sm:$0xff]  ;;  %v17_v5 = vld [vmem:[%s1049_s0 + $0x18] sm:$0xff]  ;;  %v19_v11 = vld [vmem:[%s1049_s0 + $0x28] sm:$0xff] }
   0x3   :  { %v637_v3 = vld [vmem:[%s1051_s2] ss:$0 sm:$0xff]  ;;  %v82_v7 = vmul.f32 %v632_v2, %v14_v0  ;;  %v83_v8 = vmul.f32 %v632_v2, %v15_v1  ;;  %v84_v9 = vmul.f32 %v632_v2, %v16_v4  ;;  %v85_v10 = vmul.f32 %v632_v2, %v17_v5  ;;  %v20_v12 = vld [vmem:[%s1049_s0 + $0x30] sm:$0xff]  ;;  %v21_v13 = vld [vmem:[%s1049_s0 + $0x38] sm:$0xff] }
   0x4   :  { %v18_v6 = vld [vmem:[%s1049_s0 + $0x20] sm:$0xff]  ;;  %v87_v15 = vmul.f32 %v632_v2, %v19_v11  ;;  %v88_v16 = vmul.f32 %v632_v2, %v20_v12  ;;  %v89_v17 = vmul.f32 %v632_v2, %v21_v13  ;;  %v23_v27 = vld [vmem:[%s1049_s0 + $0x48] sm:$0xff]  ;;  %v24_v32 = vld [vmem:[%s1049_s0 + $0x50] sm:$0xff] }
   0x5   :  { %v86_v14 = vmul.f32 %v632_v2, %v18_v6  ;;  %v150_v18 = vadd.f32 %v637_v3, %v82_v7  ;;  %v151_v19 = vadd.f32 %v637_v3, %v83_v8  ;;  %v152_v20 = vadd.f32 %v637_v3, %v84_v9  ;;  %v22_v26 = vld [vmem:[%s1049_s0 + $0x40] sm:$0xff]  ;;  %v25_v33 = vld [vmem:[%s1049_s0 + $0x58] sm:$0xff]  ;;  %v27_v39 = vld [vmem:[%s1049_s0 + $0x68] sm:$0xff] }
   0x6   :  { %v153_v21 = vadd.f32 %v637_v3, %v85_v10  ;;  %v155_v23 = vadd.f32 %v637_v3, %v87_v15  ;;  %v156_v24 = vadd.f32 %v637_v3, %v88_v16  ;;  %v157_v25 = vadd.f32 %v637_v3, %v89_v17  ;;  %v26_v38 = vld [vmem:[%s1049_s0 + $0x60] sm:$0xff]  ;;  %v28_v44 = vld [vmem:[%s1049_s0 + $0x70] sm:$0xff]  ;;  %v29_v45 = vld [vmem:[%s1049_s0 + $0x78] sm:$0xff] }
   0x7   :  { %v154_v22 = vadd.f32 %v637_v3, %v86_v14  ;;  %v214_v28 = vmax.f32 %v150_v18, 0.0  ;;  %v215_v29 = vmax.f32 %v151_v19, 0.0  ;;  %v216_v30 = vmax.f32 %v152_v20, 0.0  ;;  %v30_v58 = vld [vmem:[%s1049_s0 + $0x80] sm:$0xff]  ;;  %v31_v63 = vld [vmem:[%s1049_s0 + $0x88] sm:$0xff]  ;;  %v32_v6 = vld [vmem:[%s1049_s0 + $0x90] sm:$0xff] }
   0x8   :  { %v217_v31 = vmax.f32 %v153_v21, 0.0  ;;  %v219_v35 = vmax.f32 %v155_v23, 0.0  ;;  %v220_v36 = vmax.f32 %v156_v24, 0.0  ;;  %v221_v37 = vmax.f32 %v157_v25, 0.0  ;;  %v33_v7 = vld [vmem:[%s1049_s0 + $0x98] sm:$0xff]  ;;  %v34_v12 = vld [vmem:[%s1049_s0 + $0xa0] sm:$0xff] }
   0x9   :  { %v218_v34 = vmax.f32 %v154_v22, 0.0  ;;  %v413_v40 = vpack.c.bf16 %v215_v29, %v214_v28  ;;  %v90_v42 = vmul.f32 %v632_v2, %v22_v26  ;;  %v91_v43 = vmul.f32 %v632_v2, %v23_v27  ;;  %v35_v13 = vld [vmem:[%s1049_s0 + $0xa8] sm:$0xff]  ;;  %v36_v18 = vld [vmem:[%s1049_s0 + $0xb0] sm:$0xff]  ;;  %v37_v23 = vld [vmem:[%s1049_s0 + $0xb8] sm:$0xff] }
   0xa   :  { %v418_v41 = vpack.c.bf16 %v217_v31, %v216_v30  ;;  %v428_v47 = vpack.c.bf16 %v221_v37, %v220_v36  ;;  %v92_v48 = vmul.f32 %v632_v2, %v24_v32  ;;  %v93_v49 = vmul.f32 %v632_v2, %v25_v33  ;;  %v38_v28 = vld [vmem:[%s1049_s0 + $0xc0] sm:$0xff]  ;;  %v39_v37 = vld [vmem:[%s1049_s0 + $0xc8] sm:$0xff] }
   0xb   :  { %v423_v46 = vpack.c.bf16 %v219_v35, %v218_v34  ;;  %414 = vst [vmem:[%s1052_s3] sm:$0xff] %v413_v40   ;;  %v158_v50 = vadd.f32 %v637_v3, %v90_v42  ;;  %v159_v51 = vadd.f32 %v637_v3, %v91_v43  ;;  %v94_v52 = vmul.f32 %v632_v2, %v26_v38  ;;  %v40_v42 = vld [vmem:[%s1049_s0 + $0xd0] sm:$0xff]  ;;  %v41_v43 = vld [vmem:[%s1049_s0 + $0xd8] sm:$0xff] }
   0xc   :  { %v95_v53 = vmul.f32 %v632_v2, %v27_v39  ;;  %570 = vst [vmem:[%s1052_s3 + $0x8] sm:$0xff] %v418_v41   ;;  %v160_v54 = vadd.f32 %v637_v3, %v92_v48  ;;  %v161_v55 = vadd.f32 %v637_v3, %v93_v49  ;;  %v96_v56 = vmul.f32 %v632_v2, %v28_v44  ;;  %v42_v48 = vld [vmem:[%s1049_s0 + $0xe0] sm:$0xff]  ;;  %v43_v49 = vld [vmem:[%s1049_s0 + $0xe8] sm:$0xff] }
   0xd   :  { %v97_v57 = vmul.f32 %v632_v2, %v29_v45  ;;  %571 = vst [vmem:[%s1052_s3 + $0x10] sm:$0xff] %v423_v46   ;;  %v222_v59 = vmax.f32 %v158_v50, 0.0  ;;  %v223_v60 = vmax.f32 %v159_v51, 0.0  ;;  %v162_v61 = vadd.f32 %v637_v3, %v94_v52 }
   0xe   :  { %v163_v62 = vadd.f32 %v637_v3, %v95_v53  ;;  %572 = vst [vmem:[%s1052_s3 + $0x18] sm:$0xff] %v428_v47   ;;  %v224_v0 = vmax.f32 %v160_v54, 0.0  ;;  %v225_v1 = vmax.f32 %v161_v55, 0.0  ;;  %v164_v4 = vadd.f32 %v637_v3, %v96_v56  ;;  %v44_v54 = vld [vmem:[%s1049_s0 + $0xf0] sm:$0xff] }
   0xf   :  { %v165_v5 = vadd.f32 %v637_v3, %v97_v57  ;;  %v433_v8 = vpack.c.bf16 %v223_v60, %v222_v59  ;;  %v226_v9 = vmax.f32 %v162_v61, 0.0  ;;  %v98_v11 = vmul.f32 %v632_v2, %v30_v58  ;;  %v45_v59 = vld [vmem:[%s1049_s0 + $0xf8] sm:$0xff] }
  0x10   :  { %v227_v10 = vmax.f32 %v163_v62, 0.0  ;;  %v438_v14 = vpack.c.bf16 %v225_v1, %v224_v0  ;;  %v228_v15 = vmax.f32 %v164_v4, 0.0  ;;  %v99_v17 = vmul.f32 %v632_v2, %v31_v63  ;;  %v46_v0 = vld [vmem:[%s1049_s0 + $0x100] sm:$0xff] }
  0x11   :  { %v229_v16 = vmax.f32 %v165_v5, 0.0  ;;  %573 = vst [vmem:[%s1052_s3 + $0x20] sm:$0xff] %v433_v8   ;;  %v166_v20 = vadd.f32 %v637_v3, %v98_v11  ;;  %v100_v21 = vmul.f32 %v632_v2, %v32_v6  ;;  %v101_v22 = vmul.f32 %v632_v2, %v33_v7  ;;  %v47_v11 = vld [vmem:[%s1049_s0 + $0x108] sm:$0xff] }
  0x12   :  { %v443_v19 = vpack.c.bf16 %v227_v10, %v226_v9  ;;  %574 = vst [vmem:[%s1052_s3 + $0x28] sm:$0xff] %v438_v14   ;;  %v167_v25 = vadd.f32 %v637_v3, %v99_v17  ;;  %v102_v26 = vmul.f32 %v632_v2, %v34_v12  ;;  %v103_v27 = vmul.f32 %v632_v2, %v35_v13  ;;  %v49_v17 = vld [vmem:[%s1049_s0 + $0x118] sm:$0xff] }
  0x13   :  { %v448_v24 = vpack.c.bf16 %v229_v16, %v228_v15  ;;  %v230_v29 = vmax.f32 %v166_v20, 0.0  ;;  %v168_v30 = vadd.f32 %v637_v3, %v100_v21  ;;  %v169_v31 = vadd.f32 %v637_v3, %v101_v22  ;;  %v48_v16 = vld [vmem:[%s1049_s0 + $0x110] sm:$0xff]  ;;  %v50_v22 = vld [vmem:[%s1049_s0 + $0x120] sm:$0xff] }
  0x14   :  { %575 = vst [vmem:[%s1052_s3 + $0x30] sm:$0xff] %v443_v19   ;;  %v104_v32 = vmul.f32 %v632_v2, %v36_v18  ;;  %v231_v33 = vmax.f32 %v167_v25, 0.0  ;;  %v170_v34 = vadd.f32 %v637_v3, %v102_v26  ;;  %v171_v35 = vadd.f32 %v637_v3, %v103_v27 }
  0x15   :  { %576 = vst [vmem:[%s1052_s3 + $0x38] sm:$0xff] %v448_v24   ;;  %v105_v36 = vmul.f32 %v632_v2, %v37_v23  ;;  %v232_v38 = vmax.f32 %v168_v30, 0.0  ;;  %v233_v39 = vmax.f32 %v169_v31, 0.0  ;;  %v106_v41 = vmul.f32 %v632_v2, %v38_v28  ;;  %v51_v23 = vld [vmem:[%s1049_s0 + $0x128] sm:$0xff]  ;;  %v52_v28 = vld [vmem:[%s1049_s0 + $0x130] sm:$0xff] }
  0x16   :  { %v172_v40 = vadd.f32 %v637_v3, %v104_v32  ;;  %v453_v44 = vpack.c.bf16 %v231_v33, %v230_v29  ;;  %v234_v45 = vmax.f32 %v170_v34, 0.0  ;;  %v235_v46 = vmax.f32 %v171_v35, 0.0  ;;  %v53_v33 = vld [vmem:[%s1049_s0 + $0x138] sm:$0xff] }
  0x17   :  { %v173_v47 = vadd.f32 %v637_v3, %v105_v36  ;;  %v458_v50 = vpack.c.bf16 %v233_v39, %v232_v38  ;;  %v107_v52 = vmul.f32 %v632_v2, %v39_v37  ;;  %v174_v53 = vadd.f32 %v637_v3, %v106_v41  ;;  %v54_v38 = vld [vmem:[%s1049_s0 + $0x140] sm:$0xff] }
  0x18   :  { %v236_v51 = vmax.f32 %v172_v40, 0.0  ;;  %577 = vst [vmem:[%s1052_s3 + $0x40] sm:$0xff] %v453_v44   ;;  %v463_v55 = vpack.c.bf16 %v235_v46, %v234_v45  ;;  %v108_v57 = vmul.f32 %v632_v2, %v40_v42  ;;  %v109_v58 = vmul.f32 %v632_v2, %v41_v43 }
  0x19   :  { %v237_v56 = vmax.f32 %v173_v47, 0.0  ;;  %578 = vst [vmem:[%s1052_s3 + $0x48] sm:$0xff] %v458_v50   ;;  %v175_v60 = vadd.f32 %v637_v3, %v107_v52  ;;  %v238_v61 = vmax.f32 %v174_v53, 0.0  ;;  %v110_v62 = vmul.f32 %v632_v2, %v42_v48  ;;  %v55_v47 = vld [vmem:[%s1049_s0 + $0x148] sm:$0xff]  ;;  %v56_v52 = vld [vmem:[%s1049_s0 + $0x150] sm:$0xff]  ;;  %v57_v53 = vld [vmem:[%s1049_s0 + $0x158] sm:$0xff] }
  0x1a   :  { %v111_v63 = vmul.f32 %v632_v2, %v43_v49  ;;  %579 = vst [vmem:[%s1052_s3 + $0x50] sm:$0xff] %v463_v55   ;;  %v176_v4 = vadd.f32 %v637_v3, %v108_v57  ;;  %v177_v5 = vadd.f32 %v637_v3, %v109_v58  ;;  %v112_v6 = vmul.f32 %v632_v2, %v44_v54  ;;  %v58_v58 = vld [vmem:[%s1049_s0 + $0x160] sm:$0xff] }
  0x1b   :  { %v468_v1 = vpack.c.bf16 %v237_v56, %v236_v51  ;;  %v239_v7 = vmax.f32 %v175_v60, 0.0  ;;  %v178_v8 = vadd.f32 %v637_v3, %v110_v62  ;;  %v113_v10 = vmul.f32 %v632_v2, %v45_v59  ;;  %v59_v59 = vld [vmem:[%s1049_s0 + $0x168] sm:$0xff] }
  0x1c   :  { %v179_v9 = vadd.f32 %v637_v3, %v111_v63  ;;  %v240_v12 = vmax.f32 %v176_v4, 0.0  ;;  %v241_v13 = vmax.f32 %v177_v5, 0.0  ;;  %v180_v14 = vadd.f32 %v637_v3, %v112_v6 }
  0x1d   :  { %580 = vst [vmem:[%s1052_s3 + $0x58] sm:$0xff] %v468_v1   ;;  %v114_v15 = vmul.f32 %v632_v2, %v46_v0  ;;  %v473_v18 = vpack.c.bf16 %v239_v7, %v238_v61  ;;  %v242_v19 = vmax.f32 %v178_v8, 0.0  ;;  %v181_v21 = vadd.f32 %v637_v3, %v113_v10  ;;  %v60_v0 = vld [vmem:[%s1049_s0 + $0x170] sm:$0xff]  ;;  %v61_v7 = vld [vmem:[%s1049_s0 + $0x178] sm:$0xff] }
  0x1e   :  { %v243_v20 = vmax.f32 %v179_v9, 0.0  ;;  %v478_v24 = vpack.c.bf16 %v241_v13, %v240_v12  ;;  %v244_v25 = vmax.f32 %v180_v14, 0.0  ;;  %v115_v26 = vmul.f32 %v632_v2, %v47_v11  ;;  %v62_v12 = vld [vmem:[%s1049_s0 + $0x180] sm:$0xff] }
  0x1f   :  { %v182_v27 = vadd.f32 %v637_v3, %v114_v15  ;;  %581 = vst [vmem:[%s1052_s3 + $0x60] sm:$0xff] %v473_v18   ;;  %v245_v30 = vmax.f32 %v181_v21, 0.0  ;;  %v116_v31 = vmul.f32 %v632_v2, %v48_v16  ;;  %v117_v32 = vmul.f32 %v632_v2, %v49_v17  ;;  %v63_v21 = vld [vmem:[%s1049_s0 + $0x188] sm:$0xff] }
  0x20   :  { %v483_v29 = vpack.c.bf16 %v243_v20, %v242_v19  ;;  %582 = vst [vmem:[%s1052_s3 + $0x68] sm:$0xff] %v478_v24   ;;  %v183_v34 = vadd.f32 %v637_v3, %v115_v26  ;;  %v118_v36 = vmul.f32 %v632_v2, %v50_v22  ;;  %v119_v37 = vmul.f32 %v632_v2, %v51_v23  ;;  %v64_v26 = vld [vmem:[%s1049_s0 + $0x190] sm:$0xff] }
  0x21   :  { %v246_v35 = vmax.f32 %v182_v27, 0.0  ;;  %v488_v39 = vpack.c.bf16 %v245_v30, %v244_v25  ;;  %v184_v40 = vadd.f32 %v637_v3, %v116_v31  ;;  %v185_v41 = vadd.f32 %v637_v3, %v117_v32  ;;  %v65_v27 = vld [vmem:[%s1049_s0 + $0x198] sm:$0xff]  ;;  %v66_v32 = vld [vmem:[%s1049_s0 + $0x1a0] sm:$0xff] }
  0x22   :  { %583 = vst [vmem:[%s1052_s3 + $0x70] sm:$0xff] %v483_v29   ;;  %v120_v42 = vmul.f32 %v632_v2, %v52_v28  ;;  %v247_v43 = vmax.f32 %v183_v34, 0.0  ;;  %v186_v44 = vadd.f32 %v637_v3, %v118_v36  ;;  %v187_v45 = vadd.f32 %v637_v3, %v119_v37 }
  0x23   :  { %v121_v46 = vmul.f32 %v632_v2, %v53_v33  ;;  %584 = vst [vmem:[%s1052_s3 + $0x78] sm:$0xff] %v488_v39   ;;  %v248_v48 = vmax.f32 %v184_v40, 0.0  ;;  %v249_v49 = vmax.f32 %v185_v41, 0.0  ;;  %v122_v51 = vmul.f32 %v632_v2, %v54_v38  ;;  %v67_v33 = vld [vmem:[%s1049_s0 + $0x1a8] sm:$0xff]  ;;  %v68_v38 = vld [vmem:[%s1049_s0 + $0x1b0] sm:$0xff] }
  0x24   :  { %v188_v50 = vadd.f32 %v637_v3, %v120_v42  ;;  %v493_v54 = vpack.c.bf16 %v247_v43, %v246_v35  ;;  %v250_v55 = vmax.f32 %v186_v44, 0.0  ;;  %v251_v56 = vmax.f32 %v187_v45, 0.0  ;;  %v69_v43 = vld [vmem:[%s1049_s0 + $0x1b8] sm:$0xff] }
  0x25   :  { %v189_v57 = vadd.f32 %v637_v3, %v121_v46  ;;  %v498_v60 = vpack.c.bf16 %v249_v49, %v248_v48  ;;  %v123_v62 = vmul.f32 %v632_v2, %v55_v47  ;;  %v190_v63 = vadd.f32 %v637_v3, %v122_v51  ;;  %v70_v48 = vld [vmem:[%s1049_s0 + $0x1c0] sm:$0xff] }
  0x26   :  { %v252_v61 = vmax.f32 %v188_v50, 0.0  ;;  %585 = vst [vmem:[%s1052_s3 + $0x80] sm:$0xff] %v493_v54   ;;  %v503_v1 = vpack.c.bf16 %v251_v56, %v250_v55  ;;  %v124_v5 = vmul.f32 %v632_v2, %v56_v52  ;;  %v125_v6 = vmul.f32 %v632_v2, %v57_v53 }
  0x27   :  { %v253_v4 = vmax.f32 %v189_v57, 0.0  ;;  %586 = vst [vmem:[%s1052_s3 + $0x88] sm:$0xff] %v498_v60   ;;  %v191_v8 = vadd.f32 %v637_v3, %v123_v62  ;;  %v254_v9 = vmax.f32 %v190_v63, 0.0  ;;  %v126_v10 = vmul.f32 %v632_v2, %v58_v58  ;;  %v71_v57 = vld [vmem:[%s1049_s0 + $0x1c8] sm:$0xff]  ;;  %v72_v62 = vld [vmem:[%s1049_s0 + $0x1d0] sm:$0xff]  ;;  %v73_v63 = vld [vmem:[%s1049_s0 + $0x1d8] sm:$0xff] }
  0x28   :  { %v127_v11 = vmul.f32 %v632_v2, %v59_v59  ;;  %587 = vst [vmem:[%s1052_s3 + $0x90] sm:$0xff] %v503_v1   ;;  %v192_v14 = vadd.f32 %v637_v3, %v124_v5  ;;  %v193_v15 = vadd.f32 %v637_v3, %v125_v6  ;;  %v128_v16 = vmul.f32 %v632_v2, %v60_v0  ;;  %v74_v6 = vld [vmem:[%s1049_s0 + $0x1e0] sm:$0xff] }
  0x29   :  { %v508_v13 = vpack.c.bf16 %v253_v4, %v252_v61  ;;  %v255_v17 = vmax.f32 %v191_v8, 0.0  ;;  %v194_v18 = vadd.f32 %v637_v3, %v126_v10  ;;  %v129_v20 = vmul.f32 %v632_v2, %v61_v7  ;;  %v75_v7 = vld [vmem:[%s1049_s0 + $0x1e8] sm:$0xff] }
  0x2a   :  { %v195_v19 = vadd.f32 %v637_v3, %v127_v11  ;;  %v256_v22 = vmax.f32 %v192_v14, 0.0  ;;  %v257_v23 = vmax.f32 %v193_v15, 0.0  ;;  %v196_v24 = vadd.f32 %v637_v3, %v128_v16 }
  0x2b   :  { %588 = vst [vmem:[%s1052_s3 + $0x98] sm:$0xff] %v508_v13   ;;  %v130_v25 = vmul.f32 %v632_v2, %v62_v12  ;;  %v513_v28 = vpack.c.bf16 %v255_v17, %v254_v9  ;;  %v258_v29 = vmax.f32 %v194_v18, 0.0  ;;  %v197_v31 = vadd.f32 %v637_v3, %v129_v20  ;;  %v76_v12 = vld [vmem:[%s1049_s0 + $0x1f0] sm:$0xff]  ;;  %v77_v17 = vld [vmem:[%s1049_s0 + $0x1f8] sm:$0xff] }
  0x2c   :  { %v259_v30 = vmax.f32 %v195_v19, 0.0  ;;  %v518_v34 = vpack.c.bf16 %v257_v23, %v256_v22  ;;  %v260_v35 = vmax.f32 %v196_v24, 0.0  ;;  %v131_v36 = vmul.f32 %v632_v2, %v63_v21 }
  0x2d   :  { %v198_v37 = vadd.f32 %v637_v3, %v130_v25  ;;  %589 = vst [vmem:[%s1052_s3 + $0xa0] sm:$0xff] %v513_v28   ;;  %v261_v40 = vmax.f32 %v197_v31, 0.0  ;;  %v132_v41 = vmul.f32 %v632_v2, %v64_v26  ;;  %v133_v42 = vmul.f32 %v632_v2, %v65_v27 }
  0x2e   :  { %v523_v39 = vpack.c.bf16 %v259_v30, %v258_v29  ;;  %590 = vst [vmem:[%s1052_s3 + $0xa8] sm:$0xff] %v518_v34   ;;  %v199_v44 = vadd.f32 %v637_v3, %v131_v36  ;;  %v134_v46 = vmul.f32 %v632_v2, %v66_v32  ;;  %v135_v47 = vmul.f32 %v632_v2, %v67_v33 }
  0x2f   :  { %v262_v45 = vmax.f32 %v198_v37, 0.0  ;;  %v528_v49 = vpack.c.bf16 %v261_v40, %v260_v35  ;;  %v200_v50 = vadd.f32 %v637_v3, %v132_v41  ;;  %v201_v51 = vadd.f32 %v637_v3, %v133_v42 }
  0x30   :  { %591 = vst [vmem:[%s1052_s3 + $0xb0] sm:$0xff] %v523_v39   ;;  %v136_v52 = vmul.f32 %v632_v2, %v68_v38  ;;  %v263_v53 = vmax.f32 %v199_v44, 0.0  ;;  %v202_v54 = vadd.f32 %v637_v3, %v134_v46  ;;  %v203_v55 = vadd.f32 %v637_v3, %v135_v47 }
  0x31   :  { %v137_v56 = vmul.f32 %v632_v2, %v69_v43  ;;  %592 = vst [vmem:[%s1052_s3 + $0xb8] sm:$0xff] %v528_v49   ;;  %v264_v58 = vmax.f32 %v200_v50, 0.0  ;;  %v265_v59 = vmax.f32 %v201_v51, 0.0  ;;  %v138_v61 = vmul.f32 %v632_v2, %v70_v48 }
  0x32   :  { %v204_v60 = vadd.f32 %v637_v3, %v136_v52  ;;  %v533_v0 = vpack.c.bf16 %v263_v53, %v262_v45  ;;  %v266_v1 = vmax.f32 %v202_v54, 0.0  ;;  %v267_v4 = vmax.f32 %v203_v55, 0.0 }
  0x33   :  { %v205_v5 = vadd.f32 %v637_v3, %v137_v56  ;;  %v538_v8 = vpack.c.bf16 %v265_v59, %v264_v58  ;;  %v139_v10 = vmul.f32 %v632_v2, %v71_v57  ;;  %v206_v11 = vadd.f32 %v637_v3, %v138_v61 }
  0x34   :  { %v268_v9 = vmax.f32 %v204_v60, 0.0  ;;  %593 = vst [vmem:[%s1052_s3 + $0xc0] sm:$0xff] %v533_v0   ;;  %v543_v13 = vpack.c.bf16 %v267_v4, %v266_v1  ;;  %v140_v15 = vmul.f32 %v632_v2, %v72_v62  ;;  %v141_v16 = vmul.f32 %v632_v2, %v73_v63 }
  0x35   :  { %v269_v14 = vmax.f32 %v205_v5, 0.0  ;;  %594 = vst [vmem:[%s1052_s3 + $0xc8] sm:$0xff] %v538_v8   ;;  %v207_v18 = vadd.f32 %v637_v3, %v139_v10  ;;  %v270_v19 = vmax.f32 %v206_v11, 0.0  ;;  %v142_v20 = vmul.f32 %v632_v2, %v74_v6 }
  0x36   :  { %v143_v21 = vmul.f32 %v632_v2, %v75_v7  ;;  %595 = vst [vmem:[%s1052_s3 + $0xd0] sm:$0xff] %v543_v13   ;;  %v208_v23 = vadd.f32 %v637_v3, %v140_v15  ;;  %v209_v24 = vadd.f32 %v637_v3, %v141_v16  ;;  %v144_v25 = vmul.f32 %v632_v2, %v76_v12 }
  0x37   :  { %v548_v22 = vpack.c.bf16 %v269_v14, %v268_v9  ;;  %v271_v26 = vmax.f32 %v207_v18, 0.0  ;;  %v210_v27 = vadd.f32 %v637_v3, %v142_v20  ;;  %v145_v29 = vmul.f32 %v632_v2, %v77_v17 }
  0x38   :  { %v211_v28 = vadd.f32 %v637_v3, %v143_v21  ;;  %v272_v30 = vmax.f32 %v208_v23, 0.0  ;;  %v273_v31 = vmax.f32 %v209_v24, 0.0  ;;  %v212_v32 = vadd.f32 %v637_v3, %v144_v25 }
  0x39   :  { %596 = vst [vmem:[%s1052_s3 + $0xd8] sm:$0xff] %v548_v22   ;;  %v553_v33 = vpack.c.bf16 %v271_v26, %v270_v19  ;;  %v274_v34 = vmax.f32 %v210_v27, 0.0  ;;  %v213_v36 = vadd.f32 %v637_v3, %v145_v29 }
  0x3a   :  { %v275_v35 = vmax.f32 %v211_v28, 0.0  ;;  %v558_v37 = vpack.c.bf16 %v273_v31, %v272_v30  ;;  %v276_v38 = vmax.f32 %v212_v32, 0.0 }
  0x3b   :  { %597 = vst [vmem:[%s1052_s3 + $0xe0] sm:$0xff] %v553_v33   ;;  %v277_v39 = vmax.f32 %v213_v36, 0.0 }
  0x3c   :  { %v563_v2 = vpack.c.bf16 %v275_v35, %v274_v34  ;;  %598 = vst [vmem:[%s1052_s3 + $0xe8] sm:$0xff] %v558_v37  }
  0x3d   :  { %v568_v40 = vpack.c.bf16 %v277_v39, %v276_v38 }
  0x3e   :  { %599 = vst [vmem:[%s1052_s3 + $0xf0] sm:$0xff] %v563_v2  }
  0x3f   :  { %600 = vst [vmem:[%s1052_s3 + $0xf8] sm:$0xff] %v568_v40  }

// kernel: generator_forward.16
= control target key start
LH: loop header
LB: loop body
LE: loop exit
PB: predicated region body
PF: predicated region fallthrough
CT: control target
= control target key end

     0   :  { %s1440_s12 = smov 0   ;;  %s1933_s0 = inlined_call_operand.vmem [shape: f32[2048,128], index: 0, kind: input, shape index: {}]   ;;  %s1934_s1 = inlined_call_operand.vmem [shape: f32[1,128], index: 1, kind: input, shape index: {}]   ;;  %s1935_s2 = inlined_call_operand.vmem [shape: f32[1,128], index: 2, kind: input, shape index: {}]   ;;  %s1936_s3 = inlined_call_operand.vmem [shape: bf16[2048,128], index: 3, kind: output, shape index: {}]  }
   0x1 LB: > { %s1006_s13 = sadd.s32 4294967295, %s1418_s12   ;;  %p1010_p0 = scmp.ge.s32.totalorder %s1418_s12, 1  ;;  %s1418_s12 = sphi %s1440_s12, %s13_s12  }
   0x2   : > { %p138_p1 = scmp.lt.s32.totalorder %s1418_s12, 3 }
   0x4   : > { %p139_p2 = pnand %p1010_p0, %p138_p1 }
   0x5   : > { %s1011_s14 = sshll.u32 (!%p139_p2), %s1006_s13, 7 }
   0x6   : > { %142 = sbr.rel (%p139_p2) target bundleno = 133 (0x85), region = 32  ;;  %p163_p3 = scmp.lt.s32.totalorder (!%p139_p2), %s1011_s14, 255 }
   0xb   : > { %s1938_s14 = smov (!%p163_p3, %s1011_s14), 255  ;;  %v1453_v0 = vld [vmem:[%s1934_s1] ss:$0 sm:$0xff] }
   0xc   : > { %s1012_s17 = sshll.u32 %s1938_s14, 3  ;;  %v1464_v1 = vld [vmem:[%s1935_s2] ss:$0 sm:$0xff]  ;;  %s1014_s23 = sshll.u32 %s1938_s14, 2 }
   0xd   : > { %s1459_s20 = scalar_lea.vmem %s1933_s0, %s1012_s17  ;;  %s1496_s26 = scalar_lea.vmem %s1936_s3, %s1014_s23 }
   0xe   : > { %v174_v2 = vld [vmem:[%s1459_s20] sm:$0xff]  ;;  %v175_v3 = vld [vmem:[%s1459_s20 + $0x8] sm:$0xff]  ;;  %v176_v4 = vld [vmem:[%s1459_s20 + $0x10] sm:$0xff] }
   0xf   : > { %v306_v5 = vmul.f32 %v1453_v0, %v174_v2  ;;  %v307_v6 = vmul.f32 %v1453_v0, %v175_v3  ;;  %v177_v7 = vld [vmem:[%s1459_s20 + $0x18] sm:$0xff]  ;;  %v308_v8 = vmul.f32 %v1453_v0, %v176_v4  ;;  %v178_v9 = vld [vmem:[%s1459_s20 + $0x20] sm:$0xff]  ;;  %v179_v10 = vld [vmem:[%s1459_s20 + $0x28] sm:$0xff] }
  0x10   : > { %v309_v11 = vmul.f32 %v1453_v0, %v177_v7  ;;  %v310_v12 = vmul.f32 %v1453_v0, %v178_v9  ;;  %v311_v13 = vmul.f32 %v1453_v0, %v179_v10  ;;  %v180_v14 = vld [vmem:[%s1459_s20 + $0x30] sm:$0xff]  ;;  %v181_v15 = vld [vmem:[%s1459_s20 + $0x38] sm:$0xff]  ;;  %v182_v24 = vld [vmem:[%s1459_s20 + $0x40] sm:$0xff] }
  0x11   : > { %v438_v16 = vadd.f32 %v1464_v1, %v306_v5  ;;  %v439_v17 = vadd.f32 %v1464_v1, %v307_v6  ;;  %v440_v18 = vadd.f32 %v1464_v1, %v308_v8  ;;  %v312_v19 = vmul.f32 %v1453_v0, %v180_v14  ;;  %v183_v25 = vld [vmem:[%s1459_s20 + $0x48] sm:$0xff]  ;;  %v184_v30 = vld [vmem:[%s1459_s20 + $0x50] sm:$0xff]  ;;  %v185_v35 = vld [vmem:[%s1459_s20 + $0x58] sm:$0xff] }
  0x12   : > { %v441_v20 = vadd.f32 %v1464_v1, %v309_v11  ;;  %v442_v21 = vadd.f32 %v1464_v1, %v310_v12  ;;  %v443_v22 = vadd.f32 %v1464_v1, %v311_v13  ;;  %v313_v23 = vmul.f32 %v1453_v0, %v181_v15  ;;  %v186_v36 = vld [vmem:[%s1459_s20 + $0x60] sm:$0xff]  ;;  %v187_v41 = vld [vmem:[%s1459_s20 + $0x68] sm:$0xff]  ;;  %v188_v42 = vld [vmem:[%s1459_s20 + $0x70] sm:$0xff] }
  0x13   : > { %v566_v26 = vmax.f32 %v438_v16, 0.0  ;;  %v567_v27 = vmax.f32 %v439_v17, 0.0  ;;  %v568_v28 = vmax.f32 %v440_v18, 0.0  ;;  %v444_v29 = vadd.f32 %v1464_v1, %v312_v19  ;;  %v189_v51 = vld [vmem:[%s1459_s20 + $0x78] sm:$0xff]  ;;  %v190_v56 = vld [vmem:[%s1459_s20 + $0x80] sm:$0xff]  ;;  %v191_v61 = vld [vmem:[%s1459_s20 + $0x88] sm:$0xff] }
  0x14   : > { %v569_v31 = vmax.f32 %v441_v20, 0.0  ;;  %v570_v32 = vmax.f32 %v442_v21, 0.0  ;;  %v571_v33 = vmax.f32 %v443_v22, 0.0  ;;  %v445_v34 = vadd.f32 %v1464_v1, %v313_v23  ;;  %v192_v4 = vld [vmem:[%s1459_s20 + $0x90] sm:$0xff]  ;;  %v193_v5 = vld [vmem:[%s1459_s20 + $0x98] sm:$0xff]  ;;  %v194_v10 = vld [vmem:[%s1459_s20 + $0xa0] sm:$0xff] }
  0x15   : > { %v1020_v37 = vpack.c.bf16 %v567_v27, %v566_v26  ;;  %v572_v38 = vmax.f32 %v444_v29, 0.0  ;;  %v314_v39 = vmul.f32 %v1453_v0, %v182_v24  ;;  %v315_v40 = vmul.f32 %v1453_v0, %v183_v25  ;;  %v195_v15 = vld [vmem:[%s1459_s20 + $0xa8] sm:$0xff]  ;;  %v196_v20 = vld [vmem:[%s1459_s20 + $0xb0] sm:$0xff]  ;;  %v197_v25 = vld [vmem:[%s1459_s20 + $0xb8] sm:$0xff] }
  0x16   : > { %v1025_v43 = vpack.c.bf16 %v569_v31, %v568_v28  ;;  %v1030_v44 = vpack.c.bf16 %v571_v33, %v570_v32  ;;  %v573_v45 = vmax.f32 %v445_v34, 0.0  ;;  %v316_v46 = vmul.f32 %v1453_v0, %v184_v30  ;;  %v198_v30 = vld [vmem:[%s1459_s20 + $0xc0] sm:$0xff] }
  0x17   : > { %1021 = vst [vmem:[%s1496_s26] sm:$0xff] %v1020_v37   ;;  %v446_v47 = vadd.f32 %v1464_v1, %v314_v39  ;;  %v447_v48 = vadd.f32 %v1464_v1, %v315_v40  ;;  %v317_v49 = vmul.f32 %v1453_v0, %v185_v35  ;;  %v318_v50 = vmul.f32 %v1453_v0, %v186_v36  ;;  %v199_v35 = vld [vmem:[%s1459_s20 + $0xc8] sm:$0xff]  ;;  %v200_v40 = vld [vmem:[%s1459_s20 + $0xd0] sm:$0xff] }
  0x18   : > { %1337 = vst [vmem:[%s1496_s26 + $0x8] sm:$0xff] %v1025_v43   ;;  %v1035_v52 = vpack.c.bf16 %v573_v45, %v572_v38  ;;  %v448_v53 = vadd.f32 %v1464_v1, %v316_v46  ;;  %v319_v54 = vmul.f32 %v1453_v0, %v187_v41  ;;  %v320_v55 = vmul.f32 %v1453_v0, %v188_v42  ;;  %v201_v41 = vld [vmem:[%s1459_s20 + $0xd8] sm:$0xff]  ;;  %v202_v46 = vld [vmem:[%s1459_s20 + $0xe0] sm:$0xff] }
  0x19   : > { %1338 = vst [vmem:[%s1496_s26 + $0x10] sm:$0xff] %v1030_v44   ;;  %v574_v57 = vmax.f32 %v446_v47, 0.0  ;;  %v575_v58 = vmax.f32 %v447_v48, 0.0  ;;  %v449_v59 = vadd.f32 %v1464_v1, %v317_v49  ;;  %v450_v60 = vadd.f32 %v1464_v1, %v318_v50 }
  0x1a   : > { %1339 = vst [vmem:[%s1496_s26 + $0x18] sm:$0xff] %v1035_v52   ;;  %v576_v62 = vmax.f32 %v448_v53, 0.0  ;;  %v451_v63 = vadd.f32 %v1464_v1, %v319_v54  ;;  %v321_v2 = vmul.f32 %v1453_v0, %v189_v51  ;;  %v452_v3 = vadd.f32 %v1464_v1, %v320_v55  ;;  %v203_v51 = vld [vmem:[%s1459_s20 + $0xe8] sm:$0xff] }
  0x1b   : > { %v1040_v6 = vpack.c.bf16 %v575_v58, %v574_v57  ;;  %v577_v7 = vmax.f32 %v449_v59, 0.0  ;;  %v578_v8 = vmax.f32 %v450_v60, 0.0  ;;  %v322_v9 = vmul.f32 %v1453_v0, %v190_v56  ;;  %v204_v56 = vld [vmem:[%s1459_s20 + $0xf0] sm:$0xff] }
  0x1c   : > { %v579_v11 = vmax.f32 %v451_v63, 0.0  ;;  %v453_v12 = vadd.f32 %v1464_v1, %v321_v2  ;;  %v580_v13 = vmax.f32 %v452_v3, 0.0  ;;  %v323_v14 = vmul.f32 %v1453_v0, %v191_v61  ;;  %v205_v61 = vld [vmem:[%s1459_s20 + $0xf8] sm:$0xff] }
  0x1d   : > { %1340 = vst [vmem:[%s1496_s26 + $0x20] sm:$0xff] %v1040_v6   ;;  %v1045_v16 = vpack.c.bf16 %v577_v7, %v576_v62  ;;  %v454_v17 = vadd.f32 %v1464_v1, %v322_v9  ;;  %v324_v18 = vmul.f32 %v1453_v0, %v192_v4  ;;  %v325_v19 = vmul.f32 %v1453_v0, %v193_v5  ;;  %v206_v4 = vld [vmem:[%s1459_s20 + $0x100] sm:$0xff]  ;;  %v207_v9 = vld [vmem:[%s1459_s20 + $0x108] sm:$0xff] }
  0x1e   : > { %v1050_v21 = vpack.c.bf16 %v579_v11, %v578_v8  ;;  %v581_v22 = vmax.f32 %v453_v12, 0.0  ;;  %v455_v23 = vadd.f32 %v1464_v1, %v323_v14  ;;  %v326_v24 = vmul.f32 %v1453_v0, %v194_v10  ;;  %v208_v14 = vld [vmem:[%s1459_s20 + $0x110] sm:$0xff] }
  0x1f   : > { %1341 = vst [vmem:[%s1496_s26 + $0x28] sm:$0xff] %v1045_v16   ;;  %v582_v26 = vmax.f32 %v454_v17, 0.0  ;;  %v456_v27 = vadd.f32 %v1464_v1, %v324_v18  ;;  %v457_v28 = vadd.f32 %v1464_v1, %v325_v19  ;;  %v327_v29 = vmul.f32 %v1453_v0, %v195_v15  ;;  %v209_v15 = vld [vmem:[%s1459_s20 + $0x118] sm:$0xff] }
  0x20   : > { %1342 = vst [vmem:[%s1496_s26 + $0x30] sm:$0xff] %v1050_v21   ;;  %v1055_v31 = vpack.c.bf16 %v581_v22, %v580_v13  ;;  %v583_v32 = vmax.f32 %v455_v23, 0.0  ;;  %v458_v33 = vadd.f32 %v1464_v1, %v326_v24  ;;  %v328_v34 = vmul.f32 %v1453_v0, %v196_v20  ;;  %v210_v20 = vld [vmem:[%s1459_s20 + $0x120] sm:$0xff] }
  0x21   : > { %v584_v36 = vmax.f32 %v456_v27, 0.0  ;;  %v585_v37 = vmax.f32 %v457_v28, 0.0  ;;  %v459_v38 = vadd.f32 %v1464_v1, %v327_v29  ;;  %v329_v39 = vmul.f32 %v1453_v0, %v197_v25  ;;  %v211_v25 = vld [vmem:[%s1459_s20 + $0x128] sm:$0xff] }
  0x22   : > { %1343 = vst [vmem:[%s1496_s26 + $0x38] sm:$0xff] %v1055_v31   ;;  %v1060_v42 = vpack.c.bf16 %v583_v32, %v582_v26  ;;  %v586_v43 = vmax.f32 %v458_v33, 0.0  ;;  %v460_v44 = vadd.f32 %v1464_v1, %v328_v34  ;;  %v330_v45 = vmul.f32 %v1453_v0, %v198_v30  ;;  %v212_v30 = vld [vmem:[%s1459_s20 + $0x130] sm:$0xff] }
  0x23   : > { %v1065_v47 = vpack.c.bf16 %v585_v37, %v584_v36  ;;  %v587_v48 = vmax.f32 %v459_v38, 0.0  ;;  %v461_v49 = vadd.f32 %v1464_v1, %v329_v39  ;;  %v331_v50 = vmul.f32 %v1453_v0, %v199_v35  ;;  %v213_v35 = vld [vmem:[%s1459_s20 + $0x138] sm:$0xff] }
  0x24   : > { %1344 = vst [vmem:[%s1496_s26 + $0x40] sm:$0xff] %v1060_v42   ;;  %v588_v52 = vmax.f32 %v460_v44, 0.0  ;;  %v462_v53 = vadd.f32 %v1464_v1, %v330_v45  ;;  %v332_v54 = vmul.f32 %v1453_v0, %v200_v40  ;;  %v333_v55 = vmul.f32 %v1453_v0, %v201_v41  ;;  %v214_v40 = vld [vmem:[%s1459_s20 + $0x140] sm:$0xff]  ;;  %v215_v45 = vld [vmem:[%s1459_s20 + $0x148] sm:$0xff] }
  0x25   : > { %1345 = vst [vmem:[%s1496_s26 + $0x48] sm:$0xff] %v1065_v47   ;;  %v1070_v57 = vpack.c.bf16 %v587_v48, %v586_v43  ;;  %v589_v58 = vmax.f32 %v461_v49, 0.0  ;;  %v463_v59 = vadd.f32 %v1464_v1, %v331_v50  ;;  %v334_v60 = vmul.f32 %v1453_v0, %v202_v46  ;;  %v216_v50 = vld [vmem:[%s1459_s20 + $0x150] sm:$0xff] }
  0x26   : > { %v590_v62 = vmax.f32 %v462_v53, 0.0  ;;  %v464_v63 = vadd.f32 %v1464_v1, %v332_v54  ;;  %v465_v2 = vadd.f32 %v1464_v1, %v333_v55  ;;  %v335_v3 = vmul.f32 %v1453_v0, %v203_v51  ;;  %v217_v51 = vld [vmem:[%s1459_s20 + $0x158] sm:$0xff] }
  0x27   : > { %1346 = vst [vmem:[%s1496_s26 + $0x50] sm:$0xff] %v1070_v57   ;;  %v1075_v5 = vpack.c.bf16 %v589_v58, %v588_v52  ;;  %v591_v6 = vmax.f32 %v463_v59, 0.0  ;;  %v466_v7 = vadd.f32 %v1464_v1, %v334_v60  ;;  %v336_v8 = vmul.f32 %v1453_v0, %v204_v56  ;;  %v218_v56 = vld [vmem:[%s1459_s20 + $0x160] sm:$0xff] }
  0x28   : > { %v592_v10 = vmax.f32 %v464_v63, 0.0  ;;  %v593_v11 = vmax.f32 %v465_v2, 0.0  ;;  %v467_v12 = vadd.f32 %v1464_v1, %v335_v3  ;;  %v337_v13 = vmul.f32 %v1453_v0, %v205_v61  ;;  %v219_v61 = vld [vmem:[%s1459_s20 + $0x168] sm:$0xff] }
  0x29   : > { %1347 = vst [vmem:[%s1496_s26 + $0x58] sm:$0xff] %v1075_v5   ;;  %v1080_v16 = vpack.c.bf16 %v591_v6, %v590_v62  ;;  %v594_v17 = vmax.f32 %v466_v7, 0.0  ;;  %v468_v18 = vadd.f32 %v1464_v1, %v336_v8  ;;  %v338_v19 = vmul.f32 %v1453_v0, %v206_v4  ;;  %v220_v4 = vld [vmem:[%s1459_s20 + $0x170] sm:$0xff] }
  0x2a   : > { %v1085_v21 = vpack.c.bf16 %v593_v11, %v592_v10  ;;  %v595_v22 = vmax.f32 %v467_v12, 0.0  ;;  %v469_v23 = vadd.f32 %v1464_v1, %v337_v13  ;;  %v339_v24 = vmul.f32 %v1453_v0, %v207_v9  ;;  %v221_v9 = vld [vmem:[%s1459_s20 + $0x178] sm:$0xff] }
  0x2b   : > { %1348 = vst [vmem:[%s1496_s26 + $0x60] sm:$0xff] %v1080_v16   ;;  %v596_v26 = vmax.f32 %v468_v18, 0.0  ;;  %v470_v27 = vadd.f32 %v1464_v1, %v338_v19  ;;  %v340_v28 = vmul.f32 %v1453_v0, %v208_v14  ;;  %v341_v29 = vmul.f32 %v1453_v0, %v209_v15  ;;  %v222_v14 = vld [vmem:[%s1459_s20 + $0x180] sm:$0xff]  ;;  %v223_v19 = vld [vmem:[%s1459_s20 + $0x188] sm:$0xff] }
  0x2c   : > { %1349 = vst [vmem:[%s1496_s26 + $0x68] sm:$0xff] %v1085_v21   ;;  %v1090_v31 = vpack.c.bf16 %v595_v22, %v594_v17  ;;  %v597_v32 = vmax.f32 %v469_v23, 0.0  ;;  %v471_v33 = vadd.f32 %v1464_v1, %v339_v24  ;;  %v342_v34 = vmul.f32 %v1453_v0, %v210_v20  ;;  %v224_v24 = vld [vmem:[%s1459_s20 + $0x190] sm:$0xff] }
  0x2d   : > { %v598_v36 = vmax.f32 %v470_v27, 0.0  ;;  %v472_v37 = vadd.f32 %v1464_v1, %v340_v28  ;;  %v473_v38 = vadd.f32 %v1464_v1, %v341_v29  ;;  %v343_v39 = vmul.f32 %v1453_v0, %v211_v25  ;;  %v225_v25 = vld [vmem:[%s1459_s20 + $0x198] sm:$0xff] }
  0x2e   : > { %1350 = vst [vmem:[%s1496_s26 + $0x70] sm:$0xff] %v1090_v31   ;;  %v1095_v41 = vpack.c.bf16 %v597_v32, %v596_v26  ;;  %v599_v42 = vmax.f32 %v471_v33, 0.0  ;;  %v474_v43 = vadd.f32 %v1464_v1, %v342_v34  ;;  %v344_v44 = vmul.f32 %v1453_v0, %v212_v30  ;;  %v226_v30 = vld [vmem:[%s1459_s20 + $0x1a0] sm:$0xff] }
  0x2f   : > { %v600_v46 = vmax.f32 %v472_v37, 0.0  ;;  %v601_v47 = vmax.f32 %v473_v38, 0.0  ;;  %v475_v48 = vadd.f32 %v1464_v1, %v343_v39  ;;  %v345_v49 = vmul.f32 %v1453_v0, %v213_v35  ;;  %v227_v35 = vld [vmem:[%s1459_s20 + $0x1a8] sm:$0xff] }
  0x30   : > { %1351 = vst [vmem:[%s1496_s26 + $0x78] sm:$0xff] %v1095_v41   ;;  %v1100_v52 = vpack.c.bf16 %v599_v42, %v598_v36  ;;  %v602_v53 = vmax.f32 %v474_v43, 0.0  ;;  %v476_v54 = vadd.f32 %v1464_v1, %v344_v44  ;;  %v346_v55 = vmul.f32 %v1453_v0, %v214_v40  ;;  %v228_v40 = vld [vmem:[%s1459_s20 + $0x1b0] sm:$0xff] }
  0x31   : > { %v1105_v57 = vpack.c.bf16 %v601_v47, %v600_v46  ;;  %v603_v58 = vmax.f32 %v475_v48, 0.0  ;;  %v477_v59 = vadd.f32 %v1464_v1, %v345_v49  ;;  %v347_v60 = vmul.f32 %v1453_v0, %v215_v45  ;;  %v229_v45 = vld [vmem:[%s1459_s20 + $0x1b8] sm:$0xff] }
  0x32   : > { %1352 = vst [vmem:[%s1496_s26 + $0x80] sm:$0xff] %v1100_v52   ;;  %v604_v62 = vmax.f32 %v476_v54, 0.0  ;;  %v478_v63 = vadd.f32 %v1464_v1, %v346_v55  ;;  %v348_v2 = vmul.f32 %v1453_v0, %v216_v50  ;;  %v349_v3 = vmul.f32 %v1453_v0, %v217_v51  ;;  %v230_v50 = vld [vmem:[%s1459_s20 + $0x1c0] sm:$0xff]  ;;  %v231_v55 = vld [vmem:[%s1459_s20 + $0x1c8] sm:$0xff] }
  0x33   : > { %1353 = vst [vmem:[%s1496_s26 + $0x88] sm:$0xff] %v1105_v57   ;;  %v1110_v5 = vpack.c.bf16 %v603_v58, %v602_v53  ;;  %v605_v6 = vmax.f32 %v477_v59, 0.0  ;;  %v479_v7 = vadd.f32 %v1464_v1, %v347_v60  ;;  %v350_v8 = vmul.f32 %v1453_v0, %v218_v56  ;;  %v232_v60 = vld [vmem:[%s1459_s20 + $0x1d0] sm:$0xff] }
  0x34   : > { %v606_v10 = vmax.f32 %v478_v63, 0.0  ;;  %v480_v11 = vadd.f32 %v1464_v1, %v348_v2  ;;  %v481_v12 = vadd.f32 %v1464_v1, %v349_v3  ;;  %v351_v13 = vmul.f32 %v1453_v0, %v219_v61  ;;  %v233_v61 = vld [vmem:[%s1459_s20 + $0x1d8] sm:$0xff] }
  0x35   : > { %1354 = vst [vmem:[%s1496_s26 + $0x90] sm:$0xff] %v1110_v5   ;;  %v1115_v15 = vpack.c.bf16 %v605_v6, %v604_v62  ;;  %v607_v16 = vmax.f32 %v479_v7, 0.0  ;;  %v482_v17 = vadd.f32 %v1464_v1, %v350_v8  ;;  %v352_v18 = vmul.f32 %v1453_v0, %v220_v4  ;;  %v234_v4 = vld [vmem:[%s1459_s20 + $0x1e0] sm:$0xff] }
  0x36   : > { %v608_v20 = vmax.f32 %v480_v11, 0.0  ;;  %v609_v21 = vmax.f32 %v481_v12, 0.0  ;;  %v483_v22 = vadd.f32 %v1464_v1, %v351_v13  ;;  %v353_v23 = vmul.f32 %v1453_v0, %v221_v9  ;;  %v235_v9 = vld [vmem:[%s1459_s20 + $0x1e8] sm:$0xff] }
  0x37   : > { %1355 = vst [vmem:[%s1496_s26 + $0x98] sm:$0xff] %v1115_v15   ;;  %v1120_v26 = vpack.c.bf16 %v607_v16, %v606_v10  ;;  %v610_v27 = vmax.f32 %v482_v17, 0.0  ;;  %v484_v28 = vadd.f32 %v1464_v1, %v352_v18  ;;  %v354_v29 = vmul.f32 %v1453_v0, %v222_v14  ;;  %v236_v14 = vld [vmem:[%s1459_s20 + $0x1f0] sm:$0xff] }
  0x38   : > { %v1125_v31 = vpack.c.bf16 %v609_v21, %v608_v20  ;;  %v611_v32 = vmax.f32 %v483_v22, 0.0  ;;  %v485_v33 = vadd.f32 %v1464_v1, %v353_v23  ;;  %v355_v34 = vmul.f32 %v1453_v0, %v223_v19  ;;  %v237_v19 = vld [vmem:[%s1459_s20 + $0x1f8] sm:$0xff] }
  0x39   : > { %1356 = vst [vmem:[%s1496_s26 + $0xa0] sm:$0xff] %v1120_v26   ;;  %v612_v36 = vmax.f32 %v484_v28, 0.0  ;;  %v486_v37 = vadd.f32 %v1464_v1, %v354_v29  ;;  %v356_v38 = vmul.f32 %v1453_v0, %v224_v24  ;;  %v357_v39 = vmul.f32 %v1453_v0, %v225_v25  ;;  %v238_v24 = vld [vmem:[%s1459_s20 + $0x200] sm:$0xff]  ;;  %v239_v29 = vld [vmem:[%s1459_s20 + $0x208] sm:$0xff] }
  0x3a   : > { %1357 = vst [vmem:[%s1496_s26 + $0xa8] sm:$0xff] %v1125_v31   ;;  %v1130_v41 = vpack.c.bf16 %v611_v32, %v610_v27  ;;  %v613_v42 = vmax.f32 %v485_v33, 0.0  ;;  %v487_v43 = vadd.f32 %v1464_v1, %v355_v34  ;;  %v358_v44 = vmul.f32 %v1453_v0, %v226_v30  ;;  %v240_v34 = vld [vmem:[%s1459_s20 + $0x210] sm:$0xff] }
  0x3b   : > { %v614_v46 = vmax.f32 %v486_v37, 0.0  ;;  %v488_v47 = vadd.f32 %v1464_v1, %v356_v38  ;;  %v489_v48 = vadd.f32 %v1464_v1, %v357_v39  ;;  %v359_v49 = vmul.f32 %v1453_v0, %v227_v35  ;;  %v241_v35 = vld [vmem:[%s1459_s20 + $0x218] sm:$0xff] }
  0x3c   : > { %1358 = vst [vmem:[%s1496_s26 + $0xb0] sm:$0xff] %v1130_v41   ;;  %v1135_v51 = vpack.c.bf16 %v613_v42, %v612_v36  ;;  %v615_v52 = vmax.f32 %v487_v43, 0.0  ;;  %v490_v53 = vadd.f32 %v1464_v1, %v358_v44  ;;  %v360_v54 = vmul.f32 %v1453_v0, %v228_v40  ;;  %v242_v40 = vld [vmem:[%s1459_s20 + $0x220] sm:$0xff] }
  0x3d   : > { %v616_v56 = vmax.f32 %v488_v47, 0.0  ;;  %v617_v57 = vmax.f32 %v489_v48, 0.0  ;;  %v491_v58 = vadd.f32 %v1464_v1, %v359_v49  ;;  %v361_v59 = vmul.f32 %v1453_v0, %v229_v45  ;;  %v243_v45 = vld [vmem:[%s1459_s20 + $0x228] sm:$0xff] }
  0x3e   : > { %1359 = vst [vmem:[%s1496_s26 + $0xb8] sm:$0xff] %v1135_v51   ;;  %v1140_v62 = vpack.c.bf16 %v615_v52, %v614_v46  ;;  %v618_v63 = vmax.f32 %v490_v53, 0.0  ;;  %v492_v2 = vadd.f32 %v1464_v1, %v360_v54  ;;  %v362_v3 = vmul.f32 %v1453_v0, %v230_v50  ;;  %v244_v50 = vld [vmem:[%s1459_s20 + $0x230] sm:$0xff] }
  0x3f   : > { %v1145_v5 = vpack.c.bf16 %v617_v57, %v616_v56  ;;  %v619_v6 = vmax.f32 %v491_v58, 0.0  ;;  %v493_v7 = vadd.f32 %v1464_v1, %v361_v59  ;;  %v363_v8 = vmul.f32 %v1453_v0, %v231_v55  ;;  %v245_v55 = vld [vmem:[%s1459_s20 + $0x238] sm:$0xff] }
  0x40   : > { %1360 = vst [vmem:[%s1496_s26 + $0xc0] sm:$0xff] %v1140_v62   ;;  %v620_v10 = vmax.f32 %v492_v2, 0.0  ;;  %v494_v11 = vadd.f32 %v1464_v1, %v362_v3  ;;  %v364_v12 = vmul.f32 %v1453_v0, %v232_v60  ;;  %v365_v13 = vmul.f32 %v1453_v0, %v233_v61  ;;  %v246_v60 = vld [vmem:[%s1459_s20 + $0x240] sm:$0xff]  ;;  %v247_v3 = vld [vmem:[%s1459_s20 + $0x248] sm:$0xff] }
  0x41   : > { %1361 = vst [vmem:[%s1496_s26 + $0xc8] sm:$0xff] %v1145_v5   ;;  %v1150_v15 = vpack.c.bf16 %v619_v6, %v618_v63  ;;  %v621_v16 = vmax.f32 %v493_v7, 0.0  ;;  %v495_v17 = vadd.f32 %v1464_v1, %v363_v8  ;;  %v366_v18 = vmul.f32 %v1453_v0, %v234_v4  ;;  %v248_v8 = vld [vmem:[%s1459_s20 + $0x250] sm:$0xff] }
  0x42   : > { %v622_v20 = vmax.f32 %v494_v11, 0.0  ;;  %v496_v21 = vadd.f32 %v1464_v1, %v364_v12  ;;  %v497_v22 = vadd.f32 %v1464_v1, %v365_v13  ;;  %v367_v23 = vmul.f32 %v1453_v0, %v235_v9  ;;  %v249_v9 = vld [vmem:[%s1459_s20 + $0x258] sm:$0xff] }
  0x43   : > { %1362 = vst [vmem:[%s1496_s26 + $0xd0] sm:$0xff] %v1150_v15   ;;  %v1155_v25 = vpack.c.bf16 %v621_v16, %v620_v10  ;;  %v623_v26 = vmax.f32 %v495_v17, 0.0  ;;  %v498_v27 = vadd.f32 %v1464_v1, %v366_v18  ;;  %v368_v28 = vmul.f32 %v1453_v0, %v236_v14  ;;  %v250_v14 = vld [vmem:[%s1459_s20 + $0x260] sm:$0xff] }
  0x44   : > { %v624_v30 = vmax.f32 %v496_v21, 0.0  ;;  %v625_v31 = vmax.f32 %v497_v22, 0.0  ;;  %v499_v32 = vadd.f32 %v1464_v1, %v367_v23  ;;  %v369_v33 = vmul.f32 %v1453_v0, %v237_v19  ;;  %v251_v19 = vld [vmem:[%s1459_s20 + $0x268] sm:$0xff] }
  0x45   : > { %1363 = vst [vmem:[%s1496_s26 + $0xd8] sm:$0xff] %v1155_v25   ;;  %v1160_v36 = vpack.c.bf16 %v623_v26, %v622_v20  ;;  %v626_v37 = vmax.f32 %v498_v27, 0.0  ;;  %v500_v38 = vadd.f32 %v1464_v1, %v368_v28  ;;  %v370_v39 = vmul.f32 %v1453_v0, %v238_v24  ;;  %v252_v24 = vld [vmem:[%s1459_s20 + $0x270] sm:$0xff] }
  0x46   : > { %v1165_v41 = vpack.c.bf16 %v625_v31, %v624_v30  ;;  %v627_v42 = vmax.f32 %v499_v32, 0.0  ;;  %v501_v43 = vadd.f32 %v1464_v1, %v369_v33  ;;  %v371_v44 = vmul.f32 %v1453_v0, %v239_v29  ;;  %v253_v29 = vld [vmem:[%s1459_s20 + $0x278] sm:$0xff] }
  0x47   : > { %1364 = vst [vmem:[%s1496_s26 + $0xe0] sm:$0xff] %v1160_v36   ;;  %v628_v46 = vmax.f32 %v500_v38, 0.0  ;;  %v502_v47 = vadd.f32 %v1464_v1, %v370_v39  ;;  %v372_v48 = vmul.f32 %v1453_v0, %v240_v34  ;;  %v373_v49 = vmul.f32 %v1453_v0, %v241_v35  ;;  %v254_v34 = vld [vmem:[%s1459_s20 + $0x280] sm:$0xff]  ;;  %v255_v39 = vld [vmem:[%s1459_s20 + $0x288] sm:$0xff] }
  0x48   : > { %1365 = vst [vmem:[%s1496_s26 + $0xe8] sm:$0xff] %v1165_v41   ;;  %v1170_v51 = vpack.c.bf16 %v627_v42, %v626_v37  ;;  %v629_v52 = vmax.f32 %v501_v43, 0.0  ;;  %v503_v53 = vadd.f32 %v1464_v1, %v371_v44  ;;  %v374_v54 = vmul.f32 %v1453_v0, %v242_v40  ;;  %v256_v44 = vld [vmem:[%s1459_s20 + $0x290] sm:$0xff] }
  0x49   : > { %v630_v56 = vmax.f32 %v502_v47, 0.0  ;;  %v504_v57 = vadd.f32 %v1464_v1, %v372_v48  ;;  %v505_v58 = vadd.f32 %v1464_v1, %v373_v49  ;;  %v375_v59 = vmul.f32 %v1453_v0, %v243_v45  ;;  %v257_v45 = vld [vmem:[%s1459_s20 + $0x298] sm:$0xff] }
  0x4a   : > { %1366 = vst [vmem:[%s1496_s26 + $0xf0] sm:$0xff] %v1170_v51   ;;  %v1175_v61 = vpack.c.bf16 %v629_v52, %v628_v46  ;;  %v631_v62 = vmax.f32 %v503_v53, 0.0  ;;  %v506_v63 = vadd.f32 %v1464_v1, %v374_v54  ;;  %v376_v2 = vmul.f32 %v1453_v0, %v244_v50  ;;  %v258_v50 = vld [vmem:[%s1459_s20 + $0x2a0] sm:$0xff] }
  0x4b   : > { %v632_v4 = vmax.f32 %v504_v57, 0.0  ;;  %v633_v5 = vmax.f32 %v505_v58, 0.0  ;;  %v507_v6 = vadd.f32 %v1464_v1, %v375_v59  ;;  %v377_v7 = vmul.f32 %v1453_v0, %v245_v55  ;;  %v259_v55 = vld [vmem:[%s1459_s20 + $0x2a8] sm:$0xff] }
  0x4c   : > { %1367 = vst [vmem:[%s1496_s26 + $0xf8] sm:$0xff] %v1175_v61   ;;  %v1180_v10 = vpack.c.bf16 %v631_v62, %v630_v56  ;;  %v634_v11 = vmax.f32 %v506_v63, 0.0  ;;  %v508_v12 = vadd.f32 %v1464_v1, %v376_v2  ;;  %v378_v13 = vmul.f32 %v1453_v0, %v246_v60  ;;  %v260_v60 = vld [vmem:[%s1459_s20 + $0x2b0] sm:$0xff] }
  0x4d   : > { %v1185_v15 = vpack.c.bf16 %v633_v5, %v632_v4  ;;  %v635_v16 = vmax.f32 %v507_v6, 0.0  ;;  %v509_v17 = vadd.f32 %v1464_v1, %v377_v7  ;;  %v379_v18 = vmul.f32 %v1453_v0, %v247_v3  ;;  %v261_v3 = vld [vmem:[%s1459_s20 + $0x2b8] sm:$0xff] }
  0x4e   : > { %1368 = vst [vmem:[%s1496_s26 + $0x100] sm:$0xff] %v1180_v10   ;;  %v636_v20 = vmax.f32 %v508_v12, 0.0  ;;  %v510_v21 = vadd.f32 %v1464_v1, %v378_v13  ;;  %v380_v22 = vmul.f32 %v1453_v0, %v248_v8  ;;  %v381_v23 = vmul.f32 %v1453_v0, %v249_v9  ;;  %v262_v8 = vld [vmem:[%s1459_s20 + $0x2c0] sm:$0xff]  ;;  %v263_v13 = vld [vmem:[%s1459_s20 + $0x2c8] sm:$0xff] }
  0x4f   : > { %1369 = vst [vmem:[%s1496_s26 + $0x108] sm:$0xff] %v1185_v15   ;;  %v1190_v25 = vpack.c.bf16 %v635_v16, %v634_v11  ;;  %v637_v26 = vmax.f32 %v509_v17, 0.0  ;;  %v511_v27 = vadd.f32 %v1464_v1, %v379_v18  ;;  %v382_v28 = vmul.f32 %v1453_v0, %v250_v14  ;;  %v264_v18 = vld [vmem:[%s1459_s20 + $0x2d0] sm:$0xff] }
  0x50   : > { %v638_v30 = vmax.f32 %v510_v21, 0.0  ;;  %v512_v31 = vadd.f32 %v1464_v1, %v380_v22  ;;  %v513_v32 = vadd.f32 %v1464_v1, %v381_v23  ;;  %v383_v33 = vmul.f32 %v1453_v0, %v251_v19  ;;  %v265_v19 = vld [vmem:[%s1459_s20 + $0x2d8] sm:$0xff] }
  0x51   : > { %1370 = vst [vmem:[%s1496_s26 + $0x110] sm:$0xff] %v1190_v25   ;;  %v1195_v35 = vpack.c.bf16 %v637_v26, %v636_v20  ;;  %v639_v36 = vmax.f32 %v511_v27, 0.0  ;;  %v514_v37 = vadd.f32 %v1464_v1, %v382_v28  ;;  %v384_v38 = vmul.f32 %v1453_v0, %v252_v24  ;;  %v266_v24 = vld [vmem:[%s1459_s20 + $0x2e0] sm:$0xff] }
  0x52   : > { %v640_v40 = vmax.f32 %v512_v31, 0.0  ;;  %v641_v41 = vmax.f32 %v513_v32, 0.0  ;;  %v515_v42 = vadd.f32 %v1464_v1, %v383_v33  ;;  %v385_v43 = vmul.f32 %v1453_v0, %v253_v29  ;;  %v267_v29 = vld [vmem:[%s1459_s20 + $0x2e8] sm:$0xff] }
  0x53   : > { %1371 = vst [vmem:[%s1496_s26 + $0x118] sm:$0xff] %v1195_v35   ;;  %v1200_v46 = vpack.c.bf16 %v639_v36, %v638_v30  ;;  %v642_v47 = vmax.f32 %v514_v37, 0.0  ;;  %v516_v48 = vadd.f32 %v1464_v1, %v384_v38  ;;  %v386_v49 = vmul.f32 %v1453_v0, %v254_v34  ;;  %v268_v34 = vld [vmem:[%s1459_s20 + $0x2f0] sm:$0xff] }
  0x54   : > { %v1205_v51 = vpack.c.bf16 %v641_v41, %v640_v40  ;;  %v643_v52 = vmax.f32 %v515_v42, 0.0  ;;  %v517_v53 = vadd.f32 %v1464_v1, %v385_v43  ;;  %v387_v54 = vmul.f32 %v1453_v0, %v255_v39  ;;  %v269_v39 = vld [vmem:[%s1459_s20 + $0x2f8] sm:$0xff] }
  0x55   : > { %1372 = vst [vmem:[%s1496_s26 + $0x120] sm:$0xff] %v1200_v46   ;;  %v644_v56 = vmax.f32 %v516_v48, 0.0  ;;  %v518_v57 = vadd.f32 %v1464_v1, %v386_v49  ;;  %v388_v58 = vmul.f32 %v1453_v0, %v256_v44  ;;  %v389_v59 = vmul.f32 %v1453_v0, %v257_v45  ;;  %v270_v44 = vld [vmem:[%s1459_s20 + $0x300] sm:$0xff]  ;;  %v271_v49 = vld [vmem:[%s1459_s20 + $0x308] sm:$0xff] }
  0x56   : > { %1373 = vst [vmem:[%s1496_s26 + $0x128] sm:$0xff] %v1205_v51   ;;  %v1210_v61 = vpack.c.bf16 %v643_v52, %v642_v47  ;;  %v645_v62 = vmax.f32 %v517_v53, 0.0  ;;  %v519_v63 = vadd.f32 %v1464_v1, %v387_v54  ;;  %v390_v2 = vmul.f32 %v1453_v0, %v258_v50  ;;  %v272_v54 = vld [vmem:[%s1459_s20 + $0x310] sm:$0xff] }
  0x57   : > { %v646_v4 = vmax.f32 %v518_v57, 0.0  ;;  %v520_v5 = vadd.f32 %v1464_v1, %v388_v58  ;;  %v521_v6 = vadd.f32 %v1464_v1, %v389_v59  ;;  %v391_v7 = vmul.f32 %v1453_v0, %v259_v55  ;;  %v273_v55 = vld [vmem:[%s1459_s20 + $0x318] sm:$0xff] }
  0x58   : > { %1374 = vst [vmem:[%s1496_s26 + $0x130] sm:$0xff] %v1210_v61   ;;  %v1215_v9 = vpack.c.bf16 %v645_v62, %v644_v56  ;;  %v647_v10 = vmax.f32 %v519_v63, 0.0  ;;  %v522_v11 = vadd.f32 %v1464_v1, %v390_v2  ;;  %v392_v12 = vmul.f32 %v1453_v0, %v260_v60  ;;  %v274_v60 = vld [vmem:[%s1459_s20 + $0x320] sm:$0xff] }
  0x59   : > { %v648_v14 = vmax.f32 %v520_v5, 0.0  ;;  %v649_v15 = vmax.f32 %v521_v6, 0.0  ;;  %v523_v16 = vadd.f32 %v1464_v1, %v391_v7  ;;  %v393_v17 = vmul.f32 %v1453_v0, %v261_v3  ;;  %v275_v3 = vld [vmem:[%s1459_s20 + $0x328] sm:$0xff] }
  0x5a   : > { %1375 = vst [vmem:[%s1496_s26 + $0x138] sm:$0xff] %v1215_v9   ;;  %v1220_v20 = vpack.c.bf16 %v647_v10, %v646_v4  ;;  %v650_v21 = vmax.f32 %v522_v11, 0.0  ;;  %v524_v22 = vadd.f32 %v1464_v1, %v392_v12  ;;  %v394_v23 = vmul.f32 %v1453_v0, %v262_v8  ;;  %v276_v8 = vld [vmem:[%s1459_s20 + $0x330] sm:$0xff] }
  0x5b   : > { %v1225_v25 = vpack.c.bf16 %v649_v15, %v648_v14  ;;  %v651_v26 = vmax.f32 %v523_v16, 0.0  ;;  %v525_v27 = vadd.f32 %v1464_v1, %v393_v17  ;;  %v395_v28 = vmul.f32 %v1453_v0, %v263_v13  ;;  %v277_v13 = vld [vmem:[%s1459_s20 + $0x338] sm:$0xff] }
  0x5c   : > { %1376 = vst [vmem:[%s1496_s26 + $0x140] sm:$0xff] %v1220_v20   ;;  %v652_v30 = vmax.f32 %v524_v22, 0.0  ;;  %v526_v31 = vadd.f32 %v1464_v1, %v394_v23  ;;  %v396_v32 = vmul.f32 %v1453_v0, %v264_v18  ;;  %v397_v33 = vmul.f32 %v1453_v0, %v265_v19  ;;  %v278_v18 = vld [vmem:[%s1459_s20 + $0x340] sm:$0xff]  ;;  %v279_v23 = vld [vmem:[%s1459_s20 + $0x348] sm:$0xff] }
  0x5d   : > { %1377 = vst [vmem:[%s1496_s26 + $0x148] sm:$0xff] %v1225_v25   ;;  %v1230_v35 = vpack.c.bf16 %v651_v26, %v650_v21  ;;  %v653_v36 = vmax.f32 %v525_v27, 0.0  ;;  %v527_v37 = vadd.f32 %v1464_v1, %v395_v28  ;;  %v398_v38 = vmul.f32 %v1453_v0, %v266_v24  ;;  %v1833_v27 = vld [vmem:[%s1934_s1] ss:$0 sm:$0xff] }
  0x5e   : > { %v654_v40 = vmax.f32 %v526_v31, 0.0  ;;  %v528_v41 = vadd.f32 %v1464_v1, %v396_v32  ;;  %v529_v42 = vadd.f32 %v1464_v1, %v397_v33  ;;  %v399_v43 = vmul.f32 %v1453_v0, %v267_v29  ;;  %v280_v29 = vld [vmem:[%s1459_s20 + $0x350] sm:$0xff] }
  0x5f   : > { %1378 = vst [vmem:[%s1496_s26 + $0x150] sm:$0xff] %v1230_v35   ;;  %v1235_v45 = vpack.c.bf16 %v653_v36, %v652_v30  ;;  %v655_v46 = vmax.f32 %v527_v37, 0.0  ;;  %v530_v47 = vadd.f32 %v1464_v1, %v398_v38  ;;  %v400_v48 = vmul.f32 %v1453_v0, %v268_v34  ;;  %v281_v30 = vld [vmem:[%s1459_s20 + $0x358] sm:$0xff]  ;;  %v282_v34 = vld [vmem:[%s1459_s20 + $0x360] sm:$0xff] }
  0x60   : > { %v656_v50 = vmax.f32 %v528_v41, 0.0  ;;  %v657_v51 = vmax.f32 %v529_v42, 0.0  ;;  %v531_v52 = vadd.f32 %v1464_v1, %v399_v43  ;;  %v401_v53 = vmul.f32 %v1453_v0, %v269_v39  ;;  %v283_v39 = vld [vmem:[%s1459_s20 + $0x368] sm:$0xff] }
  0x61   : > { %1379 = vst [vmem:[%s1496_s26 + $0x158] sm:$0xff] %v1235_v45   ;;  %v1240_v56 = vpack.c.bf16 %v655_v46, %v654_v40  ;;  %v658_v57 = vmax.f32 %v530_v47, 0.0  ;;  %v532_v58 = vadd.f32 %v1464_v1, %v400_v48  ;;  %v402_v59 = vmul.f32 %v1453_v0, %v270_v44  ;;  %v284_v44 = vld [vmem:[%s1459_s20 + $0x370] sm:$0xff] }
  0x62   : > { %v1245_v61 = vpack.c.bf16 %v657_v51, %v656_v50  ;;  %v659_v62 = vmax.f32 %v531_v52, 0.0  ;;  %v533_v63 = vadd.f32 %v1464_v1, %v401_v53  ;;  %v403_v2 = vmul.f32 %v1453_v0, %v271_v49  ;;  %v285_v49 = vld [vmem:[%s1459_s20 + $0x378] sm:$0xff] }
  0x63   : > { %1380 = vst [vmem:[%s1496_s26 + $0x160] sm:$0xff] %v1240_v56   ;;  %v660_v4 = vmax.f32 %v532_v58, 0.0  ;;  %v534_v5 = vadd.f32 %v1464_v1, %v402_v59  ;;  %v404_v6 = vmul.f32 %v1453_v0, %v272_v54  ;;  %v405_v7 = vmul.f32 %v1453_v0, %v273_v55  ;;  %v286_v54 = vld [vmem:[%s1459_s20 + $0x380] sm:$0xff]  ;;  %v287_v59 = vld [vmem:[%s1459_s20 + $0x388] sm:$0xff] }
  0x64   : > { %1381 = vst [vmem:[%s1496_s26 + $0x168] sm:$0xff] %v1245_v61   ;;  %v1250_v9 = vpack.c.bf16 %v659_v62, %v658_v57  ;;  %v661_v10 = vmax.f32 %v533_v63, 0.0  ;;  %v535_v11 = vadd.f32 %v1464_v1, %v403_v2  ;;  %v406_v12 = vmul.f32 %v1453_v0, %v274_v60  ;;  %v288_v2 = vld [vmem:[%s1459_s20 + $0x390] sm:$0xff] }
  0x65   : > { %v662_v14 = vmax.f32 %v534_v5, 0.0  ;;  %v536_v15 = vadd.f32 %v1464_v1, %v404_v6  ;;  %v537_v16 = vadd.f32 %v1464_v1, %v405_v7  ;;  %v407_v17 = vmul.f32 %v1453_v0, %v275_v3  ;;  %v289_v3 = vld [vmem:[%s1459_s20 + $0x398] sm:$0xff] }
  0x66   : > { %1382 = vst [vmem:[%s1496_s26 + $0x170] sm:$0xff] %v1250_v9   ;;  %v1255_v19 = vpack.c.bf16 %v661_v10, %v660_v4  ;;  %v663_v20 = vmax.f32 %v535_v11, 0.0  ;;  %v538_v21 = vadd.f32 %v1464_v1, %v406_v12  ;;  %v408_v22 = vmul.f32 %v1453_v0, %v276_v8  ;;  %v290_v8 = vld [vmem:[%s1459_s20 + $0x3a0] sm:$0xff] }
  0x67   : > { %v664_v24 = vmax.f32 %v536_v15, 0.0  ;;  %v665_v25 = vmax.f32 %v537_v16, 0.0  ;;  %v539_v26 = vadd.f32 %v1464_v1, %v407_v17  ;;  %v409_v28 = vmul.f32 %v1833_v27, %v277_v13  ;;  %v1842_v1 = vld [vmem:[%s1935_s2] ss:$0 sm:$0xff]  ;;  %v291_v13 = vld [vmem:[%s1459_s20 + $0x3a8] sm:$0xff] }
  0x68   : > { %1383 = vst [vmem:[%s1496_s26 + $0x178] sm:$0xff] %v1255_v19   ;;  %v1260_v31 = vpack.c.bf16 %v663_v20, %v662_v14  ;;  %v666_v0 = vmax.f32 %v538_v21, 0.0  ;;  %v540_v32 = vadd.f32 %v1842_v1, %v408_v22  ;;  %v410_v33 = vmul.f32 %v1833_v27, %v278_v18  ;;  %v292_v18 = vld [vmem:[%s1459_s20 + $0x3b0] sm:$0xff] }
  0x69   : > { %v1265_v35 = vpack.c.bf16 %v665_v25, %v664_v24  ;;  %v667_v36 = vmax.f32 %v539_v26, 0.0  ;;  %v541_v37 = vadd.f32 %v1842_v1, %v409_v28  ;;  %v411_v38 = vmul.f32 %v1833_v27, %v279_v23  ;;  %v293_v23 = vld [vmem:[%s1459_s20 + $0x3b8] sm:$0xff] }
  0x6a   : > { %1384 = vst [vmem:[%s1496_s26 + $0x180] sm:$0xff] %v1260_v31   ;;  %v668_v40 = vmax.f32 %v540_v32, 0.0  ;;  %v542_v41 = vadd.f32 %v1842_v1, %v410_v33  ;;  %v412_v42 = vmul.f32 %v1833_v27, %v280_v29  ;;  %v413_v43 = vmul.f32 %v1833_v27, %v281_v30  ;;  %v294_v29 = vld [vmem:[%s1459_s20 + $0x3c0] sm:$0xff]  ;;  %v295_v33 = vld [vmem:[%s1459_s20 + $0x3c8] sm:$0xff] }
  0x6b   : > { %1385 = vst [vmem:[%s1496_s26 + $0x188] sm:$0xff] %v1265_v35   ;;  %v1270_v45 = vpack.c.bf16 %v667_v36, %v666_v0  ;;  %v669_v46 = vmax.f32 %v541_v37, 0.0  ;;  %v543_v47 = vadd.f32 %v1842_v1, %v411_v38  ;;  %v414_v48 = vmul.f32 %v1833_v27, %v282_v34  ;;  %v296_v38 = vld [vmem:[%s1459_s20 + $0x3d0] sm:$0xff] }
  0x6c   : > { %v670_v50 = vmax.f32 %v542_v41, 0.0  ;;  %v544_v51 = vadd.f32 %v1842_v1, %v412_v42  ;;  %v545_v52 = vadd.f32 %v1842_v1, %v413_v43  ;;  %v415_v53 = vmul.f32 %v1833_v27, %v283_v39  ;;  %v297_v39 = vld [vmem:[%s1459_s20 + $0x3d8] sm:$0xff] }
  0x6d   : > { %1386 = vst [vmem:[%s1496_s26 + $0x190] sm:$0xff] %v1270_v45   ;;  %v1275_v55 = vpack.c.bf16 %v669_v46, %v668_v40  ;;  %v671_v56 = vmax.f32 %v543_v47, 0.0  ;;  %v546_v57 = vadd.f32 %v1842_v1, %v414_v48  ;;  %v416_v58 = vmul.f32 %v1833_v27, %v284_v44  ;;  %v298_v44 = vld [vmem:[%s1459_s20 + $0x3e0] sm:$0xff] }
  0x6e   : > { %v672_v60 = vmax.f32 %v544_v51, 0.0  ;;  %v673_v61 = vmax.f32 %v545_v52, 0.0  ;;  %v547_v62 = vadd.f32 %v1842_v1, %v415_v53  ;;  %v417_v63 = vmul.f32 %v1833_v27, %v285_v49  ;;  %v299_v49 = vld [vmem:[%s1459_s20 + $0x3e8] sm:$0xff] }
  0x6f   : > { %1387 = vst [vmem:[%s1496_s26 + $0x198] sm:$0xff] %v1275_v55   ;;  %v1280_v4 = vpack.c.bf16 %v671_v56, %v670_v50  ;;  %v674_v5 = vmax.f32 %v546_v57, 0.0  ;;  %v548_v6 = vadd.f32 %v1842_v1, %v416_v58  ;;  %v418_v7 = vmul.f32 %v1833_v27, %v286_v54  ;;  %v300_v54 = vld [vmem:[%s1459_s20 + $0x3f0] sm:$0xff] }
  0x70   : > { %v1285_v9 = vpack.c.bf16 %v673_v61, %v672_v60  ;;  %v675_v10 = vmax.f32 %v547_v62, 0.0  ;;  %v549_v11 = vadd.f32 %v1842_v1, %v417_v63  ;;  %v419_v12 = vmul.f32 %v1833_v27, %v287_v59  ;;  %v301_v59 = vld [vmem:[%s1459_s20 + $0x3f8] sm:$0xff] }
  0x71   : > { %1388 = vst [vmem:[%s1496_s26 + $0x1a0] sm:$0xff] %v1280_v4   ;;  %v676_v14 = vmax.f32 %v548_v6, 0.0  ;;  %v550_v15 = vadd.f32 %v1842_v1, %v418_v7  ;;  %v420_v16 = vmul.f32 %v1833_v27, %v288_v2  ;;  %v421_v17 = vmul.f32 %v1833_v27, %v289_v3 }
  0x72   : > { %1389 = vst [vmem:[%s1496_s26 + $0x1a8] sm:$0xff] %v1285_v9   ;;  %v1290_v19 = vpack.c.bf16 %v675_v10, %v674_v5  ;;  %v677_v20 = vmax.f32 %v549_v11, 0.0  ;;  %v551_v21 = vadd.f32 %v1842_v1, %v419_v12  ;;  %v422_v22 = vmul.f32 %v1833_v27, %v290_v8 }
  0x73   : > { %v678_v24 = vmax.f32 %v550_v15, 0.0  ;;  %v552_v25 = vadd.f32 %v1842_v1, %v420_v16  ;;  %v553_v26 = vadd.f32 %v1842_v1, %v421_v17  ;;  %v423_v28 = vmul.f32 %v1833_v27, %v291_v13 }
  0x74   : > { %1390 = vst [vmem:[%s1496_s26 + $0x1b0] sm:$0xff] %v1290_v19   ;;  %v1295_v30 = vpack.c.bf16 %v677_v20, %v676_v14  ;;  %v679_v31 = vmax.f32 %v551_v21, 0.0  ;;  %v554_v0 = vadd.f32 %v1842_v1, %v422_v22  ;;  %v424_v32 = vmul.f32 %v1833_v27, %v292_v18 }
  0x75   : > { %v680_v34 = vmax.f32 %v552_v25, 0.0  ;;  %v681_v35 = vmax.f32 %v553_v26, 0.0  ;;  %v555_v36 = vadd.f32 %v1842_v1, %v423_v28  ;;  %v425_v37 = vmul.f32 %v1833_v27, %v293_v23 }
  0x76   : > { %1391 = vst [vmem:[%s1496_s26 + $0x1b8] sm:$0xff] %v1295_v30   ;;  %v1300_v40 = vpack.c.bf16 %v679_v31, %v678_v24  ;;  %v682_v41 = vmax.f32 %v554_v0, 0.0  ;;  %v556_v42 = vadd.f32 %v1842_v1, %v424_v32  ;;  %v426_v43 = vmul.f32 %v1833_v27, %v294_v29 }
  0x77   : > { %v1305_v45 = vpack.c.bf16 %v681_v35, %v680_v34  ;;  %v683_v46 = vmax.f32 %v555_v36, 0.0  ;;  %v557_v47 = vadd.f32 %v1842_v1, %v425_v37  ;;  %v427_v48 = vmul.f32 %v1833_v27, %v295_v33 }
  0x78   : > { %1392 = vst [vmem:[%s1496_s26 + $0x1c0] sm:$0xff] %v1300_v40   ;;  %v684_v50 = vmax.f32 %v556_v42, 0.0  ;;  %v558_v51 = vadd.f32 %v1842_v1, %v426_v43  ;;  %v428_v52 = vmul.f32 %v1833_v27, %v296_v38  ;;  %v429_v53 = vmul.f32 %v1833_v27, %v297_v39 }
  0x79   : > { %1393 = vst [vmem:[%s1496_s26 + $0x1c8] sm:$0xff] %v1305_v45   ;;  %v1310_v55 = vpack.c.bf16 %v683_v46, %v682_v41  ;;  %v685_v56 = vmax.f32 %v557_v47, 0.0  ;;  %v559_v57 = vadd.f32 %v1842_v1, %v427_v48  ;;  %v430_v58 = vmul.f32 %v1833_v27, %v298_v44 }
  0x7a   : > { %v686_v60 = vmax.f32 %v558_v51, 0.0  ;;  %v560_v61 = vadd.f32 %v1842_v1, %v428_v52  ;;  %v561_v62 = vadd.f32 %v1842_v1, %v429_v53  ;;  %v431_v63 = vmul.f32 %v1833_v27, %v299_v49 }
  0x7b   : > { %1394 = vst [vmem:[%s1496_s26 + $0x1d0] sm:$0xff] %v1310_v55   ;;  %v1315_v2 = vpack.c.bf16 %v685_v56, %v684_v50  ;;  %v687_v3 = vmax.f32 %v559_v57, 0.0  ;;  %v562_v4 = vadd.f32 %v1842_v1, %v430_v58  ;;  %v432_v5 = vmul.f32 %v1833_v27, %v300_v54 }
  0x7c   : > { %v688_v6 = vmax.f32 %v560_v61, 0.0  ;;  %v689_v7 = vmax.f32 %v561_v62, 0.0  ;;  %v563_v8 = vadd.f32 %v1842_v1, %v431_v63  ;;  %v433_v9 = vmul.f32 %v1833_v27, %v301_v59 }
  0x7d   : > { %1395 = vst [vmem:[%s1496_s26 + $0x1d8] sm:$0xff] %v1315_v2   ;;  %v1320_v10 = vpack.c.bf16 %v687_v3, %v686_v60  ;;  %v690_v11 = vmax.f32 %v562_v4, 0.0  ;;  %v564_v12 = vadd.f32 %v1842_v1, %v432_v5 }
  0x7e   : > { %v1325_v13 = vpack.c.bf16 %v689_v7, %v688_v6  ;;  %v691_v14 = vmax.f32 %v563_v8, 0.0  ;;  %v565_v15 = vadd.f32 %v1842_v1, %v433_v9 }
  0x7f   : > { %1396 = vst [vmem:[%s1496_s26 + $0x1e0] sm:$0xff] %v1320_v10   ;;  %v692_v16 = vmax.f32 %v564_v12, 0.0 }
  0x80   : > { %1397 = vst [vmem:[%s1496_s26 + $0x1e8] sm:$0xff] %v1325_v13   ;;  %v1330_v17 = vpack.c.bf16 %v691_v14, %v690_v11  ;;  %v693_v18 = vmax.f32 %v565_v15, 0.0 }
  0x82   : > { %1398 = vst [vmem:[%s1496_s26 + $0x1f0] sm:$0xff] %v1330_v17   ;;  %v1335_v19 = vpack.c.bf16 %v693_v18, %v692_v16 }
  0x84   : > { %1399 = vst [vmem:[%s1496_s26 + $0x1f8] sm:$0xff] %v1335_v19  }
  0x85 PF: > { %s13_s12 = sadd.s32 1, %s1418_s12  }
  0x86   : > { %p10_p4 = scmp.ge.s32.totalorder %s13_s12, 4  }
  0x88   :  { %12 = sbr.rel (!%p10_p4) target bundleno = 1 (0x1), region = 62 }

// kernel: generator_forward.15
= control target key start
LH: loop header
LB: loop body
LE: loop exit
PB: predicated region body
PF: predicated region fallthrough
CT: control target
= control target key end

     0   :  { %s1483_s15 = smov 0   ;;  %s1485_s16 = smov 0   ;;  %s1957_s0 = inlined_call_operand.vmem [shape: bf16[4,512,64], index: 0, kind: input, shape index: {}]   ;;  %s1958_s1 = inlined_call_operand.vmem [shape: bf16[4,64,128], index: 1, kind: input, shape index: {}]   ;;  %s1959_s2 = inlined_call_operand.vmem [shape: f32[4,512,128], index: 2, kind: output, shape index: {0}]   ;;  %s1960_s3 = inlined_call_operand.vmem [shape: f32[1,128], index: 3, kind: output, shape index: {1}]   ;;  %s1961_s4 = inlined_call_operand.vmem [shape: f32[1,128], index: 4, kind: output, shape index: {2}]  }
   0x1   :  { %s1487_s17 = smov 0  }
   0x2 LB: > { %s27_s18 = sadd.s32 1, %s1451_s16  ;;  %p1170_p0 = scmp.ge.s32.totalorder %s1455_s17, 1  ;;  %s1455_s17 = sphi %s1487_s17, %s15_s17   ;;  %s1451_s16 = sphi %s1485_s16, %s1963_s16   ;;  %s1447_s15 = sphi %s1483_s15, %s1962_s15  }
   0x3   : > { %p29_p1 = scmp.ge.s32.totalorder %s27_s18, 4  ;;  %p188_p2 = scmp.lt.s32.totalorder %s1455_s17, 5 }
   0x5   : > { %s1965_s18 = smov (%p29_p1, %s27_s18), 0  ;;  %p189_p3 = pnand %p1170_p0, %p188_p2 }
   0x6   : > { %p228_p4 = scmp.lt.s32.totalorder (!%p189_p3), %s1447_s15, 3  ;;  %p253_p5 = scmp.eq.s32.totalorder (!%p189_p3), %s1447_s15, 0 }
   0x7   : > { %192 = sbr.rel (%p189_p3) target bundleno = 394 (0x18a), region = 28 }
   0xc   : > { %s1967_s15 = smov (!%p228_p4, %s1447_s15), 3  ;;  %258 = sbr.rel (!%p253_p5) target bundleno = 17 (0x11), region = 32  ;;  %v1457_v0 = vmov (%p253_p5), 0.0  }
   0xd   : > { %s1356_s19 = sshll.u32 %s1967_s15, 8  ;;  %s1357_s20 = sshll.u32 %s1967_s15, 5  ;;  %259 = vst [vmem:[%s1960_s3] sm:$0x1] (%p253_p5), %v1457_v0 }
   0xe   : > { %s1504_s23 = scalar_lea.vmem %s1957_s0, %s1356_s19  ;;  %s241_s26 = scalar_lea.vmem %s1958_s1, %s1357_s20  ;;  %260 = vst [vmem:[%s1961_s4] sm:$0x1] (%p253_p5), %v1457_v0 }
   0xf   : > { %s1358_s27 = sshll.u32 %s1967_s15, 9 }
  0x10   : > { %s1512_s30 = scalar_lea.vmem %s1959_s2, %s1358_s27 }
  0x11 PF: > { %v1395_v1 = vld [vmem:[%s241_s26 + $0x18] sm:$0xff]  ;;  %v1394_v2 = vld [vmem:[%s241_s26 + $0x10] sm:$0xff]  ;;  %v1393_v3 = vld [vmem:[%s241_s26 + $0x8] sm:$0xff]  ;;  %vm517_vm0 = vcmask 523264  }
  0x12   : > { %618 = vmatpush.bf16.msra.mxu0 %v1395_v1  ;;  %1396 = vmatpush.bf16.msra.mxu1 %v1395_v1  ;;  %v1392_v4 = vld [vmem:[%s241_s26] sm:$0xff]  ;;  %v1361_v7 = vld [vmem:[%s1504_s23 + $0x8] sm:$0xff]  ;;  %v1362_v10 = vld [vmem:[%s1504_s23 + $0x10] sm:$0xff] }
  0x13   : > { %1397 = vmatpush.bf16.msra.mxu2 %v1395_v1  ;;  %1398 = vmatpush.bf16.msra.mxu3 %v1395_v1  ;;  %v1360_v5 = vld [vmem:[%s1504_s23] sm:$0xff]  ;;  %v1369_v8 = vld [vmem:[%s1504_s23 + $0x48] sm:$0xff]  ;;  %v1370_v11 = vld [vmem:[%s1504_s23 + $0x50] sm:$0xff] }
  0x14   : > { %v1368_v6 = vld [vmem:[%s1504_s23 + $0x40] sm:$0xff]  ;;  %v1377_v12 = vld [vmem:[%s1504_s23 + $0x88] sm:$0xff]  ;;  %v1363_v13 = vld [vmem:[%s1504_s23 + $0x18] sm:$0xff] }
  0x15   : > { %v1376_v9 = vld [vmem:[%s1504_s23 + $0x80] sm:$0xff]  ;;  %v1371_v14 = vld [vmem:[%s1504_s23 + $0x58] sm:$0xff]  ;;  %v1378_v15 = vld [vmem:[%s1504_s23 + $0x90] sm:$0xff] }
  0x16   : > { %619 = vmatpush.bf16.msra.mxu0 %v1394_v2  ;;  %1399 = vmatpush.bf16.msra.mxu1 %v1394_v2  ;;  %v1384_v16 = vld [vmem:[%s1504_s23 + $0xc0] sm:$0xff]  ;;  %v1379_v19 = vld [vmem:[%s1504_s23 + $0x98] sm:$0xff]  ;;  %v1385_v20 = vld [vmem:[%s1504_s23 + $0xc8] sm:$0xff] }
  0x17   : > { %1400 = vmatpush.bf16.msra.mxu2 %v1394_v2  ;;  %1401 = vmatpush.bf16.msra.mxu3 %v1394_v2  ;;  %v1364_v17 = vld [vmem:[%s1504_s23 + $0x20] sm:$0xff]  ;;  %v1365_v21 = vld [vmem:[%s1504_s23 + $0x28] sm:$0xff]  ;;  %v1386_v24 = vld [vmem:[%s1504_s23 + $0xd0] sm:$0xff] }
  0x18   : > { %v1372_v18 = vld [vmem:[%s1504_s23 + $0x60] sm:$0xff]  ;;  %v1373_v22 = vld [vmem:[%s1504_s23 + $0x68] sm:$0xff]  ;;  %v1366_v25 = vld [vmem:[%s1504_s23 + $0x30] sm:$0xff] }
  0x19   : > { %v1380_v23 = vld [vmem:[%s1504_s23 + $0xa0] sm:$0xff]  ;;  %v1374_v26 = vld [vmem:[%s1504_s23 + $0x70] sm:$0xff]  ;;  %v1381_v27 = vld [vmem:[%s1504_s23 + $0xa8] sm:$0xff] }
  0x1a   : > { %620 = vmatpush.bf16.msra.mxu0 %v1393_v3  ;;  %1402 = vmatpush.bf16.msra.mxu1 %v1393_v3  ;;  %v1387_v28 = vld [vmem:[%s1504_s23 + $0xd8] sm:$0xff]  ;;  %v1382_v31 = vld [vmem:[%s1504_s23 + $0xb0] sm:$0xff]  ;;  %v1388_v32 = vld [vmem:[%s1504_s23 + $0xe0] sm:$0xff] }
  0x1b   : > { %1403 = vmatpush.bf16.msra.mxu2 %v1393_v3  ;;  %1404 = vmatpush.bf16.msra.mxu3 %v1393_v3  ;;  %v1367_v29 = vld [vmem:[%s1504_s23 + $0x38] sm:$0xff]  ;;  %v1389_v36 = vld [vmem:[%s1504_s23 + $0xe8] sm:$0xff]  ;;  %v1390_v48 = vld [vmem:[%s1504_s23 + $0xf0] sm:$0xff] }
  0x1c   : > { %v1375_v30 = vld [vmem:[%s1504_s23 + $0x78] sm:$0xff] }
  0x1d   : > { %v1383_v35 = vld [vmem:[%s1504_s23 + $0xb8] sm:$0xff] }
  0x1e   : > { %621 = vmatpush.bf16.msra.mxu0 %v1392_v4  ;;  %1405 = vmatpush.bf16.msra.mxu1 %v1392_v4  ;;  %v1391_v61 = vld [vmem:[%s1504_s23 + $0xf8] sm:$0xff] }
  0x1f   : > { %1406 = vmatpush.bf16.msra.mxu2 %v1392_v4  ;;  %1407 = vmatpush.bf16.msra.mxu3 %v1392_v4 }
  0x21   : > { %1322 = vmatmul.msk.bf16.vlgmr.msra.gmra.mxu0 %vm517_vm0, %v1360_v5  ;;  %1330 = vmatmul.msk.bf16.vlgmr.msra.gmra.mxu1 %vm517_vm0, %v1368_v6 }
  0x22   : > { %1338 = vmatmul.msk.bf16.vlgmr.msra.gmra.mxu2 %vm517_vm0, %v1376_v9  ;;  %1346 = vmatmul.msk.bf16.vlgmr.msra.gmra.mxu3 %vm517_vm0, %v1384_v16 }
  0x31   : > { %1323 = vmatmul.msk.bf16.gmra.mxu0 %vm517_vm0, %v1361_v7  ;;  %1331 = vmatmul.msk.bf16.gmra.mxu1 %vm517_vm0, %v1369_v8 }
  0x32   : > { %1339 = vmatmul.msk.bf16.gmra.mxu2 %vm517_vm0, %v1377_v12  ;;  %1347 = vmatmul.msk.bf16.gmra.mxu3 %vm517_vm0, %v1385_v20 }
  0x41   : > { %1324 = vmatmul.msk.bf16.gmra.mxu0 %vm517_vm0, %v1362_v10  ;;  %1332 = vmatmul.msk.bf16.gmra.mxu1 %vm517_vm0, %v1370_v11 }
  0x42   : > { %1340 = vmatmul.msk.bf16.gmra.mxu2 %vm517_vm0, %v1378_v15  ;;  %1348 = vmatmul.msk.bf16.gmra.mxu3 %vm517_vm0, %v1386_v24 }
  0x51   : > { %1325 = vmatmul.msk.bf16.gmra.mxu0 %vm517_vm0, %v1363_v13  ;;  %1333 = vmatmul.msk.bf16.gmra.mxu1 %vm517_vm0, %v1371_v14 }
  0x52   : > { %1341 = vmatmul.msk.bf16.gmra.mxu2 %vm517_vm0, %v1379_v19  ;;  %1349 = vmatmul.msk.bf16.gmra.mxu3 %vm517_vm0, %v1387_v28 }
  0x61   : > { %1326 = vmatmul.msk.bf16.gmra.mxu0 %vm517_vm0, %v1364_v17  ;;  %1334 = vmatmul.msk.bf16.gmra.mxu1 %vm517_vm0, %v1372_v18 }
  0x62   : > { %1342 = vmatmul.msk.bf16.gmra.mxu2 %vm517_vm0, %v1380_v23  ;;  %1350 = vmatmul.msk.bf16.gmra.mxu3 %vm517_vm0, %v1388_v32 }
  0x71   : > { %1327 = vmatmul.msk.bf16.gmra.mxu0 %vm517_vm0, %v1365_v21  ;;  %1335 = vmatmul.msk.bf16.gmra.mxu1 %vm517_vm0, %v1373_v22 }
  0x72   : > { %1343 = vmatmul.msk.bf16.gmra.mxu2 %vm517_vm0, %v1381_v27  ;;  %1351 = vmatmul.msk.bf16.gmra.mxu3 %vm517_vm0, %v1389_v36 }
  0x81   : > { %1328 = vmatmul.msk.bf16.gmra.mxu0 %vm517_vm0, %v1366_v25  ;;  %1336 = vmatmul.msk.bf16.gmra.mxu1 %vm517_vm0, %v1374_v26 }
  0x82   : > { %1344 = vmatmul.msk.bf16.gmra.mxu2 %vm517_vm0, %v1382_v31  ;;  %1352 = vmatmul.msk.bf16.gmra.mxu3 %vm517_vm0, %v1390_v48 }
  0x91   : > { %1329 = vmatmul.msk.bf16.gmra.mxu0 %vm517_vm0, %v1367_v29  ;;  %1337 = vmatmul.msk.bf16.gmra.mxu1 %vm517_vm0, %v1375_v30 }
  0x92   : > { %1345 = vmatmul.msk.bf16.gmra.mxu2 %vm517_vm0, %v1383_v35  ;;  %1353 = vmatmul.msk.bf16.gmra.mxu3 %vm517_vm0, %v1391_v61 }
  0x9e   : > { %v623_v33 = vpop.f32.mrf.mxu0  ;;  %v1576_v34 = vpop.f32.mrf.mxu1 }
  0x9f   : > { %783 = vst [vmem:[%s1512_s30] sm:$0xff] %v623_v33  ;;  %v920_v39 = vmul.f32 %v623_v33, %v623_v33 }
  0xa0   : > { %799 = vst [vmem:[%s1512_s30 + $0x80] sm:$0xff] %v1576_v34 }
  0xa5   : > { %v1600_v53 = vpop.f32.mrf.mxu2  ;;  %v1644_v7 = vpop.f32.mrf.mxu3 }
  0xa6   : > { %v625_v37 = vpop.f32.mrf.mxu0  ;;  %v1585_v38 = vpop.f32.mrf.mxu1  ;;  %815 = vst [vmem:[%s1512_s30 + $0x100] sm:$0xff] %v1600_v53 }
  0xa7   : > { %784 = vst [vmem:[%s1512_s30 + $0x8] sm:$0xff] %v625_v37  ;;  %v848_v40 = vadd.f32 %v625_v37, %v623_v33  ;;  %v921_v41 = vmul.f32 %v625_v37, %v625_v37 }
  0xa8   : > { %800 = vst [vmem:[%s1512_s30 + $0x88] sm:$0xff] %v1585_v38 }
  0xa9   : > { %v984_v42 = vadd.f32 %v921_v41, %v920_v39  ;;  %831 = vst [vmem:[%s1512_s30 + $0x180] sm:$0xff] %v1644_v7 }
  0xad   : > { %v1611_v59 = vpop.f32.mrf.mxu2  ;;  %v1657_v11 = vpop.f32.mrf.mxu3 }
  0xae   : > { %v628_v43 = vpop.f32.mrf.mxu0  ;;  %v1590_v44 = vpop.f32.mrf.mxu1  ;;  %816 = vst [vmem:[%s1512_s30 + $0x108] sm:$0xff] %v1611_v59 }
  0xaf   : > { %785 = vst [vmem:[%s1512_s30 + $0x10] sm:$0xff] %v628_v43  ;;  %v849_v45 = vadd.f32 %v848_v40, %v628_v43  ;;  %v922_v46 = vmul.f32 %v628_v43, %v628_v43 }
  0xb0   : > { %801 = vst [vmem:[%s1512_s30 + $0x90] sm:$0xff] %v1590_v44 }
  0xb1   : > { %v985_v47 = vadd.f32 %v984_v42, %v922_v46  ;;  %832 = vst [vmem:[%s1512_s30 + $0x188] sm:$0xff] %v1657_v11 }
  0xb5   : > { %v1624_v0 = vpop.f32.mrf.mxu2  ;;  %v1670_v15 = vpop.f32.mrf.mxu3 }
  0xb6   : > { %v630_v49 = vpop.f32.mrf.mxu0  ;;  %v1597_v50 = vpop.f32.mrf.mxu1  ;;  %817 = vst [vmem:[%s1512_s30 + $0x110] sm:$0xff] %v1624_v0 }
  0xb7   : > { %786 = vst [vmem:[%s1512_s30 + $0x18] sm:$0xff] %v630_v49  ;;  %v850_v51 = vadd.f32 %v849_v45, %v630_v49  ;;  %v923_v52 = vmul.f32 %v630_v49, %v630_v49 }
  0xb8   : > { %802 = vst [vmem:[%s1512_s30 + $0x98] sm:$0xff] %v1597_v50 }
  0xb9   : > { %v986_v54 = vadd.f32 %v985_v47, %v923_v52  ;;  %833 = vst [vmem:[%s1512_s30 + $0x190] sm:$0xff] %v1670_v15 }
  0xbd   : > { %v1633_v3 = vpop.f32.mrf.mxu2  ;;  %v1683_v19 = vpop.f32.mrf.mxu3 }
  0xbe   : > { %v633_v55 = vpop.f32.mrf.mxu0  ;;  %v1606_v56 = vpop.f32.mrf.mxu1  ;;  %818 = vst [vmem:[%s1512_s30 + $0x118] sm:$0xff] %v1633_v3 }
  0xbf   : > { %787 = vst [vmem:[%s1512_s30 + $0x20] sm:$0xff] %v633_v55  ;;  %v1609_v57 = vadd.f32 %v850_v51, %v633_v55  ;;  %v924_v58 = vmul.f32 %v633_v55, %v633_v55 }
  0xc0   : > { %803 = vst [vmem:[%s1512_s30 + $0xa0] sm:$0xff] %v1606_v56 }
  0xc1   : > { %v1615_v60 = vadd.f32 %v986_v54, %v924_v58  ;;  %834 = vst [vmem:[%s1512_s30 + $0x198] sm:$0xff] %v1683_v19 }
  0xc5   : > { %v1642_v6 = vpop.f32.mrf.mxu2  ;;  %v1696_v23 = vpop.f32.mrf.mxu3 }
  0xc6   : > { %v635_v62 = vpop.f32.mrf.mxu0  ;;  %v1621_v63 = vpop.f32.mrf.mxu1  ;;  %819 = vst [vmem:[%s1512_s30 + $0x120] sm:$0xff] %v1642_v6 }
  0xc7   : > { %788 = vst [vmem:[%s1512_s30 + $0x28] sm:$0xff] %v635_v62  ;;  %v925_v28 = vmul.f32 %v635_v62, %v635_v62  ;;  %v852_v29 = vadd.f32 %v1609_v57, %v635_v62 }
  0xc8   : > { %804 = vst [vmem:[%s1512_s30 + $0xa8] sm:$0xff] %v1621_v63 }
  0xc9   : > { %835 = vst [vmem:[%s1512_s30 + $0x1a0] sm:$0xff] %v1696_v23  ;;  %v988_v31 = vadd.f32 %v1615_v60, %v925_v28 }
  0xcd   : > { %v1655_v10 = vpop.f32.mrf.mxu2  ;;  %v1709_v27 = vpop.f32.mrf.mxu3 }
  0xce   : > { %v638_v1 = vpop.f32.mrf.mxu0  ;;  %v1630_v2 = vpop.f32.mrf.mxu1  ;;  %820 = vst [vmem:[%s1512_s30 + $0x128] sm:$0xff] %v1655_v10 }
  0xcf   : > { %789 = vst [vmem:[%s1512_s30 + $0x30] sm:$0xff] %v638_v1  ;;  %v926_v30 = vmul.f32 %v638_v1, %v638_v1  ;;  %v853_v32 = vadd.f32 %v852_v29, %v638_v1 }
  0xd0   : > { %805 = vst [vmem:[%s1512_s30 + $0xb0] sm:$0xff] %v1630_v2 }
  0xd1   : > { %836 = vst [vmem:[%s1512_s30 + $0x1a8] sm:$0xff] %v1709_v27  ;;  %v989_v37 = vadd.f32 %v988_v31, %v926_v30 }
  0xd5   : > { %v1668_v14 = vpop.f32.mrf.mxu2  ;;  %v1724_v42 = vpop.f32.mrf.mxu3 }
  0xd6   : > { %v640_v4 = vpop.f32.mrf.mxu0  ;;  %v1639_v5 = vpop.f32.mrf.mxu1  ;;  %821 = vst [vmem:[%s1512_s30 + $0x130] sm:$0xff] %v1668_v14 }
  0xd7   : > { %790 = vst [vmem:[%s1512_s30 + $0x38] sm:$0xff] %v640_v4  ;;  %v927_v33 = vmul.f32 %v640_v4, %v640_v4  ;;  %v854_v39 = vadd.f32 %v853_v32, %v640_v4 }
  0xd8   : > { %806 = vst [vmem:[%s1512_s30 + $0xb8] sm:$0xff] %v1639_v5 }
  0xd9   : > { %v990_v43 = vadd.f32 %v989_v37, %v927_v33  ;;  %837 = vst [vmem:[%s1512_s30 + $0x1b0] sm:$0xff] %v1724_v42 }
  0xdd   : > { %v1681_v18 = vpop.f32.mrf.mxu2  ;;  %v1737_v1 = vpop.f32.mrf.mxu3 }
  0xde   : > { %v643_v8 = vpop.f32.mrf.mxu0  ;;  %v1652_v9 = vpop.f32.mrf.mxu1  ;;  %822 = vst [vmem:[%s1512_s30 + $0x138] sm:$0xff] %v1681_v18 }
  0xdf   : > { %791 = vst [vmem:[%s1512_s30 + $0x40] sm:$0xff] %v643_v8  ;;  %v928_v40 = vmul.f32 %v643_v8, %v643_v8  ;;  %v855_v45 = vadd.f32 %v854_v39, %v643_v8 }
  0xe0   : > { %807 = vst [vmem:[%s1512_s30 + $0xc0] sm:$0xff] %v1652_v9 }
  0xe1   : > { %v991_v47 = vadd.f32 %v990_v43, %v928_v40  ;;  %838 = vst [vmem:[%s1512_s30 + $0x1b8] sm:$0xff] %v1737_v1 }
  0xe5   : > { %v1694_v22 = vpop.f32.mrf.mxu2  ;;  %v1750_v40 = vpop.f32.mrf.mxu3 }
  0xe6   : > { %v645_v12 = vpop.f32.mrf.mxu0  ;;  %v1665_v13 = vpop.f32.mrf.mxu1  ;;  %823 = vst [vmem:[%s1512_s30 + $0x140] sm:$0xff] %v1694_v22 }
  0xe7   : > { %792 = vst [vmem:[%s1512_s30 + $0x48] sm:$0xff] %v645_v12  ;;  %v929_v46 = vmul.f32 %v645_v12, %v645_v12  ;;  %v856_v48 = vadd.f32 %v855_v45, %v645_v12 }
  0xe8   : > { %808 = vst [vmem:[%s1512_s30 + $0xc8] sm:$0xff] %v1665_v13 }
  0xe9   : > { %v992_v51 = vadd.f32 %v991_v47, %v929_v46  ;;  %839 = vst [vmem:[%s1512_s30 + $0x1c0] sm:$0xff] %v1750_v40  ;;  %v937_v46 = vmul.f32 %v1585_v38, %v1585_v38 }
  0xed   : > { %v1707_v26 = vpop.f32.mrf.mxu2 }
  0xee   : > { %v648_v16 = vpop.f32.mrf.mxu0  ;;  %v1678_v17 = vpop.f32.mrf.mxu1  ;;  %824 = vst [vmem:[%s1512_s30 + $0x148] sm:$0xff] %v1707_v26 }
  0xef   : > { %793 = vst [vmem:[%s1512_s30 + $0x50] sm:$0xff] %v648_v16  ;;  %v930_v49 = vmul.f32 %v648_v16, %v648_v16  ;;  %v857_v52 = vadd.f32 %v856_v48, %v648_v16 }
  0xf0   : > { %809 = vst [vmem:[%s1512_s30 + $0xd0] sm:$0xff] %v1678_v17 }
  0xf1   : > { %v993_v58 = vadd.f32 %v992_v51, %v930_v49  ;;  %v938_v49 = vmul.f32 %v1590_v44, %v1590_v44 }
  0xf5   : > { %v1722_v41 = vpop.f32.mrf.mxu2 }
  0xf6   : > { %v650_v20 = vpop.f32.mrf.mxu0  ;;  %v1691_v21 = vpop.f32.mrf.mxu1  ;;  %825 = vst [vmem:[%s1512_s30 + $0x150] sm:$0xff] %v1722_v41 }
  0xf7   : > { %794 = vst [vmem:[%s1512_s30 + $0x58] sm:$0xff] %v650_v20  ;;  %v931_v54 = vmul.f32 %v650_v20, %v650_v20  ;;  %v858_v60 = vadd.f32 %v857_v52, %v650_v20 }
  0xf8   : > { %810 = vst [vmem:[%s1512_s30 + $0xd8] sm:$0xff] %v1691_v21 }
  0xf9   : > { %v994_v4 = vadd.f32 %v993_v58, %v931_v54 }
  0xfd   : > { %v1735_v62 = vpop.f32.mrf.mxu2 }
  0xfe   : > { %v653_v24 = vpop.f32.mrf.mxu0  ;;  %v1704_v25 = vpop.f32.mrf.mxu1  ;;  %826 = vst [vmem:[%s1512_s30 + $0x158] sm:$0xff] %v1735_v62 }
  0xff   : > { %795 = vst [vmem:[%s1512_s30 + $0x60] sm:$0xff] %v653_v24  ;;  %v932_v61 = vmul.f32 %v653_v24, %v653_v24  ;;  %v859_v8 = vadd.f32 %v858_v60, %v653_v24  ;;  %v1772_v60 = vpop.f32.mrf.mxu3 }
 0x100   : > { %811 = vst [vmem:[%s1512_s30 + $0xe0] sm:$0xff] %v1704_v25 }
 0x101   : > { %v995_v16 = vadd.f32 %v994_v4, %v932_v61  ;;  %840 = vst [vmem:[%s1512_s30 + $0x1c8] sm:$0xff] %v1772_v60 }
 0x105   : > { %v1748_v39 = vpop.f32.mrf.mxu2 }
 0x106   : > { %v655_v35 = vpop.f32.mrf.mxu0  ;;  %v1719_v36 = vpop.f32.mrf.mxu1  ;;  %827 = vst [vmem:[%s1512_s30 + $0x160] sm:$0xff] %v1748_v39 }
 0x107   : > { %796 = vst [vmem:[%s1512_s30 + $0x68] sm:$0xff] %v655_v35  ;;  %v933_v12 = vmul.f32 %v655_v35, %v655_v35  ;;  %v860_v28 = vadd.f32 %v859_v8, %v655_v35  ;;  %v936_v35 = vmul.f32 %v1576_v34, %v1576_v34 }
 0x108   : > { %812 = vst [vmem:[%s1512_s30 + $0xe8] sm:$0xff] %v1719_v36 }
 0x109   : > { %v996_v29 = vadd.f32 %v995_v16, %v933_v12  ;;  %v942_v12 = vmul.f32 %v1630_v2, %v1630_v2 }
 0x10d   : > { %v1770_v58 = vpop.f32.mrf.mxu2 }
 0x10e   : > { %v658_v55 = vpop.f32.mrf.mxu0  ;;  %v1732_v57 = vpop.f32.mrf.mxu1  ;;  %828 = vst [vmem:[%s1512_s30 + $0x168] sm:$0xff] %v1770_v58 }
 0x10f   : > { %797 = vst [vmem:[%s1512_s30 + $0x70] sm:$0xff] %v658_v55  ;;  %v934_v20 = vmul.f32 %v658_v55, %v658_v55  ;;  %v861_v30 = vadd.f32 %v860_v28, %v658_v55 }
 0x110   : > { %813 = vst [vmem:[%s1512_s30 + $0xf0] sm:$0xff] %v1732_v57 }
 0x111   : > { %v997_v33 = vadd.f32 %v996_v29, %v934_v20  ;;  %v943_v20 = vmul.f32 %v1639_v5, %v1639_v5 }
 0x116   : > { %v660_v31 = vpop.f32.mrf.mxu0  ;;  %v1745_v32 = vpop.f32.mrf.mxu1 }
 0x117   : > { %798 = vst [vmem:[%s1512_s30 + $0x78] sm:$0xff] %v660_v31  ;;  %v862_v37 = vadd.f32 %v861_v30, %v660_v31  ;;  %v935_v24 = vmul.f32 %v660_v31, %v660_v31  ;;  %v1790_v30 = vpop.f32.mrf.mxu2  ;;  %v1792_v31 = vpop.f32.mrf.mxu3 }
 0x118   : > { %814 = vst [vmem:[%s1512_s30 + $0xf8] sm:$0xff] %v1745_v32 }
 0x119   : > { %v863_v43 = vadd.f32 %v862_v37, %v1576_v34  ;;  %v998_v45 = vadd.f32 %v997_v33, %v935_v24  ;;  %v939_v34 = vmul.f32 %v1597_v50, %v1597_v50  ;;  %829 = vst [vmem:[%s1512_s30 + $0x170] sm:$0xff] %v1790_v30 }
 0x11a   : > { %841 = vst [vmem:[%s1512_s30 + $0x1d0] sm:$0xff] %v1792_v31 }
 0x11b   : > { %v864_v47 = vadd.f32 %v863_v43, %v1585_v38  ;;  %v999_v48 = vadd.f32 %v998_v45, %v936_v35  ;;  %v940_v38 = vmul.f32 %v1606_v56, %v1606_v56  ;;  %v946_v35 = vmul.f32 %v1678_v17, %v1678_v17 }
 0x11d   : > { %v865_v51 = vadd.f32 %v864_v47, %v1590_v44  ;;  %v1000_v52 = vadd.f32 %v999_v48, %v937_v46  ;;  %v947_v46 = vmul.f32 %v1691_v21, %v1691_v21 }
 0x11f   : > { %v866_v54 = vadd.f32 %v865_v51, %v1597_v50  ;;  %v1001_v55 = vadd.f32 %v1000_v52, %v938_v49  ;;  %v941_v50 = vmul.f32 %v1621_v63, %v1621_v63  ;;  %v1810_v48 = vpop.f32.mrf.mxu2  ;;  %v1812_v49 = vpop.f32.mrf.mxu3  ;;  %v948_v51 = vmul.f32 %v1704_v25, %v1704_v25 }
 0x120   : > { %830 = vst [vmem:[%s1512_s30 + $0x178] sm:$0xff] %v1810_v48 }
 0x121   : > { %v867_v61 = vadd.f32 %v866_v54, %v1606_v56  ;;  %v1002_v44 = vadd.f32 %v1001_v55, %v939_v34  ;;  %842 = vst [vmem:[%s1512_s30 + $0x1d8] sm:$0xff] %v1812_v49 }
 0x123   : > { %v868_v4 = vadd.f32 %v867_v61, %v1621_v63  ;;  %v1003_v8 = vadd.f32 %v1002_v44, %v940_v38  ;;  %v944_v63 = vmul.f32 %v1652_v9, %v1652_v9  ;;  %v950_v38 = vmul.f32 %v1732_v57, %v1732_v57 }
 0x125   : > { %v1004_v16 = vadd.f32 %v1003_v8, %v941_v50  ;;  %v869_v28 = vadd.f32 %v868_v4, %v1630_v2  ;;  %v945_v2 = vmul.f32 %v1665_v13, %v1665_v13 }
 0x127   : > { %v870_v56 = vadd.f32 %v869_v28, %v1639_v5  ;;  %v1005_v29 = vadd.f32 %v1004_v16, %v942_v12  ;;  %v1830_v50 = vpop.f32.mrf.mxu3 }
 0x128   : > { %843 = vst [vmem:[%s1512_s30 + $0x1e0] sm:$0xff] %v1830_v50 }
 0x129   : > { %v871_v33 = vadd.f32 %v870_v56, %v1652_v9  ;;  %v1006_v37 = vadd.f32 %v1005_v29, %v943_v20  ;;  %v955_v56 = vmul.f32 %v1633_v3, %v1633_v3 }
 0x12b   : > { %v872_v5 = vadd.f32 %v871_v33, %v1665_v13  ;;  %v1007_v24 = vadd.f32 %v1006_v37, %v944_v63 }
 0x12d   : > { %v873_v43 = vadd.f32 %v872_v5, %v1678_v17  ;;  %v1008_v45 = vadd.f32 %v1007_v24, %v945_v2 }
 0x12f   : > { %v874_v9 = vadd.f32 %v873_v43, %v1691_v21  ;;  %v1009_v47 = vadd.f32 %v1008_v45, %v946_v35  ;;  %v949_v21 = vmul.f32 %v1719_v36, %v1719_v36  ;;  %v959_v43 = vmul.f32 %v1681_v18, %v1681_v18 }
 0x131   : > { %v875_v13 = vadd.f32 %v874_v9, %v1704_v25  ;;  %v1010_v17 = vadd.f32 %v1009_v47, %v947_v46  ;;  %v951_v25 = vmul.f32 %v1745_v32, %v1745_v32 }
 0x133   : > { %v1011_v52 = vadd.f32 %v1010_v17, %v948_v51  ;;  %v876_v34 = vadd.f32 %v875_v13, %v1719_v36  ;;  %v952_v36 = vmul.f32 %v1600_v53, %v1600_v53 }
 0x135   : > { %v1012_v54 = vadd.f32 %v1011_v52, %v949_v21  ;;  %v877_v55 = vadd.f32 %v876_v34, %v1732_v57  ;;  %v953_v57 = vmul.f32 %v1611_v59, %v1611_v59  ;;  %v963_v21 = vmul.f32 %v1735_v62, %v1735_v62 }
 0x137   : > { %v1013_v61 = vadd.f32 %v1012_v54, %v950_v38  ;;  %v878_v44 = vadd.f32 %v877_v55, %v1745_v32  ;;  %v954_v32 = vmul.f32 %v1624_v0, %v1624_v0 }
 0x139   : > { %v879_v4 = vadd.f32 %v878_v44, %v1600_v53  ;;  %v1014_v8 = vadd.f32 %v1013_v61, %v951_v25  ;;  %v1846_v53 = vpop.f32.mrf.mxu3 }
 0x13a   : > { %844 = vst [vmem:[%s1512_s30 + $0x1e8] sm:$0xff] %v1846_v53 }
 0x13b   : > { %v880_v12 = vadd.f32 %v879_v4, %v1611_v59  ;;  %v1015_v16 = vadd.f32 %v1014_v8, %v952_v36  ;;  %v956_v59 = vmul.f32 %v1642_v6, %v1642_v6 }
 0x13d   : > { %v881_v28 = vadd.f32 %v880_v12, %v1624_v0  ;;  %v1016_v20 = vadd.f32 %v1015_v16, %v953_v57  ;;  %v957_v0 = vmul.f32 %v1655_v10, %v1655_v10  ;;  %v967_v57 = vmul.f32 %v1810_v48, %v1810_v48 }
 0x13f   : > { %v882_v29 = vadd.f32 %v881_v28, %v1633_v3  ;;  %v1017_v63 = vadd.f32 %v1016_v20, %v954_v32  ;;  %v958_v3 = vmul.f32 %v1668_v14, %v1668_v14 }
 0x141   : > { %v883_v33 = vadd.f32 %v882_v29, %v1642_v6  ;;  %v1018_v37 = vadd.f32 %v1017_v63, %v955_v56  ;;  %v1862_v6 = vpop.f32.mrf.mxu3 }
 0x142   : > { %845 = vst [vmem:[%s1512_s30 + $0x1f0] sm:$0xff] %v1862_v6 }
 0x143   : > { %v884_v2 = vadd.f32 %v883_v33, %v1655_v10  ;;  %v1019_v5 = vadd.f32 %v1018_v37, %v956_v59  ;;  %v960_v10 = vmul.f32 %v1694_v22, %v1694_v22 }
 0x145   : > { %v1020_v24 = vadd.f32 %v1019_v5, %v957_v0  ;;  %v885_v35 = vadd.f32 %v884_v2, %v1668_v14  ;;  %v961_v14 = vmul.f32 %v1707_v26, %v1707_v26 }
 0x147   : > { %v886_v45 = vadd.f32 %v885_v35, %v1681_v18  ;;  %v1021_v46 = vadd.f32 %v1020_v24, %v958_v3  ;;  %v962_v18 = vmul.f32 %v1722_v41, %v1722_v41 }
 0x149   : > { %v887_v9 = vadd.f32 %v886_v45, %v1694_v22  ;;  %v1022_v47 = vadd.f32 %v1021_v46, %v959_v43  ;;  %v780_v22 = vpop.f32.mrf.mxu3 }
 0x14a   : > { %846 = vst [vmem:[%s1512_s30 + $0x1f8] sm:$0xff] %v780_v22 }
 0x14b   : > { %v888_v13 = vadd.f32 %v887_v9, %v1707_v26  ;;  %v1023_v51 = vadd.f32 %v1022_v47, %v960_v10  ;;  %v964_v26 = vmul.f32 %v1748_v39, %v1748_v39  ;;  %v979_v47 = vmul.f32 %v1812_v49, %v1812_v49 }
 0x14d   : > { %v889_v17 = vadd.f32 %v888_v13, %v1722_v41  ;;  %v1024_v52 = vadd.f32 %v1023_v51, %v961_v14  ;;  %v965_v41 = vmul.f32 %v1770_v58, %v1770_v58  ;;  %v980_v51 = vmul.f32 %v1830_v50, %v1830_v50 }
 0x14f   : > { %v890_v34 = vadd.f32 %v889_v17, %v1735_v62  ;;  %v1025_v54 = vadd.f32 %v1024_v52, %v962_v18  ;;  %v966_v62 = vmul.f32 %v1790_v30, %v1790_v30  ;;  %v981_v17 = vmul.f32 %v1846_v53, %v1846_v53 }
 0x151   : > { %v1026_v55 = vadd.f32 %v1025_v54, %v963_v21  ;;  %v891_v38 = vadd.f32 %v890_v34, %v1748_v39  ;;  %v968_v39 = vmul.f32 %v1644_v7, %v1644_v7  ;;  %v982_v34 = vmul.f32 %v1862_v6, %v1862_v6 }
 0x152   : > { %v983_v54 = vmul.f32 %v780_v22, %v780_v22 }
 0x153   : > { %v1027_v61 = vadd.f32 %v1026_v55, %v964_v26  ;;  %v892_v44 = vadd.f32 %v891_v38, %v1770_v58  ;;  %v969_v58 = vmul.f32 %v1657_v11, %v1657_v11 }
 0x155   : > { %v1028_v25 = vadd.f32 %v1027_v61, %v965_v41  ;;  %v893_v36 = vadd.f32 %v892_v44, %v1790_v30  ;;  %v970_v30 = vmul.f32 %v1670_v15, %v1670_v15 }
 0x157   : > { %v1029_v4 = vadd.f32 %v1028_v25, %v966_v62  ;;  %v894_v8 = vadd.f32 %v893_v36, %v1810_v48  ;;  %v971_v48 = vmul.f32 %v1683_v19, %v1683_v19 }
 0x159   : > { %v895_v12 = vadd.f32 %v894_v8, %v1644_v7  ;;  %v1030_v16 = vadd.f32 %v1029_v4, %v967_v57  ;;  %v972_v7 = vmul.f32 %v1696_v23, %v1696_v23 }
 0x15b   : > { %v896_v32 = vadd.f32 %v895_v12, %v1657_v11  ;;  %v1031_v28 = vadd.f32 %v1030_v16, %v968_v39  ;;  %v973_v11 = vmul.f32 %v1709_v27, %v1709_v27 }
 0x15d   : > { %v897_v20 = vadd.f32 %v896_v32, %v1670_v15  ;;  %v1032_v56 = vadd.f32 %v1031_v28, %v969_v58  ;;  %v974_v15 = vmul.f32 %v1724_v42, %v1724_v42 }
 0x15f   : > { %v898_v29 = vadd.f32 %v897_v20, %v1683_v19  ;;  %v1033_v63 = vadd.f32 %v1032_v56, %v970_v30  ;;  %v975_v19 = vmul.f32 %v1737_v1, %v1737_v1 }
 0x161   : > { %v899_v59 = vadd.f32 %v898_v29, %v1696_v23  ;;  %v1034_v33 = vadd.f32 %v1033_v63, %v971_v48  ;;  %v976_v23 = vmul.f32 %v1750_v40, %v1750_v40 }
 0x163   : > { %v900_v37 = vadd.f32 %v899_v59, %v1709_v27  ;;  %v1035_v0 = vadd.f32 %v1034_v33, %v972_v7  ;;  %v977_v27 = vmul.f32 %v1772_v60, %v1772_v60 }
 0x165   : > { %v1036_v2 = vadd.f32 %v1035_v0, %v973_v11  ;;  %v901_v5 = vadd.f32 %v900_v37, %v1724_v42  ;;  %v978_v42 = vmul.f32 %v1792_v31, %v1792_v31 }
 0x167   : > { %v902_v3 = vadd.f32 %v901_v5, %v1737_v1  ;;  %v1037_v24 = vadd.f32 %v1036_v2, %v974_v15 }
 0x169   : > { %v903_v35 = vadd.f32 %v902_v3, %v1750_v40  ;;  %v1038_v43 = vadd.f32 %v1037_v24, %v975_v19 }
 0x16b   : > { %v904_v45 = vadd.f32 %v903_v35, %v1772_v60  ;;  %v1039_v46 = vadd.f32 %v1038_v43, %v976_v23 }
 0x16d   : > { %v905_v10 = vadd.f32 %v904_v45, %v1792_v31  ;;  %v1040_v9 = vadd.f32 %v1039_v46, %v977_v27 }
 0x16f   : > { %v906_v1 = vadd.f32 %v905_v10, %v1812_v49  ;;  %v1041_v14 = vadd.f32 %v1040_v9, %v978_v42 }
 0x171   : > { %v1042_v40 = vadd.f32 %v1041_v14, %v979_v47  ;;  %v907_v13 = vadd.f32 %v906_v1, %v1830_v50 }
 0x173   : > { %v1043_v60 = vadd.f32 %v1042_v40, %v980_v51  ;;  %v908_v18 = vadd.f32 %v907_v13, %v1846_v53  ;;  %v847_v53 = vld [vmem:[%s1960_s3] sm:$0x1] }
 0x175   : > { %v1044_v31 = vadd.f32 %v1043_v60, %v981_v17  ;;  %v909_v52 = vadd.f32 %v908_v18, %v1862_v6  ;;  %v919_v6 = vld [vmem:[%s1961_s4] sm:$0x1] }
 0x177   : > { %v1045_v49 = vadd.f32 %v1044_v31, %v982_v34  ;;  %v910_v21 = vadd.f32 %v909_v52, %v780_v22 }
 0x179   : > { %v911_v55 = vrot.slane %v910_v21, 4  ;;  %v1046_v38 = vadd.f32 %v1045_v49, %v983_v54 }
 0x17b   : > { %v912_v26 = vadd.f32 %v911_v55, %v910_v21  ;;  %v1047_v61 = vrot.slane %v1046_v38, 4 }
 0x17d   : > { %v913_v50 = vrot.slane %v912_v26, 2  ;;  %v1048_v44 = vadd.f32 %v1047_v61, %v1046_v38 }
 0x17f   : > { %v914_v41 = vadd.f32 %v913_v50, %v912_v26  ;;  %v1049_v25 = vrot.slane %v1048_v44, 2 }
 0x181   : > { %v915_v36 = vrot.slane %v914_v41, 1  ;;  %v1050_v62 = vadd.f32 %v1049_v25, %v1048_v44 }
 0x183   : > { %v916_v4 = vadd.f32 %v915_v36, %v914_v41  ;;  %v1051_v8 = vrot.slane %v1050_v62, 1 }
 0x185   : > { %v917_v22 = vadd.f32 %v916_v4, %v847_v53  ;;  %v1052_v57 = vadd.f32 %v1051_v8, %v1050_v62 }
 0x187   : > { %918 = vst [vmem:[%s1960_s3] sm:$0x1] %v917_v22  ;;  %v1053_v39 = vadd.f32 %v1052_v57, %v919_v6 }
 0x189   : > { %1054 = vst [vmem:[%s1961_s4] sm:$0x1] %v1053_v39 }
 0x18a PF: > { %s15_s17 = sadd.s32 1, %s1455_s17   ;;  %s1962_s15 = smov %s1451_s16 }
 0x18b   : > { %p12_p6 = scmp.ge.s32.totalorder %s15_s17, 6   ;;  %s1963_s16 = smov %s1965_s18 }
 0x18d   :  { %14 = sbr.rel (!%p12_p6) target bundleno = 2 (0x2), region = 81 }

// kernel: generator_forward.17
= control target key start
LH: loop header
LB: loop body
LE: loop exit
PB: predicated region body
PF: predicated region fallthrough
CT: control target
= control target key end

     0   :  { %s2315_s9 = smov 0   ;;  %s2317_s10 = smov 0   ;;  %s2633_s0 = inlined_call_operand.vmem [shape: bf16[4,2048,32], index: 0, kind: input, shape index: {}]   ;;  %s2634_s1 = inlined_call_operand.vmem [shape: bf16[4,32,128], index: 1, kind: input, shape index: {}]   ;;  %s2635_s2 = inlined_call_operand.vmem [shape: f32[4,2048,128], index: 2, kind: output, shape index: {}]  }
   0x1   :  { %s2319_s11 = smov 0   ;;  %s2321_s12 = smov 0  }
   0x2   :  { %s2323_s13 = smov 0  }
   0x3 LB: > { %s21_s14 = sadd.s32 1, %s2290_s11  ;;  %s24_s15 = sadd.s32 1, %s2294_s12  ;;  %s2298_s13 = sphi %s2323_s13, %s12_s13   ;;  %s2294_s12 = sphi %s2321_s12, %s2639_s12   ;;  %s2290_s11 = sphi %s2319_s11, %s2638_s11   ;;  %s2286_s10 = sphi %s2317_s10, %s2637_s10   ;;  %s2282_s9 = sphi %s2315_s9, %s2636_s9  }
   0x4   : > { %p22_p0 = scmp.ge.s32.totalorder %s21_s14, 2  ;;  %p1552_p1 = scmp.ge.s32.totalorder %s2298_s13, 1 }
   0x5   : > { %p143_p2 = scmp.lt.s32.totalorder %s2298_s13, 9 }
   0x6   : > { %s2641_s14 = smov (%p22_p0, %s21_s14), 0  ;;  %s2643_s15 = smov (!%p22_p0, %s24_s15), %s2294_s12 }
   0x7   : > { %p144_p3 = pnand %p1552_p1, %p143_p2  ;;  %p26_p4 = scmp.ge.s32.totalorder %s2643_s15, 4 }
   0x8   : > { %s1553_s16 = sshll.u32 (!%p144_p3), %s2282_s9, 7  ;;  %p179_p5 = scmp.lt.s32.totalorder (!%p144_p3), %s2286_s10, 3 }
   0x9   : > { %s2645_s15 = smov (%p26_p4, %s2643_s15), 0  ;;  %147 = sbr.rel (%p144_p3) target bundleno = 415 (0x19f), region = 28 }
   0xa   : > { %p181_p6 = scmp.lt.s32.totalorder (!%p144_p3), %s1553_s16, 255 }
   0xe   : > { %s2647_s10 = smov (!%p179_p5, %s2286_s10), 3  ;;  %s2649_s16 = smov (!%p181_p6, %s1553_s16), 255  ;;  %vm668_vm0 = vcmask 261120  }
   0xf   : > { %s1554_s17 = sshll.u32 %s2647_s10, 8  ;;  %s1891_s18 = sshll.u32 %s2647_s10, 4 }
  0x10   : > { %s2345_s19 = sadd.s32 %s1554_s17, %s2649_s16  ;;  %s192_s22 = scalar_lea.vmem %s2634_s1, %s1891_s18 }
  0x11   : > { %v1957_v0 = vld [vmem:[%s192_s22 + $0x8] sm:$0xff]  ;;  %s1555_s23 = sshll.u32 %s2345_s19, 2  ;;  %v1956_v1 = vld [vmem:[%s192_s22] sm:$0xff]  ;;  %s1560_s27 = sshll.u32 %s2345_s19, 3 }
  0x12   : > { %867 = vmatpush.bf16.msra.mxu0 %v1957_v0  ;;  %1958 = vmatpush.bf16.msra.mxu1 %v1957_v0  ;;  %s2354_s26 = scalar_lea.vmem %s2633_s0, %s1555_s23  ;;  %s2432_s30 = scalar_lea.vmem %s2635_s2, %s1560_s27 }
  0x13   : > { %1959 = vmatpush.bf16.msra.mxu2 %v1957_v0  ;;  %1960 = vmatpush.bf16.msra.mxu3 %v1957_v0  ;;  %v1892_v2 = vld [vmem:[%s2354_s26] sm:$0xff]  ;;  %v1893_v6 = vld [vmem:[%s2354_s26 + $0x8] sm:$0xff]  ;;  %v1894_v10 = vld [vmem:[%s2354_s26 + $0x10] sm:$0xff] }
  0x14   : > { %v1908_v3 = vld [vmem:[%s2354_s26 + $0x80] sm:$0xff]  ;;  %v1909_v7 = vld [vmem:[%s2354_s26 + $0x88] sm:$0xff]  ;;  %v1910_v11 = vld [vmem:[%s2354_s26 + $0x90] sm:$0xff] }
  0x15   : > { %v1924_v4 = vld [vmem:[%s2354_s26 + $0x100] sm:$0xff]  ;;  %v1925_v8 = vld [vmem:[%s2354_s26 + $0x108] sm:$0xff]  ;;  %v1926_v12 = vld [vmem:[%s2354_s26 + $0x110] sm:$0xff] }
  0x16   : > { %868 = vmatpush.bf16.msra.mxu0 %v1956_v1  ;;  %1961 = vmatpush.bf16.msra.mxu1 %v1956_v1  ;;  %v1940_v5 = vld [vmem:[%s2354_s26 + $0x180] sm:$0xff]  ;;  %v1941_v9 = vld [vmem:[%s2354_s26 + $0x188] sm:$0xff]  ;;  %v1942_v13 = vld [vmem:[%s2354_s26 + $0x190] sm:$0xff] }
  0x17   : > { %1962 = vmatpush.bf16.msra.mxu2 %v1956_v1  ;;  %1963 = vmatpush.bf16.msra.mxu3 %v1956_v1  ;;  %v1895_v14 = vld [vmem:[%s2354_s26 + $0x18] sm:$0xff]  ;;  %v1896_v18 = vld [vmem:[%s2354_s26 + $0x20] sm:$0xff]  ;;  %v1897_v22 = vld [vmem:[%s2354_s26 + $0x28] sm:$0xff] }
  0x18   : > { %v1911_v15 = vld [vmem:[%s2354_s26 + $0x98] sm:$0xff]  ;;  %v1912_v19 = vld [vmem:[%s2354_s26 + $0xa0] sm:$0xff]  ;;  %v1913_v23 = vld [vmem:[%s2354_s26 + $0xa8] sm:$0xff] }
  0x19   : > { %1825 = vmatmul.msk.bf16.vlgmr.msra.gmra.mxu0 %vm668_vm0, %v1892_v2  ;;  %1841 = vmatmul.msk.bf16.vlgmr.msra.gmra.mxu1 %vm668_vm0, %v1908_v3  ;;  %v1927_v16 = vld [vmem:[%s2354_s26 + $0x118] sm:$0xff]  ;;  %v1928_v20 = vld [vmem:[%s2354_s26 + $0x120] sm:$0xff]  ;;  %v1929_v24 = vld [vmem:[%s2354_s26 + $0x128] sm:$0xff] }
  0x1a   : > { %1857 = vmatmul.msk.bf16.vlgmr.msra.gmra.mxu2 %vm668_vm0, %v1924_v4  ;;  %1873 = vmatmul.msk.bf16.vlgmr.msra.gmra.mxu3 %vm668_vm0, %v1940_v5  ;;  %v1943_v17 = vld [vmem:[%s2354_s26 + $0x198] sm:$0xff]  ;;  %v1944_v21 = vld [vmem:[%s2354_s26 + $0x1a0] sm:$0xff]  ;;  %v1945_v25 = vld [vmem:[%s2354_s26 + $0x1a8] sm:$0xff] }
  0x1b   : > { %v1898_v26 = vld [vmem:[%s2354_s26 + $0x30] sm:$0xff]  ;;  %v1899_v30 = vld [vmem:[%s2354_s26 + $0x38] sm:$0xff]  ;;  %v1900_v34 = vld [vmem:[%s2354_s26 + $0x40] sm:$0xff] }
  0x1c   : > { %v1914_v27 = vld [vmem:[%s2354_s26 + $0xb0] sm:$0xff]  ;;  %v1915_v31 = vld [vmem:[%s2354_s26 + $0xb8] sm:$0xff]  ;;  %v1916_v35 = vld [vmem:[%s2354_s26 + $0xc0] sm:$0xff] }
  0x1d   : > { %v1930_v28 = vld [vmem:[%s2354_s26 + $0x130] sm:$0xff]  ;;  %v1931_v32 = vld [vmem:[%s2354_s26 + $0x138] sm:$0xff]  ;;  %v1932_v38 = vld [vmem:[%s2354_s26 + $0x140] sm:$0xff] }
  0x1e   : > { %v1946_v29 = vld [vmem:[%s2354_s26 + $0x1b0] sm:$0xff]  ;;  %v1947_v33 = vld [vmem:[%s2354_s26 + $0x1b8] sm:$0xff]  ;;  %v1948_v39 = vld [vmem:[%s2354_s26 + $0x1c0] sm:$0xff] }
  0x1f   : > { %v1901_v50 = vld [vmem:[%s2354_s26 + $0x48] sm:$0xff] }
  0x20   : > { %v1917_v51 = vld [vmem:[%s2354_s26 + $0xc8] sm:$0xff] }
  0x21   : > { %v1933_v55 = vld [vmem:[%s2354_s26 + $0x148] sm:$0xff] }
  0x22   : > { %v1949_v56 = vld [vmem:[%s2354_s26 + $0x1c8] sm:$0xff] }
  0x29   : > { %1826 = vmatmul.msk.bf16.gmra.mxu0 %vm668_vm0, %v1893_v6  ;;  %1842 = vmatmul.msk.bf16.gmra.mxu1 %vm668_vm0, %v1909_v7  ;;  %v1902_v6 = vld [vmem:[%s2354_s26 + $0x50] sm:$0xff] }
  0x2a   : > { %1858 = vmatmul.msk.bf16.gmra.mxu2 %vm668_vm0, %v1925_v8  ;;  %1874 = vmatmul.msk.bf16.gmra.mxu3 %vm668_vm0, %v1941_v9  ;;  %v1918_v7 = vld [vmem:[%s2354_s26 + $0xd0] sm:$0xff] }
  0x39   : > { %1827 = vmatmul.msk.bf16.gmra.mxu0 %vm668_vm0, %v1894_v10  ;;  %1843 = vmatmul.msk.bf16.gmra.mxu1 %vm668_vm0, %v1910_v11  ;;  %v1934_v11 = vld [vmem:[%s2354_s26 + $0x150] sm:$0xff] }
  0x3a   : > { %1859 = vmatmul.msk.bf16.gmra.mxu2 %vm668_vm0, %v1926_v12  ;;  %1875 = vmatmul.msk.bf16.gmra.mxu3 %vm668_vm0, %v1942_v13  ;;  %v1950_v12 = vld [vmem:[%s2354_s26 + $0x1d0] sm:$0xff] }
  0x49   : > { %1828 = vmatmul.msk.bf16.gmra.mxu0 %vm668_vm0, %v1895_v14  ;;  %1844 = vmatmul.msk.bf16.gmra.mxu1 %vm668_vm0, %v1911_v15 }
  0x4a   : > { %1860 = vmatmul.msk.bf16.gmra.mxu2 %vm668_vm0, %v1927_v16  ;;  %1876 = vmatmul.msk.bf16.gmra.mxu3 %vm668_vm0, %v1943_v17 }
  0x59   : > { %1829 = vmatmul.msk.bf16.gmra.mxu0 %vm668_vm0, %v1896_v18  ;;  %1845 = vmatmul.msk.bf16.gmra.mxu1 %vm668_vm0, %v1912_v19 }
  0x5a   : > { %1861 = vmatmul.msk.bf16.gmra.mxu2 %vm668_vm0, %v1928_v20  ;;  %1877 = vmatmul.msk.bf16.gmra.mxu3 %vm668_vm0, %v1944_v21 }
  0x69   : > { %1830 = vmatmul.msk.bf16.gmra.mxu0 %vm668_vm0, %v1897_v22  ;;  %1846 = vmatmul.msk.bf16.gmra.mxu1 %vm668_vm0, %v1913_v23 }
  0x6a   : > { %1862 = vmatmul.msk.bf16.gmra.mxu2 %vm668_vm0, %v1929_v24  ;;  %1878 = vmatmul.msk.bf16.gmra.mxu3 %vm668_vm0, %v1945_v25 }
  0x79   : > { %1831 = vmatmul.msk.bf16.gmra.mxu0 %vm668_vm0, %v1898_v26  ;;  %1847 = vmatmul.msk.bf16.gmra.mxu1 %vm668_vm0, %v1914_v27  ;;  %v1903_v26 = vld [vmem:[%s2354_s26 + $0x58] sm:$0xff] }
  0x7a   : > { %1863 = vmatmul.msk.bf16.gmra.mxu2 %vm668_vm0, %v1930_v28  ;;  %1879 = vmatmul.msk.bf16.gmra.mxu3 %vm668_vm0, %v1946_v29  ;;  %v1919_v27 = vld [vmem:[%s2354_s26 + $0xd8] sm:$0xff] }
  0x89   : > { %1832 = vmatmul.msk.bf16.gmra.mxu0 %vm668_vm0, %v1899_v30  ;;  %1848 = vmatmul.msk.bf16.gmra.mxu1 %vm668_vm0, %v1915_v31  ;;  %v1935_v31 = vld [vmem:[%s2354_s26 + $0x158] sm:$0xff] }
  0x8a   : > { %1864 = vmatmul.msk.bf16.gmra.mxu2 %vm668_vm0, %v1931_v32  ;;  %1880 = vmatmul.msk.bf16.gmra.mxu3 %vm668_vm0, %v1947_v33  ;;  %v1951_v32 = vld [vmem:[%s2354_s26 + $0x1d8] sm:$0xff] }
  0x96   : > { %v870_v36 = vpop.f32.mrf.mxu0  ;;  %v950_v37 = vpop.f32.mrf.mxu1 }
  0x97   : > { %2004 = vtanh.f32 %v870_v36 }
  0x98   : > { %2006 = vtanh.f32 %v950_v37 }
  0x99   : > { %1833 = vmatmul.msk.bf16.gmra.mxu0 %vm668_vm0, %v1900_v34  ;;  %1849 = vmatmul.msk.bf16.gmra.mxu1 %vm668_vm0, %v1916_v35 }
  0x9a   : > { %1865 = vmatmul.msk.bf16.gmra.mxu2 %vm668_vm0, %v1932_v38  ;;  %1881 = vmatmul.msk.bf16.gmra.mxu3 %vm668_vm0, %v1948_v39 }
  0x9d   : > { %v2005_v40 = vpop.eup %2004  ;;  %v1030_v41 = vpop.f32.mrf.mxu2 }
  0x9e   : > { %v1110_v42 = vpop.f32.mrf.mxu3  ;;  %v2007_v43 = vpop.eup %2006  ;;  %1318 = vst [vmem:[%s2432_s30] sm:$0xff] %v2005_v40  ;;  %2008 = vtanh.f32 %v1030_v41 }
  0x9f   : > { %v872_v44 = vpop.f32.mrf.mxu0  ;;  %v952_v45 = vpop.f32.mrf.mxu1  ;;  %1350 = vst [vmem:[%s2432_s30 + $0x100] sm:$0xff] %v2007_v43  ;;  %2010 = vtanh.f32 %v1110_v42 }
  0xa0   : > { %2012 = vtanh.f32 %v872_v44 }
  0xa1   : > { %2014 = vtanh.f32 %v952_v45 }
  0xa4   : > { %v2009_v46 = vpop.eup %2008 }
  0xa5   : > { %v2011_v47 = vpop.eup %2010  ;;  %1382 = vst [vmem:[%s2432_s30 + $0x200] sm:$0xff] %v2009_v46  ;;  %v1032_v48 = vpop.f32.mrf.mxu2  ;;  %v1904_v46 = vld [vmem:[%s2354_s26 + $0x60] sm:$0xff] }
  0xa6   : > { %v1112_v49 = vpop.f32.mrf.mxu3  ;;  %v2013_v52 = vpop.eup %2012  ;;  %1414 = vst [vmem:[%s2432_s30 + $0x300] sm:$0xff] %v2011_v47  ;;  %2016 = vtanh.f32 %v1032_v48  ;;  %v1920_v47 = vld [vmem:[%s2354_s26 + $0xe0] sm:$0xff] }
  0xa7   : > { %v875_v53 = vpop.f32.mrf.mxu0  ;;  %v955_v54 = vpop.f32.mrf.mxu1  ;;  %1319 = vst [vmem:[%s2432_s30 + $0x8] sm:$0xff] %v2013_v52  ;;  %2018 = vtanh.f32 %v1112_v49  ;;  %v1952_v52 = vld [vmem:[%s2354_s26 + $0x1e0] sm:$0xff] }
  0xa8   : > { %v2015_v57 = vpop.eup %2014  ;;  %2020 = vtanh.f32 %v875_v53 }
  0xa9   : > { %1351 = vst [vmem:[%s2432_s30 + $0x108] sm:$0xff] %v2015_v57  ;;  %2022 = vtanh.f32 %v955_v54  ;;  %1834 = vmatmul.msk.bf16.gmra.mxu0 %vm668_vm0, %v1901_v50  ;;  %1850 = vmatmul.msk.bf16.gmra.mxu1 %vm668_vm0, %v1917_v51  ;;  %v1936_v51 = vld [vmem:[%s2354_s26 + $0x160] sm:$0xff] }
  0xaa   : > { %1866 = vmatmul.msk.bf16.gmra.mxu2 %vm668_vm0, %v1933_v55  ;;  %1882 = vmatmul.msk.bf16.gmra.mxu3 %vm668_vm0, %v1949_v56 }
  0xac   : > { %v2017_v58 = vpop.eup %2016 }
  0xad   : > { %v2019_v59 = vpop.eup %2018  ;;  %1383 = vst [vmem:[%s2432_s30 + $0x208] sm:$0xff] %v2017_v58  ;;  %v1035_v60 = vpop.f32.mrf.mxu2 }
  0xae   : > { %v1115_v61 = vpop.f32.mrf.mxu3  ;;  %v2021_v62 = vpop.eup %2020  ;;  %1415 = vst [vmem:[%s2432_s30 + $0x308] sm:$0xff] %v2019_v59  ;;  %2024 = vtanh.f32 %v1035_v60 }
  0xaf   : > { %v877_v63 = vpop.f32.mrf.mxu0  ;;  %v957_v0 = vpop.f32.mrf.mxu1  ;;  %1320 = vst [vmem:[%s2432_s30 + $0x10] sm:$0xff] %v2021_v62  ;;  %2026 = vtanh.f32 %v1115_v61 }
  0xb0   : > { %v2023_v1 = vpop.eup %2022  ;;  %2028 = vtanh.f32 %v877_v63 }
  0xb1   : > { %1352 = vst [vmem:[%s2432_s30 + $0x110] sm:$0xff] %v2023_v1  ;;  %2030 = vtanh.f32 %v957_v0 }
  0xb4   : > { %v2025_v2 = vpop.eup %2024 }
  0xb5   : > { %v2027_v3 = vpop.eup %2026  ;;  %1384 = vst [vmem:[%s2432_s30 + $0x210] sm:$0xff] %v2025_v2  ;;  %v1037_v4 = vpop.f32.mrf.mxu2  ;;  %v1905_v2 = vld [vmem:[%s2354_s26 + $0x68] sm:$0xff] }
  0xb6   : > { %v1117_v5 = vpop.f32.mrf.mxu3  ;;  %v2029_v8 = vpop.eup %2028  ;;  %1416 = vst [vmem:[%s2432_s30 + $0x310] sm:$0xff] %v2027_v3  ;;  %2032 = vtanh.f32 %v1037_v4  ;;  %v1921_v3 = vld [vmem:[%s2354_s26 + $0xe8] sm:$0xff] }
  0xb7   : > { %v880_v9 = vpop.f32.mrf.mxu0  ;;  %v960_v10 = vpop.f32.mrf.mxu1  ;;  %1321 = vst [vmem:[%s2432_s30 + $0x18] sm:$0xff] %v2029_v8  ;;  %2034 = vtanh.f32 %v1117_v5  ;;  %v1953_v8 = vld [vmem:[%s2354_s26 + $0x1e8] sm:$0xff] }
  0xb8   : > { %v2031_v13 = vpop.eup %2030  ;;  %2036 = vtanh.f32 %v880_v9 }
  0xb9   : > { %1353 = vst [vmem:[%s2432_s30 + $0x118] sm:$0xff] %v2031_v13  ;;  %2038 = vtanh.f32 %v960_v10  ;;  %1835 = vmatmul.msk.bf16.gmra.mxu0 %vm668_vm0, %v1902_v6  ;;  %1851 = vmatmul.msk.bf16.gmra.mxu1 %vm668_vm0, %v1918_v7  ;;  %v1937_v7 = vld [vmem:[%s2354_s26 + $0x168] sm:$0xff] }
  0xba   : > { %1867 = vmatmul.msk.bf16.gmra.mxu2 %vm668_vm0, %v1934_v11  ;;  %1883 = vmatmul.msk.bf16.gmra.mxu3 %vm668_vm0, %v1950_v12 }
  0xbc   : > { %v2033_v14 = vpop.eup %2032 }
  0xbd   : > { %v2035_v15 = vpop.eup %2034  ;;  %1385 = vst [vmem:[%s2432_s30 + $0x218] sm:$0xff] %v2033_v14  ;;  %v1040_v16 = vpop.f32.mrf.mxu2 }
  0xbe   : > { %v1120_v17 = vpop.f32.mrf.mxu3  ;;  %v2037_v18 = vpop.eup %2036  ;;  %1417 = vst [vmem:[%s2432_s30 + $0x318] sm:$0xff] %v2035_v15  ;;  %2040 = vtanh.f32 %v1040_v16 }
  0xbf   : > { %v882_v19 = vpop.f32.mrf.mxu0  ;;  %v962_v20 = vpop.f32.mrf.mxu1  ;;  %1322 = vst [vmem:[%s2432_s30 + $0x20] sm:$0xff] %v2037_v18  ;;  %2042 = vtanh.f32 %v1120_v17 }
  0xc0   : > { %v2039_v21 = vpop.eup %2038  ;;  %2044 = vtanh.f32 %v882_v19 }
  0xc1   : > { %1354 = vst [vmem:[%s2432_s30 + $0x120] sm:$0xff] %v2039_v21  ;;  %2046 = vtanh.f32 %v962_v20 }
  0xc4   : > { %v2041_v22 = vpop.eup %2040 }
  0xc5   : > { %v2043_v23 = vpop.eup %2042  ;;  %1386 = vst [vmem:[%s2432_s30 + $0x220] sm:$0xff] %v2041_v22  ;;  %v1042_v24 = vpop.f32.mrf.mxu2  ;;  %v1906_v22 = vld [vmem:[%s2354_s26 + $0x70] sm:$0xff] }
  0xc6   : > { %v1122_v25 = vpop.f32.mrf.mxu3  ;;  %v2045_v28 = vpop.eup %2044  ;;  %1418 = vst [vmem:[%s2432_s30 + $0x320] sm:$0xff] %v2043_v23  ;;  %2048 = vtanh.f32 %v1042_v24  ;;  %v1922_v23 = vld [vmem:[%s2354_s26 + $0xf0] sm:$0xff] }
  0xc7   : > { %v885_v29 = vpop.f32.mrf.mxu0  ;;  %v965_v30 = vpop.f32.mrf.mxu1  ;;  %1323 = vst [vmem:[%s2432_s30 + $0x28] sm:$0xff] %v2045_v28  ;;  %2050 = vtanh.f32 %v1122_v25  ;;  %v1954_v28 = vld [vmem:[%s2354_s26 + $0x1f0] sm:$0xff] }
  0xc8   : > { %v2047_v33 = vpop.eup %2046  ;;  %2052 = vtanh.f32 %v885_v29 }
  0xc9   : > { %1355 = vst [vmem:[%s2432_s30 + $0x128] sm:$0xff] %v2047_v33  ;;  %2054 = vtanh.f32 %v965_v30  ;;  %1836 = vmatmul.msk.bf16.gmra.mxu0 %vm668_vm0, %v1903_v26  ;;  %1852 = vmatmul.msk.bf16.gmra.mxu1 %vm668_vm0, %v1919_v27  ;;  %v1938_v27 = vld [vmem:[%s2354_s26 + $0x170] sm:$0xff] }
  0xca   : > { %1868 = vmatmul.msk.bf16.gmra.mxu2 %vm668_vm0, %v1935_v31  ;;  %1884 = vmatmul.msk.bf16.gmra.mxu3 %vm668_vm0, %v1951_v32 }
  0xcc   : > { %v2049_v34 = vpop.eup %2048 }
  0xcd   : > { %v2051_v35 = vpop.eup %2050  ;;  %1387 = vst [vmem:[%s2432_s30 + $0x228] sm:$0xff] %v2049_v34  ;;  %v1045_v36 = vpop.f32.mrf.mxu2 }
  0xce   : > { %v1125_v37 = vpop.f32.mrf.mxu3  ;;  %v2053_v38 = vpop.eup %2052  ;;  %1419 = vst [vmem:[%s2432_s30 + $0x328] sm:$0xff] %v2051_v35  ;;  %2056 = vtanh.f32 %v1045_v36 }
  0xcf   : > { %v887_v39 = vpop.f32.mrf.mxu0  ;;  %v967_v40 = vpop.f32.mrf.mxu1  ;;  %1324 = vst [vmem:[%s2432_s30 + $0x30] sm:$0xff] %v2053_v38  ;;  %2058 = vtanh.f32 %v1125_v37 }
  0xd0   : > { %v2055_v41 = vpop.eup %2054  ;;  %2060 = vtanh.f32 %v887_v39 }
  0xd1   : > { %1356 = vst [vmem:[%s2432_s30 + $0x130] sm:$0xff] %v2055_v41  ;;  %2062 = vtanh.f32 %v967_v40 }
  0xd4   : > { %v2057_v42 = vpop.eup %2056 }
  0xd5   : > { %v2059_v43 = vpop.eup %2058  ;;  %1388 = vst [vmem:[%s2432_s30 + $0x230] sm:$0xff] %v2057_v42  ;;  %v1047_v44 = vpop.f32.mrf.mxu2  ;;  %v1907_v42 = vld [vmem:[%s2354_s26 + $0x78] sm:$0xff] }
  0xd6   : > { %v1127_v45 = vpop.f32.mrf.mxu3  ;;  %v2061_v48 = vpop.eup %2060  ;;  %1420 = vst [vmem:[%s2432_s30 + $0x330] sm:$0xff] %v2059_v43  ;;  %2064 = vtanh.f32 %v1047_v44  ;;  %v1923_v43 = vld [vmem:[%s2354_s26 + $0xf8] sm:$0xff] }
  0xd7   : > { %v890_v49 = vpop.f32.mrf.mxu0  ;;  %v970_v50 = vpop.f32.mrf.mxu1  ;;  %1325 = vst [vmem:[%s2432_s30 + $0x38] sm:$0xff] %v2061_v48  ;;  %2066 = vtanh.f32 %v1127_v45  ;;  %v1955_v48 = vld [vmem:[%s2354_s26 + $0x1f8] sm:$0xff] }
  0xd8   : > { %v2063_v53 = vpop.eup %2062  ;;  %2068 = vtanh.f32 %v890_v49 }
  0xd9   : > { %1357 = vst [vmem:[%s2432_s30 + $0x138] sm:$0xff] %v2063_v53  ;;  %2070 = vtanh.f32 %v970_v50  ;;  %1837 = vmatmul.msk.bf16.gmra.mxu0 %vm668_vm0, %v1904_v46  ;;  %1853 = vmatmul.msk.bf16.gmra.mxu1 %vm668_vm0, %v1920_v47  ;;  %v1939_v47 = vld [vmem:[%s2354_s26 + $0x178] sm:$0xff] }
  0xda   : > { %1869 = vmatmul.msk.bf16.gmra.mxu2 %vm668_vm0, %v1936_v51  ;;  %1885 = vmatmul.msk.bf16.gmra.mxu3 %vm668_vm0, %v1952_v52 }
  0xdc   : > { %v2065_v54 = vpop.eup %2064 }
  0xdd   : > { %v2067_v55 = vpop.eup %2066  ;;  %1389 = vst [vmem:[%s2432_s30 + $0x238] sm:$0xff] %v2065_v54  ;;  %v1050_v56 = vpop.f32.mrf.mxu2 }
  0xde   : > { %v1130_v57 = vpop.f32.mrf.mxu3  ;;  %v2069_v58 = vpop.eup %2068  ;;  %1421 = vst [vmem:[%s2432_s30 + $0x338] sm:$0xff] %v2067_v55  ;;  %2072 = vtanh.f32 %v1050_v56 }
  0xdf   : > { %v892_v59 = vpop.f32.mrf.mxu0  ;;  %v972_v60 = vpop.f32.mrf.mxu1  ;;  %1326 = vst [vmem:[%s2432_s30 + $0x40] sm:$0xff] %v2069_v58  ;;  %2074 = vtanh.f32 %v1130_v57 }
  0xe0   : > { %v2071_v61 = vpop.eup %2070  ;;  %2076 = vtanh.f32 %v892_v59 }
  0xe1   : > { %1358 = vst [vmem:[%s2432_s30 + $0x140] sm:$0xff] %v2071_v61  ;;  %2078 = vtanh.f32 %v972_v60 }
  0xe4   : > { %v2073_v62 = vpop.eup %2072 }
  0xe5   : > { %v2075_v63 = vpop.eup %2074  ;;  %1390 = vst [vmem:[%s2432_s30 + $0x240] sm:$0xff] %v2073_v62  ;;  %v1052_v0 = vpop.f32.mrf.mxu2 }
  0xe6   : > { %v1132_v1 = vpop.f32.mrf.mxu3  ;;  %v2077_v4 = vpop.eup %2076  ;;  %1422 = vst [vmem:[%s2432_s30 + $0x340] sm:$0xff] %v2075_v63  ;;  %2080 = vtanh.f32 %v1052_v0 }
  0xe7   : > { %v895_v5 = vpop.f32.mrf.mxu0  ;;  %v975_v6 = vpop.f32.mrf.mxu1  ;;  %1327 = vst [vmem:[%s2432_s30 + $0x48] sm:$0xff] %v2077_v4  ;;  %2082 = vtanh.f32 %v1132_v1 }
  0xe8   : > { %v2079_v9 = vpop.eup %2078  ;;  %2084 = vtanh.f32 %v895_v5 }
  0xe9   : > { %1359 = vst [vmem:[%s2432_s30 + $0x148] sm:$0xff] %v2079_v9  ;;  %2086 = vtanh.f32 %v975_v6  ;;  %1838 = vmatmul.msk.bf16.gmra.mxu0 %vm668_vm0, %v1905_v2  ;;  %1854 = vmatmul.msk.bf16.gmra.mxu1 %vm668_vm0, %v1921_v3 }
  0xea   : > { %1870 = vmatmul.msk.bf16.gmra.mxu2 %vm668_vm0, %v1937_v7  ;;  %1886 = vmatmul.msk.bf16.gmra.mxu3 %vm668_vm0, %v1953_v8 }
  0xec   : > { %v2081_v10 = vpop.eup %2080 }
  0xed   : > { %v2083_v11 = vpop.eup %2082  ;;  %1391 = vst [vmem:[%s2432_s30 + $0x248] sm:$0xff] %v2081_v10  ;;  %v1055_v12 = vpop.f32.mrf.mxu2 }
  0xee   : > { %v1135_v13 = vpop.f32.mrf.mxu3  ;;  %v2085_v14 = vpop.eup %2084  ;;  %1423 = vst [vmem:[%s2432_s30 + $0x348] sm:$0xff] %v2083_v11  ;;  %2088 = vtanh.f32 %v1055_v12 }
  0xef   : > { %v897_v15 = vpop.f32.mrf.mxu0  ;;  %v977_v16 = vpop.f32.mrf.mxu1  ;;  %1328 = vst [vmem:[%s2432_s30 + $0x50] sm:$0xff] %v2085_v14  ;;  %2090 = vtanh.f32 %v1135_v13 }
  0xf0   : > { %v2087_v17 = vpop.eup %2086  ;;  %2092 = vtanh.f32 %v897_v15 }
  0xf1   : > { %1360 = vst [vmem:[%s2432_s30 + $0x150] sm:$0xff] %v2087_v17  ;;  %2094 = vtanh.f32 %v977_v16 }
  0xf4   : > { %v2089_v18 = vpop.eup %2088 }
  0xf5   : > { %v2091_v19 = vpop.eup %2090  ;;  %1392 = vst [vmem:[%s2432_s30 + $0x250] sm:$0xff] %v2089_v18  ;;  %v1057_v20 = vpop.f32.mrf.mxu2 }
  0xf6   : > { %v1137_v21 = vpop.f32.mrf.mxu3  ;;  %v2093_v24 = vpop.eup %2092  ;;  %1424 = vst [vmem:[%s2432_s30 + $0x350] sm:$0xff] %v2091_v19  ;;  %2096 = vtanh.f32 %v1057_v20 }
  0xf7   : > { %v900_v25 = vpop.f32.mrf.mxu0  ;;  %v980_v26 = vpop.f32.mrf.mxu1  ;;  %1329 = vst [vmem:[%s2432_s30 + $0x58] sm:$0xff] %v2093_v24  ;;  %2098 = vtanh.f32 %v1137_v21 }
  0xf8   : > { %v2095_v29 = vpop.eup %2094  ;;  %2100 = vtanh.f32 %v900_v25 }
  0xf9   : > { %1361 = vst [vmem:[%s2432_s30 + $0x158] sm:$0xff] %v2095_v29  ;;  %2102 = vtanh.f32 %v980_v26  ;;  %1839 = vmatmul.msk.bf16.gmra.mxu0 %vm668_vm0, %v1906_v22  ;;  %1855 = vmatmul.msk.bf16.gmra.mxu1 %vm668_vm0, %v1922_v23 }
  0xfa   : > { %1871 = vmatmul.msk.bf16.gmra.mxu2 %vm668_vm0, %v1938_v27  ;;  %1887 = vmatmul.msk.bf16.gmra.mxu3 %vm668_vm0, %v1954_v28 }
  0xfc   : > { %v2097_v30 = vpop.eup %2096 }
  0xfd   : > { %v2099_v31 = vpop.eup %2098  ;;  %1393 = vst [vmem:[%s2432_s30 + $0x258] sm:$0xff] %v2097_v30  ;;  %v1060_v32 = vpop.f32.mrf.mxu2 }
  0xfe   : > { %v1140_v33 = vpop.f32.mrf.mxu3  ;;  %v2101_v34 = vpop.eup %2100  ;;  %1425 = vst [vmem:[%s2432_s30 + $0x358] sm:$0xff] %v2099_v31  ;;  %2104 = vtanh.f32 %v1060_v32 }
  0xff   : > { %v902_v35 = vpop.f32.mrf.mxu0  ;;  %v982_v36 = vpop.f32.mrf.mxu1  ;;  %1330 = vst [vmem:[%s2432_s30 + $0x60] sm:$0xff] %v2101_v34  ;;  %2106 = vtanh.f32 %v1140_v33 }
 0x100   : > { %v2103_v37 = vpop.eup %2102  ;;  %2108 = vtanh.f32 %v902_v35 }
 0x101   : > { %1362 = vst [vmem:[%s2432_s30 + $0x160] sm:$0xff] %v2103_v37  ;;  %2110 = vtanh.f32 %v982_v36 }
 0x104   : > { %v2105_v38 = vpop.eup %2104 }
 0x105   : > { %v2107_v39 = vpop.eup %2106  ;;  %1394 = vst [vmem:[%s2432_s30 + $0x260] sm:$0xff] %v2105_v38  ;;  %v1062_v40 = vpop.f32.mrf.mxu2 }
 0x106   : > { %v1142_v41 = vpop.f32.mrf.mxu3  ;;  %v2109_v44 = vpop.eup %2108  ;;  %1426 = vst [vmem:[%s2432_s30 + $0x360] sm:$0xff] %v2107_v39  ;;  %2112 = vtanh.f32 %v1062_v40 }
 0x107   : > { %v905_v45 = vpop.f32.mrf.mxu0  ;;  %v985_v46 = vpop.f32.mrf.mxu1  ;;  %1331 = vst [vmem:[%s2432_s30 + $0x68] sm:$0xff] %v2109_v44  ;;  %2114 = vtanh.f32 %v1142_v41 }
 0x108   : > { %v2111_v49 = vpop.eup %2110  ;;  %2116 = vtanh.f32 %v905_v45 }
 0x109   : > { %1363 = vst [vmem:[%s2432_s30 + $0x168] sm:$0xff] %v2111_v49  ;;  %2118 = vtanh.f32 %v985_v46  ;;  %1840 = vmatmul.msk.bf16.gmra.mxu0 %vm668_vm0, %v1907_v42  ;;  %1856 = vmatmul.msk.bf16.gmra.mxu1 %vm668_vm0, %v1923_v43 }
 0x10a   : > { %1872 = vmatmul.msk.bf16.gmra.mxu2 %vm668_vm0, %v1939_v47  ;;  %1888 = vmatmul.msk.bf16.gmra.mxu3 %vm668_vm0, %v1955_v48 }
 0x10c   : > { %v2113_v50 = vpop.eup %2112 }
 0x10d   : > { %v2115_v51 = vpop.eup %2114  ;;  %1395 = vst [vmem:[%s2432_s30 + $0x268] sm:$0xff] %v2113_v50  ;;  %v1065_v52 = vpop.f32.mrf.mxu2 }
 0x10e   : > { %v1145_v53 = vpop.f32.mrf.mxu3  ;;  %v2117_v54 = vpop.eup %2116  ;;  %1427 = vst [vmem:[%s2432_s30 + $0x368] sm:$0xff] %v2115_v51  ;;  %2120 = vtanh.f32 %v1065_v52 }
 0x10f   : > { %v907_v55 = vpop.f32.mrf.mxu0  ;;  %v987_v56 = vpop.f32.mrf.mxu1  ;;  %1332 = vst [vmem:[%s2432_s30 + $0x70] sm:$0xff] %v2117_v54  ;;  %2122 = vtanh.f32 %v1145_v53 }
 0x110   : > { %v2119_v57 = vpop.eup %2118  ;;  %2124 = vtanh.f32 %v907_v55 }
 0x111   : > { %1364 = vst [vmem:[%s2432_s30 + $0x170] sm:$0xff] %v2119_v57  ;;  %2126 = vtanh.f32 %v987_v56 }
 0x114   : > { %v2121_v58 = vpop.eup %2120 }
 0x115   : > { %v2123_v59 = vpop.eup %2122  ;;  %1396 = vst [vmem:[%s2432_s30 + $0x270] sm:$0xff] %v2121_v58  ;;  %v1067_v60 = vpop.f32.mrf.mxu2 }
 0x116   : > { %v1147_v61 = vpop.f32.mrf.mxu3  ;;  %v2125_v62 = vpop.eup %2124  ;;  %1428 = vst [vmem:[%s2432_s30 + $0x370] sm:$0xff] %v2123_v59  ;;  %2128 = vtanh.f32 %v1067_v60 }
 0x117   : > { %v910_v63 = vpop.f32.mrf.mxu0  ;;  %v990_v0 = vpop.f32.mrf.mxu1  ;;  %1333 = vst [vmem:[%s2432_s30 + $0x78] sm:$0xff] %v2125_v62  ;;  %2130 = vtanh.f32 %v1147_v61 }
 0x118   : > { %v2127_v1 = vpop.eup %2126  ;;  %2132 = vtanh.f32 %v910_v63 }
 0x119   : > { %1365 = vst [vmem:[%s2432_s30 + $0x178] sm:$0xff] %v2127_v1  ;;  %2134 = vtanh.f32 %v990_v0 }
 0x11c   : > { %v2129_v2 = vpop.eup %2128 }
 0x11d   : > { %v2131_v3 = vpop.eup %2130  ;;  %1397 = vst [vmem:[%s2432_s30 + $0x278] sm:$0xff] %v2129_v2  ;;  %v1070_v4 = vpop.f32.mrf.mxu2 }
 0x11e   : > { %v1150_v5 = vpop.f32.mrf.mxu3  ;;  %v2133_v6 = vpop.eup %2132  ;;  %1429 = vst [vmem:[%s2432_s30 + $0x378] sm:$0xff] %v2131_v3  ;;  %2136 = vtanh.f32 %v1070_v4 }
 0x11f   : > { %v912_v7 = vpop.f32.mrf.mxu0  ;;  %v992_v8 = vpop.f32.mrf.mxu1  ;;  %1334 = vst [vmem:[%s2432_s30 + $0x80] sm:$0xff] %v2133_v6  ;;  %2138 = vtanh.f32 %v1150_v5 }
 0x120   : > { %v2135_v9 = vpop.eup %2134  ;;  %2140 = vtanh.f32 %v912_v7 }
 0x121   : > { %1366 = vst [vmem:[%s2432_s30 + $0x180] sm:$0xff] %v2135_v9  ;;  %2142 = vtanh.f32 %v992_v8 }
 0x124   : > { %v2137_v10 = vpop.eup %2136 }
 0x125   : > { %v2139_v11 = vpop.eup %2138  ;;  %1398 = vst [vmem:[%s2432_s30 + $0x280] sm:$0xff] %v2137_v10  ;;  %v1072_v12 = vpop.f32.mrf.mxu2 }
 0x126   : > { %v1152_v13 = vpop.f32.mrf.mxu3  ;;  %v2141_v14 = vpop.eup %2140  ;;  %1430 = vst [vmem:[%s2432_s30 + $0x380] sm:$0xff] %v2139_v11  ;;  %2144 = vtanh.f32 %v1072_v12 }
 0x127   : > { %v915_v15 = vpop.f32.mrf.mxu0  ;;  %v995_v16 = vpop.f32.mrf.mxu1  ;;  %1335 = vst [vmem:[%s2432_s30 + $0x88] sm:$0xff] %v2141_v14  ;;  %2146 = vtanh.f32 %v1152_v13 }
 0x128   : > { %v2143_v17 = vpop.eup %2142  ;;  %2148 = vtanh.f32 %v915_v15 }
 0x129   : > { %1367 = vst [vmem:[%s2432_s30 + $0x188] sm:$0xff] %v2143_v17  ;;  %2150 = vtanh.f32 %v995_v16 }
 0x12c   : > { %v2145_v18 = vpop.eup %2144 }
 0x12d   : > { %v2147_v19 = vpop.eup %2146  ;;  %1399 = vst [vmem:[%s2432_s30 + $0x288] sm:$0xff] %v2145_v18  ;;  %v1075_v20 = vpop.f32.mrf.mxu2 }
 0x12e   : > { %v1155_v21 = vpop.f32.mrf.mxu3  ;;  %v2149_v22 = vpop.eup %2148  ;;  %1431 = vst [vmem:[%s2432_s30 + $0x388] sm:$0xff] %v2147_v19  ;;  %2152 = vtanh.f32 %v1075_v20 }
 0x12f   : > { %v917_v23 = vpop.f32.mrf.mxu0  ;;  %v997_v24 = vpop.f32.mrf.mxu1  ;;  %1336 = vst [vmem:[%s2432_s30 + $0x90] sm:$0xff] %v2149_v22  ;;  %2154 = vtanh.f32 %v1155_v21 }
 0x130   : > { %v2151_v25 = vpop.eup %2150  ;;  %2156 = vtanh.f32 %v917_v23 }
 0x131   : > { %1368 = vst [vmem:[%s2432_s30 + $0x190] sm:$0xff] %v2151_v25  ;;  %2158 = vtanh.f32 %v997_v24 }
 0x134   : > { %v2153_v26 = vpop.eup %2152 }
 0x135   : > { %v2155_v27 = vpop.eup %2154  ;;  %1400 = vst [vmem:[%s2432_s30 + $0x290] sm:$0xff] %v2153_v26  ;;  %v1077_v28 = vpop.f32.mrf.mxu2 }
 0x136   : > { %v1157_v29 = vpop.f32.mrf.mxu3  ;;  %v2157_v30 = vpop.eup %2156  ;;  %1432 = vst [vmem:[%s2432_s30 + $0x390] sm:$0xff] %v2155_v27  ;;  %2160 = vtanh.f32 %v1077_v28 }
 0x137   : > { %v920_v31 = vpop.f32.mrf.mxu0  ;;  %v1000_v32 = vpop.f32.mrf.mxu1  ;;  %1337 = vst [vmem:[%s2432_s30 + $0x98] sm:$0xff] %v2157_v30  ;;  %2162 = vtanh.f32 %v1157_v29 }
 0x138   : > { %v2159_v33 = vpop.eup %2158  ;;  %2164 = vtanh.f32 %v920_v31 }
 0x139   : > { %1369 = vst [vmem:[%s2432_s30 + $0x198] sm:$0xff] %v2159_v33  ;;  %2166 = vtanh.f32 %v1000_v32 }
 0x13c   : > { %v2161_v34 = vpop.eup %2160 }
 0x13d   : > { %v2163_v35 = vpop.eup %2162  ;;  %1401 = vst [vmem:[%s2432_s30 + $0x298] sm:$0xff] %v2161_v34  ;;  %v1080_v36 = vpop.f32.mrf.mxu2 }
 0x13e   : > { %v1160_v37 = vpop.f32.mrf.mxu3  ;;  %v2165_v38 = vpop.eup %2164  ;;  %1433 = vst [vmem:[%s2432_s30 + $0x398] sm:$0xff] %v2163_v35  ;;  %2168 = vtanh.f32 %v1080_v36 }
 0x13f   : > { %v922_v39 = vpop.f32.mrf.mxu0  ;;  %v1002_v40 = vpop.f32.mrf.mxu1  ;;  %1338 = vst [vmem:[%s2432_s30 + $0xa0] sm:$0xff] %v2165_v38  ;;  %2170 = vtanh.f32 %v1160_v37 }
 0x140   : > { %v2167_v41 = vpop.eup %2166  ;;  %2172 = vtanh.f32 %v922_v39 }
 0x141   : > { %1370 = vst [vmem:[%s2432_s30 + $0x1a0] sm:$0xff] %v2167_v41  ;;  %2174 = vtanh.f32 %v1002_v40 }
 0x144   : > { %v2169_v42 = vpop.eup %2168 }
 0x145   : > { %v2171_v43 = vpop.eup %2170  ;;  %1402 = vst [vmem:[%s2432_s30 + $0x2a0] sm:$0xff] %v2169_v42  ;;  %v1082_v44 = vpop.f32.mrf.mxu2 }
 0x146   : > { %v1162_v45 = vpop.f32.mrf.mxu3  ;;  %v2173_v46 = vpop.eup %2172  ;;  %1434 = vst [vmem:[%s2432_s30 + $0x3a0] sm:$0xff] %v2171_v43  ;;  %2176 = vtanh.f32 %v1082_v44 }
 0x147   : > { %v925_v47 = vpop.f32.mrf.mxu0  ;;  %v1005_v48 = vpop.f32.mrf.mxu1  ;;  %1339 = vst [vmem:[%s2432_s30 + $0xa8] sm:$0xff] %v2173_v46  ;;  %2178 = vtanh.f32 %v1162_v45 }
 0x148   : > { %v2175_v49 = vpop.eup %2174  ;;  %2180 = vtanh.f32 %v925_v47 }
 0x149   : > { %1371 = vst [vmem:[%s2432_s30 + $0x1a8] sm:$0xff] %v2175_v49  ;;  %2182 = vtanh.f32 %v1005_v48 }
 0x14c   : > { %v2177_v50 = vpop.eup %2176 }
 0x14d   : > { %v2179_v51 = vpop.eup %2178  ;;  %1403 = vst [vmem:[%s2432_s30 + $0x2a8] sm:$0xff] %v2177_v50  ;;  %v1085_v52 = vpop.f32.mrf.mxu2 }
 0x14e   : > { %v1165_v53 = vpop.f32.mrf.mxu3  ;;  %v2181_v54 = vpop.eup %2180  ;;  %1435 = vst [vmem:[%s2432_s30 + $0x3a8] sm:$0xff] %v2179_v51  ;;  %2184 = vtanh.f32 %v1085_v52 }
 0x14f   : > { %v927_v55 = vpop.f32.mrf.mxu0  ;;  %v1007_v56 = vpop.f32.mrf.mxu1  ;;  %1340 = vst [vmem:[%s2432_s30 + $0xb0] sm:$0xff] %v2181_v54  ;;  %2186 = vtanh.f32 %v1165_v53 }
 0x150   : > { %v2183_v57 = vpop.eup %2182  ;;  %2188 = vtanh.f32 %v927_v55 }
 0x151   : > { %1372 = vst [vmem:[%s2432_s30 + $0x1b0] sm:$0xff] %v2183_v57  ;;  %2190 = vtanh.f32 %v1007_v56 }
 0x154   : > { %v2185_v58 = vpop.eup %2184 }
 0x155   : > { %v2187_v59 = vpop.eup %2186  ;;  %1404 = vst [vmem:[%s2432_s30 + $0x2b0] sm:$0xff] %v2185_v58  ;;  %v1087_v60 = vpop.f32.mrf.mxu2 }
 0x156   : > { %v1167_v61 = vpop.f32.mrf.mxu3  ;;  %v2189_v62 = vpop.eup %2188  ;;  %1436 = vst [vmem:[%s2432_s30 + $0x3b0] sm:$0xff] %v2187_v59  ;;  %2192 = vtanh.f32 %v1087_v60 }
 0x157   : > { %v930_v63 = vpop.f32.mrf.mxu0  ;;  %v1010_v0 = vpop.f32.mrf.mxu1  ;;  %1341 = vst [vmem:[%s2432_s30 + $0xb8] sm:$0xff] %v2189_v62  ;;  %2194 = vtanh.f32 %v1167_v61 }
 0x158   : > { %v2191_v1 = vpop.eup %2190  ;;  %2196 = vtanh.f32 %v930_v63 }
 0x159   : > { %1373 = vst [vmem:[%s2432_s30 + $0x1b8] sm:$0xff] %v2191_v1  ;;  %2198 = vtanh.f32 %v1010_v0 }
 0x15c   : > { %v2193_v2 = vpop.eup %2192 }
 0x15d   : > { %v2195_v3 = vpop.eup %2194  ;;  %1405 = vst [vmem:[%s2432_s30 + $0x2b8] sm:$0xff] %v2193_v2  ;;  %v1090_v4 = vpop.f32.mrf.mxu2 }
 0x15e   : > { %v1170_v5 = vpop.f32.mrf.mxu3  ;;  %v2197_v6 = vpop.eup %2196  ;;  %1437 = vst [vmem:[%s2432_s30 + $0x3b8] sm:$0xff] %v2195_v3  ;;  %2200 = vtanh.f32 %v1090_v4 }
 0x15f   : > { %v932_v7 = vpop.f32.mrf.mxu0  ;;  %v1012_v8 = vpop.f32.mrf.mxu1  ;;  %1342 = vst [vmem:[%s2432_s30 + $0xc0] sm:$0xff] %v2197_v6  ;;  %2202 = vtanh.f32 %v1170_v5 }
 0x160   : > { %v2199_v9 = vpop.eup %2198  ;;  %2204 = vtanh.f32 %v932_v7 }
 0x161   : > { %1374 = vst [vmem:[%s2432_s30 + $0x1c0] sm:$0xff] %v2199_v9  ;;  %2206 = vtanh.f32 %v1012_v8 }
 0x164   : > { %v2201_v10 = vpop.eup %2200 }
 0x165   : > { %v2203_v11 = vpop.eup %2202  ;;  %1406 = vst [vmem:[%s2432_s30 + $0x2c0] sm:$0xff] %v2201_v10  ;;  %v1092_v12 = vpop.f32.mrf.mxu2 }
 0x166   : > { %v1172_v13 = vpop.f32.mrf.mxu3  ;;  %v2205_v14 = vpop.eup %2204  ;;  %1438 = vst [vmem:[%s2432_s30 + $0x3c0] sm:$0xff] %v2203_v11  ;;  %2208 = vtanh.f32 %v1092_v12 }
 0x167   : > { %v935_v15 = vpop.f32.mrf.mxu0  ;;  %v1015_v16 = vpop.f32.mrf.mxu1  ;;  %1343 = vst [vmem:[%s2432_s30 + $0xc8] sm:$0xff] %v2205_v14  ;;  %2210 = vtanh.f32 %v1172_v13 }
 0x168   : > { %v2207_v17 = vpop.eup %2206  ;;  %2212 = vtanh.f32 %v935_v15 }
 0x169   : > { %1375 = vst [vmem:[%s2432_s30 + $0x1c8] sm:$0xff] %v2207_v17  ;;  %2214 = vtanh.f32 %v1015_v16 }
 0x16c   : > { %v2209_v18 = vpop.eup %2208 }
 0x16d   : > { %v2211_v19 = vpop.eup %2210  ;;  %1407 = vst [vmem:[%s2432_s30 + $0x2c8] sm:$0xff] %v2209_v18  ;;  %v1095_v20 = vpop.f32.mrf.mxu2 }
 0x16e   : > { %v1175_v21 = vpop.f32.mrf.mxu3  ;;  %v2213_v22 = vpop.eup %2212  ;;  %1439 = vst [vmem:[%s2432_s30 + $0x3c8] sm:$0xff] %v2211_v19  ;;  %2216 = vtanh.f32 %v1095_v20 }
 0x16f   : > { %v937_v23 = vpop.f32.mrf.mxu0  ;;  %v1017_v24 = vpop.f32.mrf.mxu1  ;;  %1344 = vst [vmem:[%s2432_s30 + $0xd0] sm:$0xff] %v2213_v22  ;;  %2218 = vtanh.f32 %v1175_v21 }
 0x170   : > { %v2215_v25 = vpop.eup %2214  ;;  %2220 = vtanh.f32 %v937_v23 }
 0x171   : > { %1376 = vst [vmem:[%s2432_s30 + $0x1d0] sm:$0xff] %v2215_v25  ;;  %2222 = vtanh.f32 %v1017_v24 }
 0x174   : > { %v2217_v26 = vpop.eup %2216 }
 0x175   : > { %v2219_v27 = vpop.eup %2218  ;;  %1408 = vst [vmem:[%s2432_s30 + $0x2d0] sm:$0xff] %v2217_v26  ;;  %v1097_v28 = vpop.f32.mrf.mxu2 }
 0x176   : > { %v1177_v29 = vpop.f32.mrf.mxu3  ;;  %v2221_v30 = vpop.eup %2220  ;;  %1440 = vst [vmem:[%s2432_s30 + $0x3d0] sm:$0xff] %v2219_v27  ;;  %2224 = vtanh.f32 %v1097_v28 }
 0x177   : > { %v940_v31 = vpop.f32.mrf.mxu0  ;;  %v1020_v32 = vpop.f32.mrf.mxu1  ;;  %1345 = vst [vmem:[%s2432_s30 + $0xd8] sm:$0xff] %v2221_v30  ;;  %2226 = vtanh.f32 %v1177_v29 }
 0x178   : > { %v2223_v33 = vpop.eup %2222  ;;  %2228 = vtanh.f32 %v940_v31 }
 0x179   : > { %1377 = vst [vmem:[%s2432_s30 + $0x1d8] sm:$0xff] %v2223_v33  ;;  %2230 = vtanh.f32 %v1020_v32 }
 0x17c   : > { %v2225_v34 = vpop.eup %2224 }
 0x17d   : > { %v2227_v35 = vpop.eup %2226  ;;  %1409 = vst [vmem:[%s2432_s30 + $0x2d8] sm:$0xff] %v2225_v34  ;;  %v1100_v36 = vpop.f32.mrf.mxu2 }
 0x17e   : > { %v1180_v37 = vpop.f32.mrf.mxu3  ;;  %v2229_v38 = vpop.eup %2228  ;;  %1441 = vst [vmem:[%s2432_s30 + $0x3d8] sm:$0xff] %v2227_v35  ;;  %2232 = vtanh.f32 %v1100_v36 }
 0x17f   : > { %v942_v39 = vpop.f32.mrf.mxu0  ;;  %v1022_v40 = vpop.f32.mrf.mxu1  ;;  %1346 = vst [vmem:[%s2432_s30 + $0xe0] sm:$0xff] %v2229_v38  ;;  %2234 = vtanh.f32 %v1180_v37 }
 0x180   : > { %v2231_v41 = vpop.eup %2230  ;;  %2236 = vtanh.f32 %v942_v39 }
 0x181   : > { %1378 = vst [vmem:[%s2432_s30 + $0x1e0] sm:$0xff] %v2231_v41  ;;  %2238 = vtanh.f32 %v1022_v40 }
 0x184   : > { %v2233_v42 = vpop.eup %2232 }
 0x185   : > { %v2235_v43 = vpop.eup %2234  ;;  %1410 = vst [vmem:[%s2432_s30 + $0x2e0] sm:$0xff] %v2233_v42  ;;  %v1102_v44 = vpop.f32.mrf.mxu2 }
 0x186   : > { %v1182_v45 = vpop.f32.mrf.mxu3  ;;  %v2237_v46 = vpop.eup %2236  ;;  %1442 = vst [vmem:[%s2432_s30 + $0x3e0] sm:$0xff] %v2235_v43  ;;  %2240 = vtanh.f32 %v1102_v44 }
 0x187   : > { %v945_v47 = vpop.f32.mrf.mxu0  ;;  %v1025_v48 = vpop.f32.mrf.mxu1  ;;  %1347 = vst [vmem:[%s2432_s30 + $0xe8] sm:$0xff] %v2237_v46  ;;  %2242 = vtanh.f32 %v1182_v45 }
 0x188   : > { %v2239_v49 = vpop.eup %2238  ;;  %2244 = vtanh.f32 %v945_v47 }
 0x189   : > { %1379 = vst [vmem:[%s2432_s30 + $0x1e8] sm:$0xff] %v2239_v49  ;;  %2246 = vtanh.f32 %v1025_v48 }
 0x18c   : > { %v2241_v50 = vpop.eup %2240 }
 0x18d   : > { %v2243_v51 = vpop.eup %2242  ;;  %1411 = vst [vmem:[%s2432_s30 + $0x2e8] sm:$0xff] %v2241_v50  ;;  %v1105_v52 = vpop.f32.mrf.mxu2 }
 0x18e   : > { %v1185_v53 = vpop.f32.mrf.mxu3  ;;  %v2245_v54 = vpop.eup %2244  ;;  %1443 = vst [vmem:[%s2432_s30 + $0x3e8] sm:$0xff] %v2243_v51  ;;  %2248 = vtanh.f32 %v1105_v52 }
 0x18f   : > { %v947_v55 = vpop.f32.mrf.mxu0  ;;  %v1027_v56 = vpop.f32.mrf.mxu1  ;;  %1348 = vst [vmem:[%s2432_s30 + $0xf0] sm:$0xff] %v2245_v54  ;;  %2250 = vtanh.f32 %v1185_v53 }
 0x190   : > { %v2247_v57 = vpop.eup %2246  ;;  %2252 = vtanh.f32 %v947_v55 }
 0x191   : > { %1380 = vst [vmem:[%s2432_s30 + $0x1f0] sm:$0xff] %v2247_v57  ;;  %2254 = vtanh.f32 %v1027_v56 }
 0x194   : > { %v2249_v58 = vpop.eup %2248 }
 0x195   : > { %v2251_v59 = vpop.eup %2250  ;;  %1412 = vst [vmem:[%s2432_s30 + $0x2f0] sm:$0xff] %v2249_v58  ;;  %v1107_v60 = vpop.f32.mrf.mxu2 }
 0x196   : > { %v1187_v61 = vpop.f32.mrf.mxu3  ;;  %v2253_v62 = vpop.eup %2252  ;;  %1444 = vst [vmem:[%s2432_s30 + $0x3f0] sm:$0xff] %v2251_v59  ;;  %2256 = vtanh.f32 %v1107_v60 }
 0x197   : > { %v2255_v63 = vpop.eup %2254  ;;  %1349 = vst [vmem:[%s2432_s30 + $0xf8] sm:$0xff] %v2253_v62  ;;  %2258 = vtanh.f32 %v1187_v61 }
 0x198   : > { %1381 = vst [vmem:[%s2432_s30 + $0x1f8] sm:$0xff] %v2255_v63 }
 0x19c   : > { %v2257_v0 = vpop.eup %2256 }
 0x19d   : > { %v2259_v1 = vpop.eup %2258  ;;  %1413 = vst [vmem:[%s2432_s30 + $0x2f8] sm:$0xff] %v2257_v0 }
 0x19e   : > { %1445 = vst [vmem:[%s2432_s30 + $0x3f8] sm:$0xff] %v2259_v1 }
 0x19f PF: > { %s12_s13 = sadd.s32 1, %s2298_s13   ;;  %s2636_s9 = smov %s2290_s11 }
 0x1a0   : > { %p9_p7 = scmp.ge.s32.totalorder %s12_s13, 10   ;;  %s2637_s10 = smov %s2294_s12 }
 0x1a1   : > { %s2638_s11 = smov %s2641_s14  ;;  %s2639_s12 = smov %s2645_s15 }
 0x1a2   :  { %11 = sbr.rel (!%p9_p7) target bundleno = 3 (0x3), region = 61 }

</bundles_post_ra>
